<compile_context>
chip_gen: v7x
topology: tpu7x:2x2x1
jax: 0.10.0
libtpu: 0.0.40
codegen_flags: <defaults>
</compile_context>

<pallas_src>
import functools
import math

import jax
import jax.numpy as jnp
from jax.experimental import pallas as pl
from jax.experimental.pallas import tpu as pltpu


def _round_up(x: int, m: int) -> int:
    return ((x + m - 1) // m) * m


def _layernorm(x, g, b, eps):
    mu = jnp.mean(x, axis=-1, keepdims=True)
    var = jnp.mean(jnp.square(x - mu), axis=-1, keepdims=True)
    return (x - mu) * jax.lax.rsqrt(var + eps) * g + b


# ----------------------------------------------------------------------------
# Fused LayerNorm -> Linear -> activation head kernel (cat / out / bbox)
# ----------------------------------------------------------------------------
@functools.lru_cache(maxsize=None)
def _make_ln_linear_kernel(act: str, eps: float = 1e-5):
    def kernel(x_ref, g_ref, be_ref, w_ref, b_ref, o_ref):
        x = _layernorm(x_ref[...], g_ref[...], be_ref[...], eps)          # f32
        y = jnp.dot(x.astype(jnp.bfloat16), w_ref[...],                   # bf16 MXU
                    preferred_element_type=jnp.float32) + b_ref[...]
        if act == "relu":
            y = jnp.maximum(y, 0.0)
        elif act == "sigmoid":
            y = jax.nn.sigmoid(y)
        o_ref[...] = y
    return kernel


def ln_linear(x, gamma, beta, w, b, *, act="id", block_rows=256):
    """x: [..., d_in] -> [..., d_out]; big row tiles, lane-dense padded output."""
    d = x.shape[-1]
    h = w.shape[-1]
    lead = x.shape[:-1]
    rows = math.prod(lead) if lead else 1
    x2 = x.reshape(rows, d).astype(jnp.float32)

    # Lane-dense output: pad feature width to a multiple of 128 (sliced off later).
    h_pad = _round_up(h, 128)
    if h_pad != h:
        w = jnp.pad(w, ((0, 0), (0, h_pad - h)))
        b = jnp.pad(b, ((0, h_pad - h),))

    tm = _round_up(rows, 8) if rows <= block_rows else block_rows
    rows_p = _round_up(rows, tm)
    if rows_p != rows:
        x2 = jnp.pad(x2, ((0, rows_p - rows), (0, 0)))

    out = pl.pallas_call(
        _make_ln_linear_kernel(act),
        out_shape=jax.ShapeDtypeStruct((rows_p, h_pad), jnp.float32),
        grid=(rows_p // tm,),
        in_specs=[
            pl.BlockSpec((tm, d), lambda i: (i, 0)),
            pl.BlockSpec((1, d), lambda i: (0, 0)),
            pl.BlockSpec((1, d), lambda i: (0, 0)),
            pl.BlockSpec((d, h_pad), lambda i: (0, 0)),
            pl.BlockSpec((1, h_pad), lambda i: (0, 0)),
        ],
        out_specs=pl.BlockSpec((tm, h_pad), lambda i: (i, 0)),
        compiler_params=pltpu.CompilerParams(dimension_semantics=("parallel",)),
    )(x2,
      gamma.reshape(1, d).astype(jnp.float32),
      beta.reshape(1, d).astype(jnp.float32),
      w.astype(jnp.bfloat16),
      b.reshape(1, h_pad).astype(jnp.float32))
    return out[:rows, :h].reshape(*lead, h)


# ----------------------------------------------------------------------------
# Fully fused transformer Block kernel:
#   x += causal MHA(x,x,x); x += MHA(x,y,y); x += Linears(x)
# One grid step = one batch element; everything stays in VMEM / vregs.
# ----------------------------------------------------------------------------
@functools.lru_cache(maxsize=None)
def _make_block_kernel(nhead: int, eps: float = 1e-5):
    def kernel(x_ref, y_ref,
               wq1_ref, bq1_ref, wkv1_ref, bkv1_ref, wo1_ref, bo1_ref,
               wq2_ref, bq2_ref, wkv2_ref, bkv2_ref, wo2_ref, bo2_ref,
               g1_ref, be1_ref, w1_ref, b1_ref,
               g2_ref, be2_ref, w2_ref, b2_ref,
               o_ref):
        x = x_ref[0]                                      # [Tq, D] f32
        y = y_ref[0]                                      # [Tk, D] f32
        tq, d = x.shape
        dh = d // nhead
        scale = 1.0 / math.sqrt(dh)

        # Causal mask for self-attention (hoisted, reused by every head).
        row = jax.lax.broadcasted_iota(jnp.int32, (tq, tq), 0)
        col = jax.lax.broadcasted_iota(jnp.int32, (tq, tq), 1)
        causal_keep = row >= col

        def mha(xq, xkv, wq_ref, bq_ref, wkv_ref, bkv_ref, wo_ref, bo_ref, mask):
            # Projections: bf16 MXU inputs, f32 accumulation / bias add.
            q = jnp.dot(xq.astype(jnp.bfloat16), wq_ref[...],
                        preferred_element_type=jnp.float32) + bq_ref[...]
            kv = jnp.dot(xkv.astype(jnp.bfloat16), wkv_ref[...],
                         preferred_element_type=jnp.float32) + bkv_ref[...]
            k = kv[:, :d]
            v = kv[:, d:]
            wo = wo_ref[...]                              # bf16 [D, D]
            out = jnp.broadcast_to(bo_ref[...], (tq, d)).astype(jnp.float32)
            for h in range(nhead):                        # static unrolled loop
                sl = slice(h * dh, (h + 1) * dh)
                qh = q[:, sl].astype(jnp.bfloat16)
                kh = k[:, sl].astype(jnp.bfloat16)
                vh = v[:, sl].astype(jnp.bfloat16)
                s = jax.lax.dot_general(
                    qh, kh, (((1,), (1,)), ((), ())),
                    preferred_element_type=jnp.float32) * scale
                if mask is not None:
                    s = jnp.where(mask, s, -1e30)
                m = jnp.max(s, axis=-1, keepdims=True)
                p = jnp.exp(s - m)                        # f32 softmax
                p = p * pl.reciprocal(jnp.sum(p, axis=-1, keepdims=True),
                                      approx=True)
                ctx = jnp.dot(p.astype(jnp.bfloat16), vh,
                              preferred_element_type=jnp.float32)   # [Tq, dh]
                # Output projection accumulated per head.
                out = out + jnp.dot(ctx.astype(jnp.bfloat16), wo[sl, :],
                                    preferred_element_type=jnp.float32)
            return out

        # Self-attention (causal) + residual.
        x = x + mha(x, x, wq1_ref, bq1_ref, wkv1_ref, bkv1_ref,
                    wo1_ref, bo1_ref, causal_keep)
        # Cross-attention over image memory + residual.
        x = x + mha(x, y, wq2_ref, bq2_ref, wkv2_ref, bkv2_ref,
                    wo2_ref, bo2_ref, None)
        # FFN: LN -> Linear -> ReLU -> LN -> Linear, + residual.
        h = _layernorm(x, g1_ref[...], be1_ref[...], eps)
        h = jnp.dot(h.astype(jnp.bfloat16), w1_ref[...],
                    preferred_element_type=jnp.float32) + b1_ref[...]
        h = jnp.maximum(h, 0.0)
        h = _layernorm(h, g2_ref[...], be2_ref[...], eps)
        h = jnp.dot(h.astype(jnp.bfloat16), w2_ref[...],
                    preferred_element_type=jnp.float32) + b2_ref[...]
        o_ref[0] = x + h
    return kernel


def block_fused(x, y, bp, *, nhead):
    """One decoder Block (self-attn + cross-attn + FFN, all residuals) fused."""
    b, t, d = x.shape
    n = y.shape[1]
    d_mid = bp["norm1"]["w"].shape[1]

    def att_args(p):
        return (p["wq"].astype(jnp.bfloat16),
                p["bq"].reshape(1, d).astype(jnp.float32),
                jnp.concatenate([p["wk"], p["wv"]], axis=1).astype(jnp.bfloat16),
                jnp.concatenate([p["bk"], p["bv"]]).reshape(1, 2 * d)
                    .astype(jnp.float32),
                p["wo"].astype(jnp.bfloat16),
                p["bo"].reshape(1, d).astype(jnp.float32))

    def att_specs():
        return [pl.BlockSpec((d, d), lambda i: (0, 0)),
                pl.BlockSpec((1, d), lambda i: (0, 0)),
                pl.BlockSpec((d, 2 * d), lambda i: (0, 0)),
                pl.BlockSpec((1, 2 * d), lambda i: (0, 0)),
                pl.BlockSpec((d, d), lambda i: (0, 0)),
                pl.BlockSpec((1, d), lambda i: (0, 0))]

    ffn_args = (bp["norm1"]["g"].reshape(1, d).astype(jnp.float32),
                bp["norm1"]["be"].reshape(1, d).astype(jnp.float32),
                bp["norm1"]["w"].astype(jnp.bfloat16),
                bp["norm1"]["b"].reshape(1, d_mid).astype(jnp.float32),
                bp["norm2"]["g"].reshape(1, d_mid).astype(jnp.float32),
                bp["norm2"]["be"].reshape(1, d_mid).astype(jnp.float32),
                bp["norm2"]["w"].astype(jnp.bfloat16),
                bp["norm2"]["b"].reshape(1, d).astype(jnp.float32))
    ffn_specs = [pl.BlockSpec((1, d), lambda i: (0, 0)),
                 pl.BlockSpec((1, d), lambda i: (0, 0)),
                 pl.BlockSpec((d, d_mid), lambda i: (0, 0)),
                 pl.BlockSpec((1, d_mid), lambda i: (0, 0)),
                 pl.BlockSpec((1, d_mid), lambda i: (0, 0)),
                 pl.BlockSpec((1, d_mid), lambda i: (0, 0)),
                 pl.BlockSpec((d_mid, d), lambda i: (0, 0)),
                 pl.BlockSpec((1, d), lambda i: (0, 0))]

    in_specs = ([pl.BlockSpec((1, t, d), lambda i: (i, 0, 0)),
                 pl.BlockSpec((1, n, d), lambda i: (i, 0, 0))]
                + att_specs() + att_specs() + ffn_specs)
    args = ((x.astype(jnp.float32), y.astype(jnp.float32))
            + att_args(bp["att1"]) + att_args(bp["att2"]) + ffn_args)

    return pl.pallas_call(
        _make_block_kernel(nhead),
        out_shape=jax.ShapeDtypeStruct((b, t, d), jnp.float32),
        grid=(b,),
        in_specs=in_specs,
        out_specs=pl.BlockSpec((1, t, d), lambda i: (i, 0, 0)),
        compiler_params=pltpu.CompilerParams(dimension_semantics=("parallel",)),
    )(*args)


# ----------------------------------------------------------------------------
# Model glue (plain JAX): embeddings, PE, grid gather
# ----------------------------------------------------------------------------
def sinusoidal_pe(t, d):
    assert d % 2 == 0, "d_model must be even for the sinusoidal PE"
    pos = jnp.arange(t, dtype=jnp.float32)[:, None]
    inv = 1.0 / (10000.0 ** (jnp.arange(0, d, 2, dtype=jnp.float32) / d))
    ang = pos * inv[None, :]
    pe = jnp.zeros((t, d), jnp.float32)
    pe = pe.at[:, 0::2].set(jnp.sin(ang))
    pe = pe.at[:, 1::2].set(jnp.cos(ang))
    return pe


def decoder_fwd(p, img, seq, aux, *, sep, nhead):
    b, t = seq.shape
    d_model = p["emb"].shape[1]
    # idx = cumsum(seq == SEP); one-hot scatter @ aux  ==  gather aux rows.
    idx = jnp.cumsum((seq == sep).astype(jnp.int32), axis=1)
    idx = jnp.minimum(idx, aux.shape[1] - 1)
    sel = jnp.take_along_axis(aux.astype(jnp.float32), idx[:, :, None], axis=1)
    emb = jnp.take(p["emb"], seq, axis=0)
    mix = jnp.concatenate([emb, sel], axis=-1)
    x = ln_linear(mix, p["cat"]["g"], p["cat"]["be"], p["cat"]["w"], p["cat"]["b"])
    x = x + sinusoidal_pe(t, d_model)[None]
    for bp in p["blocks"]:
        x = block_fused(x, img, bp, nhead=nhead)
    hid = x
    out = ln_linear(hid, p["out"]["g"], p["out"]["be"], p["out"]["w"], p["out"]["b"])
    return hid, out


def make_grid(hid, text, soc):
    """Rows of hid where text token is in SOC, packed to the front, zero-padded."""
    mask = jnp.isin(text, soc)                     # [B, T]
    t = text.shape[1]

    def per_batch(h, m):
        key = jnp.where(m, 0, 1) * t + jnp.arange(t)   # selected rows first, stable
        order = jnp.argsort(key)
        gathered = h[order]
        keep = jnp.arange(t) < jnp.sum(m)
        return jnp.where(keep[:, None], gathered, 0.0)

    return jax.vmap(per_batch)(hid, mask)


def table_decoder_fwd(params, img, html, back, cell, *,
                      nhead, eos_html, sep_cell, soc_html):
    b = img.shape[0]
    ltor = jnp.broadcast_to(jnp.array([[1.0, 0.0]], jnp.float32), (b, 1, 2))
    rtol = jnp.broadcast_to(jnp.array([[0.0, 1.0]], jnp.float32), (b, 1, 2))

    # html (L->R) and back (R->L) share the same decoder weights: batch them
    # into a single pass (2B) to halve kernel launches and double per-step work.
    seq2 = jnp.concatenate([html[:, :-1], back[:, :-1]], axis=0)
    aux2 = jnp.concatenate([ltor, rtol], axis=0)
    img2 = jnp.concatenate([img, img], axis=0)
    hid2, out2 = decoder_fwd(params["html"], img2, seq2, aux2,
                             sep=eos_html, nhead=nhead)
    html_hid, html_out = hid2[:b], out2[:b]
    back_out = out2[b:]

    grid = make_grid(html_hid, html[:, 1:], soc_html)
    cell_hid, cell_out = decoder_fwd(params["cell"], img, cell[:, :-1], grid,
                                     sep=sep_cell, nhead=nhead)
    bbox = ln_linear(html_hid, params["bbox"]["g"], params["bbox"]["be"],
                     params["bbox"]["w"], params["bbox"]["b"], act="sigmoid")
    # TODO(synk): autoregressive predict() loop (host-side early-exit) is not kernelized.
    return dict(html=html_out, back=back_out, cell=cell_out, bbox=bbox)


# ----------------------------------------------------------------------------
# Deterministic parameter init (shapes follow the PyTorch __init__)
# ----------------------------------------------------------------------------
def _dense_init(key, d_in, d_out, scale=0.02):
    w = scale * jax.random.normal(key, (d_in, d_out), jnp.float32)
    return w, jnp.zeros((d_out,), jnp.float32)


def init_ln_linear_params(key, d_in, d_out):
    w, b = _dense_init(key, d_in, d_out)
    return dict(g=jnp.ones((d_in,), jnp.float32),
                be=jnp.zeros((d_in,), jnp.float32), w=w, b=b)


def init_attn_params(key, d):
    kq, kk, kv, ko = jax.random.split(key, 4)
    wq, bq = _dense_init(kq, d, d)
    wk, bk = _dense_init(kk, d, d)
    wv, bv = _dense_init(kv, d, d)
    wo, bo = _dense_init(ko, d, d)
    return dict(wq=wq, bq=bq, wk=wk, bk=bk, wv=wv, bv=bv, wo=wo, bo=bo)


def init_block_params(key, d):
    k1, k2, k3, k4 = jax.random.split(key, 4)
    return dict(att1=init_attn_params(k1, d), att2=init_attn_params(k2, d),
                norm1=init_ln_linear_params(k3, d, d),
                norm2=init_ln_linear_params(k4, d, d))


def init_decoder_params(key, depth, d_input, d_model, num_emb):
    keys = jax.random.split(key, depth + 3)
    return dict(
        emb=0.02 * jax.random.normal(keys[0], (num_emb, d_model), jnp.float32),
        cat=init_ln_linear_params(keys[1], d_input, d_model),
        out=init_ln_linear_params(keys[2], d_model, num_emb),
        blocks=[init_block_params(k, d_model) for k in keys[3:]])


def init_table_decoder_params(key, *, d_model, depth, num_emb_html, num_emb_cell):
    kh, kc, kb = jax.random.split(key, 3)
    return dict(
        html=init_decoder_params(kh, depth, d_model + 2, d_model, num_emb_html),
        cell=init_decoder_params(kc, depth, 2 * d_model, d_model, num_emb_cell),
        bbox=init_ln_linear_params(kb, d_model, 4))


# ----------------------------------------------------------------------------
if __name__ == "__main__":
    B, N, D_MODEL, NHEAD, DEPTH = 2, 16, 32, 4, 1
    NUM_EMB_HTML, NUM_EMB_CELL = 40, 48
    T_HTML, T_CELL = 9, 9
    SOS_HTML, EOS_HTML = 0, 1
    SOS_CELL, EOS_CELL, SEP_CELL = 0, 1, 2
    SOC_HTML = jnp.array([2, 3], dtype=jnp.int32)

    assert D_MODEL % NHEAD == 0

    key = jax.random.PRNGKey(0)
    kp, ki, k1, k2, k3 = jax.random.split(key, 5)
    params = init_table_decoder_params(
        kp, d_model=D_MODEL, depth=DEPTH,
        num_emb_html=NUM_EMB_HTML, num_emb_cell=NUM_EMB_CELL)

    img = jax.random.normal(ki, (B, N, D_MODEL), jnp.float32)
    targets = dict(
        html=jax.random.randint(k1, (B, T_HTML), 0, NUM_EMB_HTML, dtype=jnp.int32),
        back=jax.random.randint(k2, (B, T_HTML), 0, NUM_EMB_HTML, dtype=jnp.int32),
        cell=jax.random.randint(k3, (B, T_CELL), 0, NUM_EMB_CELL, dtype=jnp.int32))

    fwd = jax.jit(functools.partial(
        table_decoder_fwd, nhead=NHEAD, eos_html=EOS_HTML,
        sep_cell=SEP_CELL, soc_html=SOC_HTML))
    out = fwd(params, img, targets["html"], targets["back"], targets["cell"])
    jax.block_until_ready(out)

    assert out["html"].shape == (B, T_HTML - 1, NUM_EMB_HTML)
    assert out["back"].shape == (B, T_HTML - 1, NUM_EMB_HTML)
    assert out["cell"].shape == (B, T_CELL - 1, NUM_EMB_CELL)
    assert out["bbox"].shape == (B, T_HTML - 1, 4)
    assert all(jnp.all(jnp.isfinite(v)) for v in out.values())
    print("KERNEL_OK")
</pallas_src>

<mosaic_0001>
module attributes {stable_mosaic.version = 11 : i64} {
  func.func @kernel(%arg0: i32, %arg1: memref<32x34xf32, #tpu.memory_space<vmem>>, %arg2: memref<1x34xf32, #tpu.memory_space<vmem>>, %arg3: memref<1x34xf32, #tpu.memory_space<vmem>>, %arg4: memref<34x128xbf16, #tpu.memory_space<vmem>>, %arg5: memref<1x128xf32, #tpu.memory_space<vmem>>, %arg6: memref<32x128xf32, #tpu.memory_space<vmem>>) attributes {dimension_semantics = [#tpu.dimension_semantics<parallel>], iteration_bounds = array<i64: 1>, scalar_prefetch = 0 : i64, scratch_operands = 0 : i64, tpu.core_type = #tpu.core_type<tc>, window_params = [{transform_indices = @transform_0, window_bounds = array<i64: 32, 34>}, {pipeline_mode = #tpu.pipeline_mode<synchronous>, transform_indices = @transform_1, window_bounds = array<i64: 1, 34>}, {pipeline_mode = #tpu.pipeline_mode<synchronous>, transform_indices = @transform_2, window_bounds = array<i64: 1, 34>}, {pipeline_mode = #tpu.pipeline_mode<synchronous>, transform_indices = @transform_3, window_bounds = array<i64: 34, 128>}, {pipeline_mode = #tpu.pipeline_mode<synchronous>, transform_indices = @transform_4, window_bounds = array<i64: 1, 128>}, {transform_indices = @transform_5, window_bounds = array<i64: 32, 128>}]} {
    %c0 = arith.constant 0 : index
    %c0_0 = arith.constant 0 : index
    %0 = vector.load %arg1[%c0, %c0_0] : memref<32x34xf32, #tpu.memory_space<vmem>>, vector<32x34xf32>
    %c0_1 = arith.constant 0 : index
    %c0_2 = arith.constant 0 : index
    %1 = vector.load %arg2[%c0_1, %c0_2] : memref<1x34xf32, #tpu.memory_space<vmem>>, vector<1x34xf32>
    %c0_3 = arith.constant 0 : index
    %c0_4 = arith.constant 0 : index
    %2 = vector.load %arg3[%c0_3, %c0_4] : memref<1x34xf32, #tpu.memory_space<vmem>>, vector<1x34xf32>
    %cst = arith.constant dense<0.000000e+00> : vector<32xf32>
    %3 = vector.multi_reduction <add>, %0, %cst [1] : vector<32x34xf32> to vector<32xf32>
    %4 = vector.shape_cast %3 : vector<32xf32> to vector<32x1xf32>
    %cst_5 = arith.constant 3.400000e+01 : f32
    %5 = vector.broadcast %cst_5 : f32 to vector<32x1xf32>
    %6 = arith.divf %4, %5 : vector<32x1xf32>
    %7 = vector.broadcast %6 : vector<32x1xf32> to vector<32x34xf32>
    %8 = arith.subf %0, %7 : vector<32x34xf32>
    %9 = arith.mulf %8, %8 : vector<32x34xf32>
    %cst_6 = arith.constant dense<0.000000e+00> : vector<32xf32>
    %10 = vector.multi_reduction <add>, %9, %cst_6 [1] : vector<32x34xf32> to vector<32xf32>
    %11 = vector.shape_cast %10 : vector<32xf32> to vector<32x1xf32>
    %cst_7 = arith.constant 3.400000e+01 : f32
    %12 = vector.broadcast %cst_7 : f32 to vector<32x1xf32>
    %13 = arith.divf %11, %12 : vector<32x1xf32>
    %14 = vector.broadcast %6 : vector<32x1xf32> to vector<32x34xf32>
    %15 = arith.subf %0, %14 : vector<32x34xf32>
    %cst_8 = arith.constant 9.99999974E-6 : f32
    %16 = vector.broadcast %cst_8 : f32 to vector<32x1xf32>
    %17 = arith.addf %13, %16 : vector<32x1xf32>
    %18 = math.rsqrt %17 : vector<32x1xf32>
    %19 = vector.broadcast %18 : vector<32x1xf32> to vector<32x34xf32>
    %20 = arith.mulf %15, %19 : vector<32x34xf32>
    %21 = vector.broadcast %1 : vector<1x34xf32> to vector<32x34xf32>
    %22 = arith.mulf %20, %21 : vector<32x34xf32>
    %23 = vector.broadcast %2 : vector<1x34xf32> to vector<32x34xf32>
    %24 = arith.addf %22, %23 : vector<32x34xf32>
    %25 = arith.truncf %24 : vector<32x34xf32> to vector<32x34xbf16>
    %c0_9 = arith.constant 0 : index
    %c0_10 = arith.constant 0 : index
    %26 = vector.load %arg4[%c0_9, %c0_10] : memref<34x128xbf16, #tpu.memory_space<vmem>>, vector<34x128xbf16>
    %cst_11 = arith.constant dense<0.000000e+00> : vector<32x128xf32>
    %27 = tpu.matmul %25, %26, %cst_11 {dimension_numbers = #tpu.dot_dimension_numbers<[1], [0], [0], [1], [0, 0, 1, 1], [], []>} : vector<32x34xbf16>, vector<34x128xbf16>, vector<32x128xf32> -> vector<32x128xf32>
    %c0_12 = arith.constant 0 : index
    %c0_13 = arith.constant 0 : index
    %28 = vector.load %arg5[%c0_12, %c0_13] : memref<1x128xf32, #tpu.memory_space<vmem>>, vector<1x128xf32>
    %29 = vector.broadcast %28 : vector<1x128xf32> to vector<32x128xf32>
    %30 = arith.addf %27, %29 : vector<32x128xf32>
    %c0_14 = arith.constant 0 : index
    %c0_15 = arith.constant 0 : index
    %31 = vector.load %arg6[%c0_14, %c0_15] : memref<32x128xf32, #tpu.memory_space<vmem>>, vector<32x128xf32>
    tpu.vector_store %arg6[%c0_14, %c0_15], %30 {strides = array<i32>} : memref<32x128xf32, #tpu.memory_space<vmem>>, vector<32x128xf32>,
    return
  }
  func.func @transform_0(%arg0: i32) -> (i32, i32) {
    %c0_i32 = arith.constant 0 : i32
    %c0_i32_0 = arith.constant 0 : i32
    return %arg0, %c0_i32 : i32, i32
  }
  func.func @transform_1(%arg0: i32) -> (i32, i32) {
    %c0_i32 = arith.constant 0 : i32
    %c0_i32_0 = arith.constant 0 : i32
    %c0_i32_1 = arith.constant 0 : i32
    return %c0_i32, %c0_i32_0 : i32, i32
  }
  func.func @transform_2(%arg0: i32) -> (i32, i32) {
    %c0_i32 = arith.constant 0 : i32
    %c0_i32_0 = arith.constant 0 : i32
    %c0_i32_1 = arith.constant 0 : i32
    return %c0_i32, %c0_i32_0 : i32, i32
  }
  func.func @transform_3(%arg0: i32) -> (i32, i32) {
    %c0_i32 = arith.constant 0 : i32
    %c0_i32_0 = arith.constant 0 : i32
    %c0_i32_1 = arith.constant 0 : i32
    return %c0_i32, %c0_i32_0 : i32, i32
  }
  func.func @transform_4(%arg0: i32) -> (i32, i32) {
    %c0_i32 = arith.constant 0 : i32
    %c0_i32_0 = arith.constant 0 : i32
    %c0_i32_1 = arith.constant 0 : i32
    return %c0_i32, %c0_i32_0 : i32, i32
  }
  func.func @transform_5(%arg0: i32) -> (i32, i32) {
    %c0_i32 = arith.constant 0 : i32
    %c0_i32_0 = arith.constant 0 : i32
    return %arg0, %c0_i32 : i32, i32
  }
}

module attributes {stable_mosaic.version = 11 : i64} {
  func.func @kernel(%arg0: i32, %arg1: memref<1x8x32xf32, #tpu.memory_space<vmem>>, %arg2: memref<1x16x32xf32, #tpu.memory_space<vmem>>, %arg3: memref<32x32xbf16, #tpu.memory_space<vmem>>, %arg4: memref<1x32xf32, #tpu.memory_space<vmem>>, %arg5: memref<32x64xbf16, #tpu.memory_space<vmem>>, %arg6: memref<1x64xf32, #tpu.memory_space<vmem>>, %arg7: memref<32x32xbf16, #tpu.memory_space<vmem>>, %arg8: memref<1x32xf32, #tpu.memory_space<vmem>>, %arg9: memref<32x32xbf16, #tpu.memory_space<vmem>>, %arg10: memref<1x32xf32, #tpu.memory_space<vmem>>, %arg11: memref<32x64xbf16, #tpu.memory_space<vmem>>, %arg12: memref<1x64xf32, #tpu.memory_space<vmem>>, %arg13: memref<32x32xbf16, #tpu.memory_space<vmem>>, %arg14: memref<1x32xf32, #tpu.memory_space<vmem>>, %arg15: memref<1x32xf32, #tpu.memory_space<vmem>>, %arg16: memref<1x32xf32, #tpu.memory_space<vmem>>, %arg17: memref<32x32xbf16, #tpu.memory_space<vmem>>, %arg18: memref<1x32xf32, #tpu.memory_space<vmem>>, %arg19: memref<1x32xf32, #tpu.memory_space<vmem>>, %arg20: memref<1x32xf32, #tpu.memory_space<vmem>>, %arg21: memref<32x32xbf16, #tpu.memory_space<vmem>>, %arg22: memref<1x32xf32, #tpu.memory_space<vmem>>, %arg23: memref<1x8x32xf32, #tpu.memory_space<vmem>>) attributes {dimension_semantics = [#tpu.dimension_semantics<parallel>], iteration_bounds = array<i64: 4>, scalar_prefetch = 0 : i64, scratch_operands = 0 : i64, tpu.core_type = #tpu.core_type<tc>, window_params = [{transform_indices = @transform_0, window_bounds = array<i64: 1, 8, 32>}, {transform_indices = @transform_1, window_bounds = array<i64: 1, 16, 32>}, {pipeline_mode = #tpu.pipeline_mode<synchronous>, transform_indices = @transform_2, window_bounds = array<i64: 32, 32>}, {pipeline_mode = #tpu.pipeline_mode<synchronous>, transform_indices = @transform_3, window_bounds = array<i64: 1, 32>}, {pipeline_mode = #tpu.pipeline_mode<synchronous>, transform_indices = @transform_4, window_bounds = array<i64: 32, 64>}, {pipeline_mode = #tpu.pipeline_mode<synchronous>, transform_indices = @transform_5, window_bounds = array<i64: 1, 64>}, {pipeline_mode = #tpu.pipeline_mode<synchronous>, transform_indices = @transform_6, window_bounds = array<i64: 32, 32>}, {pipeline_mode = #tpu.pipeline_mode<synchronous>, transform_indices = @transform_7, window_bounds = array<i64: 1, 32>}, {pipeline_mode = #tpu.pipeline_mode<synchronous>, transform_indices = @transform_8, window_bounds = array<i64: 32, 32>}, {pipeline_mode = #tpu.pipeline_mode<synchronous>, transform_indices = @transform_9, window_bounds = array<i64: 1, 32>}, {pipeline_mode = #tpu.pipeline_mode<synchronous>, transform_indices = @transform_10, window_bounds = array<i64: 32, 64>}, {pipeline_mode = #tpu.pipeline_mode<synchronous>, transform_indices = @transform_11, window_bounds = array<i64: 1, 64>}, {pipeline_mode = #tpu.pipeline_mode<synchronous>, transform_indices = @transform_12, window_bounds = array<i64: 32, 32>}, {pipeline_mode = #tpu.pipeline_mode<synchronous>, transform_indices = @transform_13, window_bounds = array<i64: 1, 32>}, {pipeline_mode = #tpu.pipeline_mode<synchronous>, transform_indices = @transform_14, window_bounds = array<i64: 1, 32>}, {pipeline_mode = #tpu.pipeline_mode<synchronous>, transform_indices = @transform_15, window_bounds = array<i64: 1, 32>}, {pipeline_mode = #tpu.pipeline_mode<synchronous>, transform_indices = @transform_16, window_bounds = array<i64: 32, 32>}, {pipeline_mode = #tpu.pipeline_mode<synchronous>, transform_indices = @transform_17, window_bounds = array<i64: 1, 32>}, {pipeline_mode = #tpu.pipeline_mode<synchronous>, transform_indices = @transform_18, window_bounds = array<i64: 1, 32>}, {pipeline_mode = #tpu.pipeline_mode<synchronous>, transform_indices = @transform_19, window_bounds = array<i64: 1, 32>}, {pipeline_mode = #tpu.pipeline_mode<synchronous>, transform_indices = @transform_20, window_bounds = array<i64: 32, 32>}, {pipeline_mode = #tpu.pipeline_mode<synchronous>, transform_indices = @transform_21, window_bounds = array<i64: 1, 32>}, {transform_indices = @transform_22, window_bounds = array<i64: 1, 8, 32>}]} {
    %c0 = arith.constant 0 : index
    %c0_0 = arith.constant 0 : index
    %c0_1 = arith.constant 0 : index
    %0 = vector.load %arg1[%c0, %c0_0, %c0_1] : memref<1x8x32xf32, #tpu.memory_space<vmem>>, vector<1x8x32xf32>
    %1 = vector.shape_cast %0 : vector<1x8x32xf32> to vector<8x32xf32>
    %c0_2 = arith.constant 0 : index
    %c0_3 = arith.constant 0 : index
    %c0_4 = arith.constant 0 : index
    %2 = vector.load %arg2[%c0_2, %c0_3, %c0_4] : memref<1x16x32xf32, #tpu.memory_space<vmem>>, vector<1x16x32xf32>
    %3 = vector.shape_cast %2 : vector<1x16x32xf32> to vector<16x32xf32>
    %4 = tpu.iota {dimensions = array<i32: 0>} : vector<8x8xi32>
    %5 = tpu.iota {dimensions = array<i32: 1>} : vector<8x8xi32>
    %6 = arith.cmpi sge, %4, %5 : vector<8x8xi32>
    %7 = arith.truncf %1 : vector<8x32xf32> to vector<8x32xbf16>
    %c0_5 = arith.constant 0 : index
    %c0_6 = arith.constant 0 : index
    %8 = vector.load %arg3[%c0_5, %c0_6] : memref<32x32xbf16, #tpu.memory_space<vmem>>, vector<32x32xbf16>
    %cst = arith.constant dense<0.000000e+00> : vector<8x32xf32>
    %9 = tpu.matmul %7, %8, %cst {dimension_numbers = #tpu.dot_dimension_numbers<[1], [0], [0], [1], [0, 0, 1, 1], [], []>} : vector<8x32xbf16>, vector<32x32xbf16>, vector<8x32xf32> -> vector<8x32xf32>
    %c0_7 = arith.constant 0 : index
    %c0_8 = arith.constant 0 : index
    %10 = vector.load %arg4[%c0_7, %c0_8] : memref<1x32xf32, #tpu.memory_space<vmem>>, vector<1x32xf32>
    %11 = vector.broadcast %10 : vector<1x32xf32> to vector<8x32xf32>
    %12 = arith.addf %9, %11 : vector<8x32xf32>
    %13 = arith.truncf %1 : vector<8x32xf32> to vector<8x32xbf16>
    %c0_9 = arith.constant 0 : index
    %c0_10 = arith.constant 0 : index
    %14 = vector.load %arg5[%c0_9, %c0_10] : memref<32x64xbf16, #tpu.memory_space<vmem>>, vector<32x64xbf16>
    %cst_11 = arith.constant dense<0.000000e+00> : vector<8x64xf32>
    %15 = tpu.matmul %13, %14, %cst_11 {dimension_numbers = #tpu.dot_dimension_numbers<[1], [0], [0], [1], [0, 0, 1, 1], [], []>} : vector<8x32xbf16>, vector<32x64xbf16>, vector<8x64xf32> -> vector<8x64xf32>
    %c0_12 = arith.constant 0 : index
    %c0_13 = arith.constant 0 : index
    %16 = vector.load %arg6[%c0_12, %c0_13] : memref<1x64xf32, #tpu.memory_space<vmem>>, vector<1x64xf32>
    %17 = vector.broadcast %16 : vector<1x64xf32> to vector<8x64xf32>
    %18 = arith.addf %15, %17 : vector<8x64xf32>
    %19 = vector.extract_strided_slice %18 {offsets = [0, 0], sizes = [8, 32], strides = [1, 1]} : vector<8x64xf32> to vector<8x32xf32>
    %20 = vector.extract_strided_slice %18 {offsets = [0, 32], sizes = [8, 32], strides = [1, 1]} : vector<8x64xf32> to vector<8x32xf32>
    %c0_14 = arith.constant 0 : index
    %c0_15 = arith.constant 0 : index
    %21 = vector.load %arg7[%c0_14, %c0_15] : memref<32x32xbf16, #tpu.memory_space<vmem>>, vector<32x32xbf16>
    %c0_16 = arith.constant 0 : index
    %c0_17 = arith.constant 0 : index
    %22 = vector.load %arg8[%c0_16, %c0_17] : memref<1x32xf32, #tpu.memory_space<vmem>>, vector<1x32xf32>
    %23 = vector.shape_cast %22 : vector<1x32xf32> to vector<1x32xf32>
    %24 = vector.broadcast %23 : vector<1x32xf32> to vector<8x32xf32>
    %25 = vector.extract_strided_slice %12 {offsets = [0, 0], sizes = [8, 8], strides = [1, 1]} : vector<8x32xf32> to vector<8x8xf32>
    %26 = arith.truncf %25 : vector<8x8xf32> to vector<8x8xbf16>
    %27 = vector.extract_strided_slice %19 {offsets = [0, 0], sizes = [8, 8], strides = [1, 1]} : vector<8x32xf32> to vector<8x8xf32>
    %28 = arith.truncf %27 : vector<8x8xf32> to vector<8x8xbf16>
    %29 = vector.extract_strided_slice %20 {offsets = [0, 0], sizes = [8, 8], strides = [1, 1]} : vector<8x32xf32> to vector<8x8xf32>
    %30 = arith.truncf %29 : vector<8x8xf32> to vector<8x8xbf16>
    %cst_18 = arith.constant dense<0.000000e+00> : vector<8x8xf32>
    %31 = tpu.matmul %26, %28, %cst_18 {dimension_numbers = #tpu.dot_dimension_numbers<[1], [1], [0], [0], [0, 0, 1, 0], [], []>} : vector<8x8xbf16>, vector<8x8xbf16>, vector<8x8xf32> -> vector<8x8xf32>
    %cst_19 = arith.constant 0.353553385 : f32
    %32 = vector.broadcast %cst_19 : f32 to vector<8x8xf32>
    %33 = arith.mulf %31, %32 : vector<8x8xf32>
    %cst_20 = arith.constant -1.000000e+30 : f32
    %34 = vector.broadcast %cst_20 : f32 to vector<8x8xf32>
    %35 = arith.select %6, %33, %34 : vector<8x8xi1>, vector<8x8xf32>
    %cst_21 = arith.constant dense<0xFF800000> : vector<8xf32>
    %36 = vector.multi_reduction <maximumf>, %35, %cst_21 [1] : vector<8x8xf32> to vector<8xf32>
    %37 = vector.shape_cast %36 : vector<8xf32> to vector<8x1xf32>
    %38 = vector.broadcast %37 : vector<8x1xf32> to vector<8x8xf32>
    %39 = arith.subf %35, %38 : vector<8x8xf32>
    %40 = math.exp %39 : vector<8x8xf32>
    %cst_22 = arith.constant dense<0.000000e+00> : vector<8xf32>
    %41 = vector.multi_reduction <add>, %40, %cst_22 [1] : vector<8x8xf32> to vector<8xf32>
    %42 = vector.shape_cast %41 : vector<8xf32> to vector<8x1xf32>
    %43 = tpu.reciprocal %42 {approx = true} : vector<8x1xf32> -> vector<8x1xf32>
    %44 = vector.broadcast %43 : vector<8x1xf32> to vector<8x8xf32>
    %45 = arith.mulf %40, %44 : vector<8x8xf32>
    %46 = arith.truncf %45 : vector<8x8xf32> to vector<8x8xbf16>
    %cst_23 = arith.constant dense<0.000000e+00> : vector<8x8xf32>
    %47 = tpu.matmul %46, %30, %cst_23 {dimension_numbers = #tpu.dot_dimension_numbers<[1], [0], [0], [1], [0, 0, 1, 1], [], []>} : vector<8x8xbf16>, vector<8x8xbf16>, vector<8x8xf32> -> vector<8x8xf32>
    %48 = arith.truncf %47 : vector<8x8xf32> to vector<8x8xbf16>
    %49 = vector.extract_strided_slice %21 {offsets = [0, 0], sizes = [8, 32], strides = [1, 1]} : vector<32x32xbf16> to vector<8x32xbf16>
    %cst_24 = arith.constant dense<0.000000e+00> : vector<8x32xf32>
    %50 = tpu.matmul %48, %49, %cst_24 {dimension_numbers = #tpu.dot_dimension_numbers<[1], [0], [0], [1], [0, 0, 1, 1], [], []>} : vector<8x8xbf16>, vector<8x32xbf16>, vector<8x32xf32> -> vector<8x32xf32>
    %51 = arith.addf %24, %50 : vector<8x32xf32>
    %52 = vector.extract_strided_slice %12 {offsets = [0, 8], sizes = [8, 8], strides = [1, 1]} : vector<8x32xf32> to vector<8x8xf32>
    %53 = arith.truncf %52 : vector<8x8xf32> to vector<8x8xbf16>
    %54 = vector.extract_strided_slice %19 {offsets = [0, 8], sizes = [8, 8], strides = [1, 1]} : vector<8x32xf32> to vector<8x8xf32>
    %55 = arith.truncf %54 : vector<8x8xf32> to vector<8x8xbf16>
    %56 = vector.extract_strided_slice %20 {offsets = [0, 8], sizes = [8, 8], strides = [1, 1]} : vector<8x32xf32> to vector<8x8xf32>
    %57 = arith.truncf %56 : vector<8x8xf32> to vector<8x8xbf16>
    %cst_25 = arith.constant dense<0.000000e+00> : vector<8x8xf32>
    %58 = tpu.matmul %53, %55, %cst_25 {dimension_numbers = #tpu.dot_dimension_numbers<[1], [1], [0], [0], [0, 0, 1, 0], [], []>} : vector<8x8xbf16>, vector<8x8xbf16>, vector<8x8xf32> -> vector<8x8xf32>
    %cst_26 = arith.constant 0.353553385 : f32
    %59 = vector.broadcast %cst_26 : f32 to vector<8x8xf32>
    %60 = arith.mulf %58, %59 : vector<8x8xf32>
    %cst_27 = arith.constant -1.000000e+30 : f32
    %61 = vector.broadcast %cst_27 : f32 to vector<8x8xf32>
    %62 = arith.select %6, %60, %61 : vector<8x8xi1>, vector<8x8xf32>
    %cst_28 = arith.constant dense<0xFF800000> : vector<8xf32>
    %63 = vector.multi_reduction <maximumf>, %62, %cst_28 [1] : vector<8x8xf32> to vector<8xf32>
    %64 = vector.shape_cast %63 : vector<8xf32> to vector<8x1xf32>
    %65 = vector.broadcast %64 : vector<8x1xf32> to vector<8x8xf32>
    %66 = arith.subf %62, %65 : vector<8x8xf32>
    %67 = math.exp %66 : vector<8x8xf32>
    %cst_29 = arith.constant dense<0.000000e+00> : vector<8xf32>
    %68 = vector.multi_reduction <add>, %67, %cst_29 [1] : vector<8x8xf32> to vector<8xf32>
    %69 = vector.shape_cast %68 : vector<8xf32> to vector<8x1xf32>
    %70 = tpu.reciprocal %69 {approx = true} : vector<8x1xf32> -> vector<8x1xf32>
    %71 = vector.broadcast %70 : vector<8x1xf32> to vector<8x8xf32>
    %72 = arith.mulf %67, %71 : vector<8x8xf32>
    %73 = arith.truncf %72 : vector<8x8xf32> to vector<8x8xbf16>
    %cst_30 = arith.constant dense<0.000000e+00> : vector<8x8xf32>
    %74 = tpu.matmul %73, %57, %cst_30 {dimension_numbers = #tpu.dot_dimension_numbers<[1], [0], [0], [1], [0, 0, 1, 1], [], []>} : vector<8x8xbf16>, vector<8x8xbf16>, vector<8x8xf32> -> vector<8x8xf32>
    %75 = arith.truncf %74 : vector<8x8xf32> to vector<8x8xbf16>
    %76 = vector.extract_strided_slice %21 {offsets = [8, 0], sizes = [8, 32], strides = [1, 1]} : vector<32x32xbf16> to vector<8x32xbf16>
    %cst_31 = arith.constant dense<0.000000e+00> : vector<8x32xf32>
    %77 = tpu.matmul %75, %76, %cst_31 {dimension_numbers = #tpu.dot_dimension_numbers<[1], [0], [0], [1], [0, 0, 1, 1], [], []>} : vector<8x8xbf16>, vector<8x32xbf16>, vector<8x32xf32> -> vector<8x32xf32>
    %78 = arith.addf %51, %77 : vector<8x32xf32>
    %79 = vector.extract_strided_slice %12 {offsets = [0, 16], sizes = [8, 8], strides = [1, 1]} : vector<8x32xf32> to vector<8x8xf32>
    %80 = arith.truncf %79 : vector<8x8xf32> to vector<8x8xbf16>
    %81 = vector.extract_strided_slice %19 {offsets = [0, 16], sizes = [8, 8], strides = [1, 1]} : vector<8x32xf32> to vector<8x8xf32>
    %82 = arith.truncf %81 : vector<8x8xf32> to vector<8x8xbf16>
    %83 = vector.extract_strided_slice %20 {offsets = [0, 16], sizes = [8, 8], strides = [1, 1]} : vector<8x32xf32> to vector<8x8xf32>
    %84 = arith.truncf %83 : vector<8x8xf32> to vector<8x8xbf16>
    %cst_32 = arith.constant dense<0.000000e+00> : vector<8x8xf32>
    %85 = tpu.matmul %80, %82, %cst_32 {dimension_numbers = #tpu.dot_dimension_numbers<[1], [1], [0], [0], [0, 0, 1, 0], [], []>} : vector<8x8xbf16>, vector<8x8xbf16>, vector<8x8xf32> -> vector<8x8xf32>
    %cst_33 = arith.constant 0.353553385 : f32
    %86 = vector.broadcast %cst_33 : f32 to vector<8x8xf32>
    %87 = arith.mulf %85, %86 : vector<8x8xf32>
    %cst_34 = arith.constant -1.000000e+30 : f32
    %88 = vector.broadcast %cst_34 : f32 to vector<8x8xf32>
    %89 = arith.select %6, %87, %88 : vector<8x8xi1>, vector<8x8xf32>
    %cst_35 = arith.constant dense<0xFF800000> : vector<8xf32>
    %90 = vector.multi_reduction <maximumf>, %89, %cst_35 [1] : vector<8x8xf32> to vector<8xf32>
    %91 = vector.shape_cast %90 : vector<8xf32> to vector<8x1xf32>
    %92 = vector.broadcast %91 : vector<8x1xf32> to vector<8x8xf32>
    %93 = arith.subf %89, %92 : vector<8x8xf32>
    %94 = math.exp %93 : vector<8x8xf32>
    %cst_36 = arith.constant dense<0.000000e+00> : vector<8xf32>
    %95 = vector.multi_reduction <add>, %94, %cst_36 [1] : vector<8x8xf32> to vector<8xf32>
    %96 = vector.shape_cast %95 : vector<8xf32> to vector<8x1xf32>
    %97 = tpu.reciprocal %96 {approx = true} : vector<8x1xf32> -> vector<8x1xf32>
    %98 = vector.broadcast %97 : vector<8x1xf32> to vector<8x8xf32>
    %99 = arith.mulf %94, %98 : vector<8x8xf32>
    %100 = arith.truncf %99 : vector<8x8xf32> to vector<8x8xbf16>
    %cst_37 = arith.constant dense<0.000000e+00> : vector<8x8xf32>
    %101 = tpu.matmul %100, %84, %cst_37 {dimension_numbers = #tpu.dot_dimension_numbers<[1], [0], [0], [1], [0, 0, 1, 1], [], []>} : vector<8x8xbf16>, vector<8x8xbf16>, vector<8x8xf32> -> vector<8x8xf32>
    %102 = arith.truncf %101 : vector<8x8xf32> to vector<8x8xbf16>
    %103 = vector.extract_strided_slice %21 {offsets = [16, 0], sizes = [8, 32], strides = [1, 1]} : vector<32x32xbf16> to vector<8x32xbf16>
    %cst_38 = arith.constant dense<0.000000e+00> : vector<8x32xf32>
    %104 = tpu.matmul %102, %103, %cst_38 {dimension_numbers = #tpu.dot_dimension_numbers<[1], [0], [0], [1], [0, 0, 1, 1], [], []>} : vector<8x8xbf16>, vector<8x32xbf16>, vector<8x32xf32> -> vector<8x32xf32>
    %105 = arith.addf %78, %104 : vector<8x32xf32>
    %106 = vector.extract_strided_slice %12 {offsets = [0, 24], sizes = [8, 8], strides = [1, 1]} : vector<8x32xf32> to vector<8x8xf32>
    %107 = arith.truncf %106 : vector<8x8xf32> to vector<8x8xbf16>
    %108 = vector.extract_strided_slice %19 {offsets = [0, 24], sizes = [8, 8], strides = [1, 1]} : vector<8x32xf32> to vector<8x8xf32>
    %109 = arith.truncf %108 : vector<8x8xf32> to vector<8x8xbf16>
    %110 = vector.extract_strided_slice %20 {offsets = [0, 24], sizes = [8, 8], strides = [1, 1]} : vector<8x32xf32> to vector<8x8xf32>
    %111 = arith.truncf %110 : vector<8x8xf32> to vector<8x8xbf16>
    %cst_39 = arith.constant dense<0.000000e+00> : vector<8x8xf32>
    %112 = tpu.matmul %107, %109, %cst_39 {dimension_numbers = #tpu.dot_dimension_numbers<[1], [1], [0], [0], [0, 0, 1, 0], [], []>} : vector<8x8xbf16>, vector<8x8xbf16>, vector<8x8xf32> -> vector<8x8xf32>
    %cst_40 = arith.constant 0.353553385 : f32
    %113 = vector.broadcast %cst_40 : f32 to vector<8x8xf32>
    %114 = arith.mulf %112, %113 : vector<8x8xf32>
    %cst_41 = arith.constant -1.000000e+30 : f32
    %115 = vector.broadcast %cst_41 : f32 to vector<8x8xf32>
    %116 = arith.select %6, %114, %115 : vector<8x8xi1>, vector<8x8xf32>
    %cst_42 = arith.constant dense<0xFF800000> : vector<8xf32>
    %117 = vector.multi_reduction <maximumf>, %116, %cst_42 [1] : vector<8x8xf32> to vector<8xf32>
    %118 = vector.shape_cast %117 : vector<8xf32> to vector<8x1xf32>
    %119 = vector.broadcast %118 : vector<8x1xf32> to vector<8x8xf32>
    %120 = arith.subf %116, %119 : vector<8x8xf32>
    %121 = math.exp %120 : vector<8x8xf32>
    %cst_43 = arith.constant dense<0.000000e+00> : vector<8xf32>
    %122 = vector.multi_reduction <add>, %121, %cst_43 [1] : vector<8x8xf32> to vector<8xf32>
    %123 = vector.shape_cast %122 : vector<8xf32> to vector<8x1xf32>
    %124 = tpu.reciprocal %123 {approx = true} : vector<8x1xf32> -> vector<8x1xf32>
    %125 = vector.broadcast %124 : vector<8x1xf32> to vector<8x8xf32>
    %126 = arith.mulf %121, %125 : vector<8x8xf32>
    %127 = arith.truncf %126 : vector<8x8xf32> to vector<8x8xbf16>
    %cst_44 = arith.constant dense<0.000000e+00> : vector<8x8xf32>
    %128 = tpu.matmul %127, %111, %cst_44 {dimension_numbers = #tpu.dot_dimension_numbers<[1], [0], [0], [1], [0, 0, 1, 1], [], []>} : vector<8x8xbf16>, vector<8x8xbf16>, vector<8x8xf32> -> vector<8x8xf32>
    %129 = arith.truncf %128 : vector<8x8xf32> to vector<8x8xbf16>
    %130 = vector.extract_strided_slice %21 {offsets = [24, 0], sizes = [8, 32], strides = [1, 1]} : vector<32x32xbf16> to vector<8x32xbf16>
    %cst_45 = arith.constant dense<0.000000e+00> : vector<8x32xf32>
    %131 = tpu.matmul %129, %130, %cst_45 {dimension_numbers = #tpu.dot_dimension_numbers<[1], [0], [0], [1], [0, 0, 1, 1], [], []>} : vector<8x8xbf16>, vector<8x32xbf16>, vector<8x32xf32> -> vector<8x32xf32>
    %132 = arith.addf %105, %131 : vector<8x32xf32>
    %133 = arith.addf %1, %132 : vector<8x32xf32>
    %134 = arith.truncf %133 : vector<8x32xf32> to vector<8x32xbf16>
    %c0_46 = arith.constant 0 : index
    %c0_47 = arith.constant 0 : index
    %135 = vector.load %arg9[%c0_46, %c0_47] : memref<32x32xbf16, #tpu.memory_space<vmem>>, vector<32x32xbf16>
    %cst_48 = arith.constant dense<0.000000e+00> : vector<8x32xf32>
    %136 = tpu.matmul %134, %135, %cst_48 {dimension_numbers = #tpu.dot_dimension_numbers<[1], [0], [0], [1], [0, 0, 1, 1], [], []>} : vector<8x32xbf16>, vector<32x32xbf16>, vector<8x32xf32> -> vector<8x32xf32>
    %c0_49 = arith.constant 0 : index
    %c0_50 = arith.constant 0 : index
    %137 = vector.load %arg10[%c0_49, %c0_50] : memref<1x32xf32, #tpu.memory_space<vmem>>, vector<1x32xf32>
    %138 = vector.broadcast %137 : vector<1x32xf32> to vector<8x32xf32>
    %139 = arith.addf %136, %138 : vector<8x32xf32>
    %140 = arith.truncf %3 : vector<16x32xf32> to vector<16x32xbf16>
    %c0_51 = arith.constant 0 : index
    %c0_52 = arith.constant 0 : index
    %141 = vector.load %arg11[%c0_51, %c0_52] : memref<32x64xbf16, #tpu.memory_space<vmem>>, vector<32x64xbf16>
    %cst_53 = arith.constant dense<0.000000e+00> : vector<16x64xf32>
    %142 = tpu.matmul %140, %141, %cst_53 {dimension_numbers = #tpu.dot_dimension_numbers<[1], [0], [0], [1], [0, 0, 1, 1], [], []>} : vector<16x32xbf16>, vector<32x64xbf16>, vector<16x64xf32> -> vector<16x64xf32>
    %c0_54 = arith.constant 0 : index
    %c0_55 = arith.constant 0 : index
    %143 = vector.load %arg12[%c0_54, %c0_55] : memref<1x64xf32, #tpu.memory_space<vmem>>, vector<1x64xf32>
    %144 = vector.broadcast %143 : vector<1x64xf32> to vector<16x64xf32>
    %145 = arith.addf %142, %144 : vector<16x64xf32>
    %146 = vector.extract_strided_slice %145 {offsets = [0, 0], sizes = [16, 32], strides = [1, 1]} : vector<16x64xf32> to vector<16x32xf32>
    %147 = vector.extract_strided_slice %145 {offsets = [0, 32], sizes = [16, 32], strides = [1, 1]} : vector<16x64xf32> to vector<16x32xf32>
    %c0_56 = arith.constant 0 : index
    %c0_57 = arith.constant 0 : index
    %148 = vector.load %arg13[%c0_56, %c0_57] : memref<32x32xbf16, #tpu.memory_space<vmem>>, vector<32x32xbf16>
    %c0_58 = arith.constant 0 : index
    %c0_59 = arith.constant 0 : index
    %149 = vector.load %arg14[%c0_58, %c0_59] : memref<1x32xf32, #tpu.memory_space<vmem>>, vector<1x32xf32>
    %150 = vector.shape_cast %149 : vector<1x32xf32> to vector<1x32xf32>
    %151 = vector.broadcast %150 : vector<1x32xf32> to vector<8x32xf32>
    %152 = vector.extract_strided_slice %139 {offsets = [0, 0], sizes = [8, 8], strides = [1, 1]} : vector<8x32xf32> to vector<8x8xf32>
    %153 = arith.truncf %152 : vector<8x8xf32> to vector<8x8xbf16>
    %154 = vector.extract_strided_slice %146 {offsets = [0, 0], sizes = [16, 8], strides = [1, 1]} : vector<16x32xf32> to vector<16x8xf32>
    %155 = arith.truncf %154 : vector<16x8xf32> to vector<16x8xbf16>
    %156 = vector.extract_strided_slice %147 {offsets = [0, 0], sizes = [16, 8], strides = [1, 1]} : vector<16x32xf32> to vector<16x8xf32>
    %157 = arith.truncf %156 : vector<16x8xf32> to vector<16x8xbf16>
    %cst_60 = arith.constant dense<0.000000e+00> : vector<8x16xf32>
    %158 = tpu.matmul %153, %155, %cst_60 {dimension_numbers = #tpu.dot_dimension_numbers<[1], [1], [0], [0], [0, 0, 1, 0], [], []>} : vector<8x8xbf16>, vector<16x8xbf16>, vector<8x16xf32> -> vector<8x16xf32>
    %cst_61 = arith.constant 0.353553385 : f32
    %159 = vector.broadcast %cst_61 : f32 to vector<8x16xf32>
    %160 = arith.mulf %158, %159 : vector<8x16xf32>
    %cst_62 = arith.constant dense<0xFF800000> : vector<8xf32>
    %161 = vector.multi_reduction <maximumf>, %160, %cst_62 [1] : vector<8x16xf32> to vector<8xf32>
    %162 = vector.shape_cast %161 : vector<8xf32> to vector<8x1xf32>
    %163 = vector.broadcast %162 : vector<8x1xf32> to vector<8x16xf32>
    %164 = arith.subf %160, %163 : vector<8x16xf32>
    %165 = math.exp %164 : vector<8x16xf32>
    %cst_63 = arith.constant dense<0.000000e+00> : vector<8xf32>
    %166 = vector.multi_reduction <add>, %165, %cst_63 [1] : vector<8x16xf32> to vector<8xf32>
    %167 = vector.shape_cast %166 : vector<8xf32> to vector<8x1xf32>
    %168 = tpu.reciprocal %167 {approx = true} : vector<8x1xf32> -> vector<8x1xf32>
    %169 = vector.broadcast %168 : vector<8x1xf32> to vector<8x16xf32>
    %170 = arith.mulf %165, %169 : vector<8x16xf32>
    %171 = arith.truncf %170 : vector<8x16xf32> to vector<8x16xbf16>
    %cst_64 = arith.constant dense<0.000000e+00> : vector<8x8xf32>
    %172 = tpu.matmul %171, %157, %cst_64 {dimension_numbers = #tpu.dot_dimension_numbers<[1], [0], [0], [1], [0, 0, 1, 1], [], []>} : vector<8x16xbf16>, vector<16x8xbf16>, vector<8x8xf32> -> vector<8x8xf32>
    %173 = arith.truncf %172 : vector<8x8xf32> to vector<8x8xbf16>
    %174 = vector.extract_strided_slice %148 {offsets = [0, 0], sizes = [8, 32], strides = [1, 1]} : vector<32x32xbf16> to vector<8x32xbf16>
    %cst_65 = arith.constant dense<0.000000e+00> : vector<8x32xf32>
    %175 = tpu.matmul %173, %174, %cst_65 {dimension_numbers = #tpu.dot_dimension_numbers<[1], [0], [0], [1], [0, 0, 1, 1], [], []>} : vector<8x8xbf16>, vector<8x32xbf16>, vector<8x32xf32> -> vector<8x32xf32>
    %176 = arith.addf %151, %175 : vector<8x32xf32>
    %177 = vector.extract_strided_slice %139 {offsets = [0, 8], sizes = [8, 8], strides = [1, 1]} : vector<8x32xf32> to vector<8x8xf32>
    %178 = arith.truncf %177 : vector<8x8xf32> to vector<8x8xbf16>
    %179 = vector.extract_strided_slice %146 {offsets = [0, 8], sizes = [16, 8], strides = [1, 1]} : vector<16x32xf32> to vector<16x8xf32>
    %180 = arith.truncf %179 : vector<16x8xf32> to vector<16x8xbf16>
    %181 = vector.extract_strided_slice %147 {offsets = [0, 8], sizes = [16, 8], strides = [1, 1]} : vector<16x32xf32> to vector<16x8xf32>
    %182 = arith.truncf %181 : vector<16x8xf32> to vector<16x8xbf16>
    %cst_66 = arith.constant dense<0.000000e+00> : vector<8x16xf32>
    %183 = tpu.matmul %178, %180, %cst_66 {dimension_numbers = #tpu.dot_dimension_numbers<[1], [1], [0], [0], [0, 0, 1, 0], [], []>} : vector<8x8xbf16>, vector<16x8xbf16>, vector<8x16xf32> -> vector<8x16xf32>
    %cst_67 = arith.constant 0.353553385 : f32
    %184 = vector.broadcast %cst_67 : f32 to vector<8x16xf32>
    %185 = arith.mulf %183, %184 : vector<8x16xf32>
    %cst_68 = arith.constant dense<0xFF800000> : vector<8xf32>
    %186 = vector.multi_reduction <maximumf>, %185, %cst_68 [1] : vector<8x16xf32> to vector<8xf32>
    %187 = vector.shape_cast %186 : vector<8xf32> to vector<8x1xf32>
    %188 = vector.broadcast %187 : vector<8x1xf32> to vector<8x16xf32>
    %189 = arith.subf %185, %188 : vector<8x16xf32>
    %190 = math.exp %189 : vector<8x16xf32>
    %cst_69 = arith.constant dense<0.000000e+00> : vector<8xf32>
    %191 = vector.multi_reduction <add>, %190, %cst_69 [1] : vector<8x16xf32> to vector<8xf32>
    %192 = vector.shape_cast %191 : vector<8xf32> to vector<8x1xf32>
    %193 = tpu.reciprocal %192 {approx = true} : vector<8x1xf32> -> vector<8x1xf32>
    %194 = vector.broadcast %193 : vector<8x1xf32> to vector<8x16xf32>
    %195 = arith.mulf %190, %194 : vector<8x16xf32>
    %196 = arith.truncf %195 : vector<8x16xf32> to vector<8x16xbf16>
    %cst_70 = arith.constant dense<0.000000e+00> : vector<8x8xf32>
    %197 = tpu.matmul %196, %182, %cst_70 {dimension_numbers = #tpu.dot_dimension_numbers<[1], [0], [0], [1], [0, 0, 1, 1], [], []>} : vector<8x16xbf16>, vector<16x8xbf16>, vector<8x8xf32> -> vector<8x8xf32>
    %198 = arith.truncf %197 : vector<8x8xf32> to vector<8x8xbf16>
    %199 = vector.extract_strided_slice %148 {offsets = [8, 0], sizes = [8, 32], strides = [1, 1]} : vector<32x32xbf16> to vector<8x32xbf16>
    %cst_71 = arith.constant dense<0.000000e+00> : vector<8x32xf32>
    %200 = tpu.matmul %198, %199, %cst_71 {dimension_numbers = #tpu.dot_dimension_numbers<[1], [0], [0], [1], [0, 0, 1, 1], [], []>} : vector<8x8xbf16>, vector<8x32xbf16>, vector<8x32xf32> -> vector<8x32xf32>
    %201 = arith.addf %176, %200 : vector<8x32xf32>
    %202 = vector.extract_strided_slice %139 {offsets = [0, 16], sizes = [8, 8], strides = [1, 1]} : vector<8x32xf32> to vector<8x8xf32>
    %203 = arith.truncf %202 : vector<8x8xf32> to vector<8x8xbf16>
    %204 = vector.extract_strided_slice %146 {offsets = [0, 16], sizes = [16, 8], strides = [1, 1]} : vector<16x32xf32> to vector<16x8xf32>
    %205 = arith.truncf %204 : vector<16x8xf32> to vector<16x8xbf16>
    %206 = vector.extract_strided_slice %147 {offsets = [0, 16], sizes = [16, 8], strides = [1, 1]} : vector<16x32xf32> to vector<16x8xf32>
    %207 = arith.truncf %206 : vector<16x8xf32> to vector<16x8xbf16>
    %cst_72 = arith.constant dense<0.000000e+00> : vector<8x16xf32>
    %208 = tpu.matmul %203, %205, %cst_72 {dimension_numbers = #tpu.dot_dimension_numbers<[1], [1], [0], [0], [0, 0, 1, 0], [], []>} : vector<8x8xbf16>, vector<16x8xbf16>, vector<8x16xf32> -> vector<8x16xf32>
    %cst_73 = arith.constant 0.353553385 : f32
    %209 = vector.broadcast %cst_73 : f32 to vector<8x16xf32>
    %210 = arith.mulf %208, %209 : vector<8x16xf32>
    %cst_74 = arith.constant dense<0xFF800000> : vector<8xf32>
    %211 = vector.multi_reduction <maximumf>, %210, %cst_74 [1] : vector<8x16xf32> to vector<8xf32>
    %212 = vector.shape_cast %211 : vector<8xf32> to vector<8x1xf32>
    %213 = vector.broadcast %212 : vector<8x1xf32> to vector<8x16xf32>
    %214 = arith.subf %210, %213 : vector<8x16xf32>
    %215 = math.exp %214 : vector<8x16xf32>
    %cst_75 = arith.constant dense<0.000000e+00> : vector<8xf32>
    %216 = vector.multi_reduction <add>, %215, %cst_75 [1] : vector<8x16xf32> to vector<8xf32>
    %217 = vector.shape_cast %216 : vector<8xf32> to vector<8x1xf32>
    %218 = tpu.reciprocal %217 {approx = true} : vector<8x1xf32> -> vector<8x1xf32>
    %219 = vector.broadcast %218 : vector<8x1xf32> to vector<8x16xf32>
    %220 = arith.mulf %215, %219 : vector<8x16xf32>
    %221 = arith.truncf %220 : vector<8x16xf32> to vector<8x16xbf16>
    %cst_76 = arith.constant dense<0.000000e+00> : vector<8x8xf32>
    %222 = tpu.matmul %221, %207, %cst_76 {dimension_numbers = #tpu.dot_dimension_numbers<[1], [0], [0], [1], [0, 0, 1, 1], [], []>} : vector<8x16xbf16>, vector<16x8xbf16>, vector<8x8xf32> -> vector<8x8xf32>
    %223 = arith.truncf %222 : vector<8x8xf32> to vector<8x8xbf16>
    %224 = vector.extract_strided_slice %148 {offsets = [16, 0], sizes = [8, 32], strides = [1, 1]} : vector<32x32xbf16> to vector<8x32xbf16>
    %cst_77 = arith.constant dense<0.000000e+00> : vector<8x32xf32>
    %225 = tpu.matmul %223, %224, %cst_77 {dimension_numbers = #tpu.dot_dimension_numbers<[1], [0], [0], [1], [0, 0, 1, 1], [], []>} : vector<8x8xbf16>, vector<8x32xbf16>, vector<8x32xf32> -> vector<8x32xf32>
    %226 = arith.addf %201, %225 : vector<8x32xf32>
    %227 = vector.extract_strided_slice %139 {offsets = [0, 24], sizes = [8, 8], strides = [1, 1]} : vector<8x32xf32> to vector<8x8xf32>
    %228 = arith.truncf %227 : vector<8x8xf32> to vector<8x8xbf16>
    %229 = vector.extract_strided_slice %146 {offsets = [0, 24], sizes = [16, 8], strides = [1, 1]} : vector<16x32xf32> to vector<16x8xf32>
    %230 = arith.truncf %229 : vector<16x8xf32> to vector<16x8xbf16>
    %231 = vector.extract_strided_slice %147 {offsets = [0, 24], sizes = [16, 8], strides = [1, 1]} : vector<16x32xf32> to vector<16x8xf32>
    %232 = arith.truncf %231 : vector<16x8xf32> to vector<16x8xbf16>
    %cst_78 = arith.constant dense<0.000000e+00> : vector<8x16xf32>
    %233 = tpu.matmul %228, %230, %cst_78 {dimension_numbers = #tpu.dot_dimension_numbers<[1], [1], [0], [0], [0, 0, 1, 0], [], []>} : vector<8x8xbf16>, vector<16x8xbf16>, vector<8x16xf32> -> vector<8x16xf32>
    %cst_79 = arith.constant 0.353553385 : f32
    %234 = vector.broadcast %cst_79 : f32 to vector<8x16xf32>
    %235 = arith.mulf %233, %234 : vector<8x16xf32>
    %cst_80 = arith.constant dense<0xFF800000> : vector<8xf32>
    %236 = vector.multi_reduction <maximumf>, %235, %cst_80 [1] : vector<8x16xf32> to vector<8xf32>
    %237 = vector.shape_cast %236 : vector<8xf32> to vector<8x1xf32>
    %238 = vector.broadcast %237 : vector<8x1xf32> to vector<8x16xf32>
    %239 = arith.subf %235, %238 : vector<8x16xf32>
    %240 = math.exp %239 : vector<8x16xf32>
    %cst_81 = arith.constant dense<0.000000e+00> : vector<8xf32>
    %241 = vector.multi_reduction <add>, %240, %cst_81 [1] : vector<8x16xf32> to vector<8xf32>
    %242 = vector.shape_cast %241 : vector<8xf32> to vector<8x1xf32>
    %243 = tpu.reciprocal %242 {approx = true} : vector<8x1xf32> -> vector<8x1xf32>
    %244 = vector.broadcast %243 : vector<8x1xf32> to vector<8x16xf32>
    %245 = arith.mulf %240, %244 : vector<8x16xf32>
    %246 = arith.truncf %245 : vector<8x16xf32> to vector<8x16xbf16>
    %cst_82 = arith.constant dense<0.000000e+00> : vector<8x8xf32>
    %247 = tpu.matmul %246, %232, %cst_82 {dimension_numbers = #tpu.dot_dimension_numbers<[1], [0], [0], [1], [0, 0, 1, 1], [], []>} : vector<8x16xbf16>, vector<16x8xbf16>, vector<8x8xf32> -> vector<8x8xf32>
    %248 = arith.truncf %247 : vector<8x8xf32> to vector<8x8xbf16>
    %249 = vector.extract_strided_slice %148 {offsets = [24, 0], sizes = [8, 32], strides = [1, 1]} : vector<32x32xbf16> to vector<8x32xbf16>
    %cst_83 = arith.constant dense<0.000000e+00> : vector<8x32xf32>
    %250 = tpu.matmul %248, %249, %cst_83 {dimension_numbers = #tpu.dot_dimension_numbers<[1], [0], [0], [1], [0, 0, 1, 1], [], []>} : vector<8x8xbf16>, vector<8x32xbf16>, vector<8x32xf32> -> vector<8x32xf32>
    %251 = arith.addf %226, %250 : vector<8x32xf32>
    %252 = arith.addf %133, %251 : vector<8x32xf32>
    %c0_84 = arith.constant 0 : index
    %c0_85 = arith.constant 0 : index
    %253 = vector.load %arg15[%c0_84, %c0_85] : memref<1x32xf32, #tpu.memory_space<vmem>>, vector<1x32xf32>
    %c0_86 = arith.constant 0 : index
    %c0_87 = arith.constant 0 : index
    %254 = vector.load %arg16[%c0_86, %c0_87] : memref<1x32xf32, #tpu.memory_space<vmem>>, vector<1x32xf32>
    %cst_88 = arith.constant dense<0.000000e+00> : vector<8xf32>
    %255 = vector.multi_reduction <add>, %252, %cst_88 [1] : vector<8x32xf32> to vector<8xf32>
    %256 = vector.shape_cast %255 : vector<8xf32> to vector<8x1xf32>
    %cst_89 = arith.constant 3.200000e+01 : f32
    %257 = vector.broadcast %cst_89 : f32 to vector<8x1xf32>
    %258 = arith.divf %256, %257 : vector<8x1xf32>
    %259 = vector.broadcast %258 : vector<8x1xf32> to vector<8x32xf32>
    %260 = arith.subf %252, %259 : vector<8x32xf32>
    %261 = arith.mulf %260, %260 : vector<8x32xf32>
    %cst_90 = arith.constant dense<0.000000e+00> : vector<8xf32>
    %262 = vector.multi_reduction <add>, %261, %cst_90 [1] : vector<8x32xf32> to vector<8xf32>
    %263 = vector.shape_cast %262 : vector<8xf32> to vector<8x1xf32>
    %cst_91 = arith.constant 3.200000e+01 : f32
    %264 = vector.broadcast %cst_91 : f32 to vector<8x1xf32>
    %265 = arith.divf %263, %264 : vector<8x1xf32>
    %266 = vector.broadcast %258 : vector<8x1xf32> to vector<8x32xf32>
    %267 = arith.subf %252, %266 : vector<8x32xf32>
    %cst_92 = arith.constant 9.99999974E-6 : f32
    %268 = vector.broadcast %cst_92 : f32 to vector<8x1xf32>
    %269 = arith.addf %265, %268 : vector<8x1xf32>
    %270 = math.rsqrt %269 : vector<8x1xf32>
    %271 = vector.broadcast %270 : vector<8x1xf32> to vector<8x32xf32>
    %272 = arith.mulf %267, %271 : vector<8x32xf32>
    %273 = vector.broadcast %253 : vector<1x32xf32> to vector<8x32xf32>
    %274 = arith.mulf %272, %273 : vector<8x32xf32>
    %275 = vector.broadcast %254 : vector<1x32xf32> to vector<8x32xf32>
    %276 = arith.addf %274, %275 : vector<8x32xf32>
    %277 = arith.truncf %276 : vector<8x32xf32> to vector<8x32xbf16>
    %c0_93 = arith.constant 0 : index
    %c0_94 = arith.constant 0 : index
    %278 = vector.load %arg17[%c0_93, %c0_94] : memref<32x32xbf16, #tpu.memory_space<vmem>>, vector<32x32xbf16>
    %cst_95 = arith.constant dense<0.000000e+00> : vector<8x32xf32>
    %279 = tpu.matmul %277, %278, %cst_95 {dimension_numbers = #tpu.dot_dimension_numbers<[1], [0], [0], [1], [0, 0, 1, 1], [], []>} : vector<8x32xbf16>, vector<32x32xbf16>, vector<8x32xf32> -> vector<8x32xf32>
    %c0_96 = arith.constant 0 : index
    %c0_97 = arith.constant 0 : index
    %280 = vector.load %arg18[%c0_96, %c0_97] : memref<1x32xf32, #tpu.memory_space<vmem>>, vector<1x32xf32>
    %281 = vector.broadcast %280 : vector<1x32xf32> to vector<8x32xf32>
    %282 = arith.addf %279, %281 : vector<8x32xf32>
    %cst_98 = arith.constant 0.000000e+00 : f32
    %283 = vector.broadcast %cst_98 : f32 to vector<8x32xf32>
    %284 = arith.maximumf %282, %283 : vector<8x32xf32>
    %c0_99 = arith.constant 0 : index
    %c0_100 = arith.constant 0 : index
    %285 = vector.load %arg19[%c0_99, %c0_100] : memref<1x32xf32, #tpu.memory_space<vmem>>, vector<1x32xf32>
    %c0_101 = arith.constant 0 : index
    %c0_102 = arith.constant 0 : index
    %286 = vector.load %arg20[%c0_101, %c0_102] : memref<1x32xf32, #tpu.memory_space<vmem>>, vector<1x32xf32>
    %cst_103 = arith.constant dense<0.000000e+00> : vector<8xf32>
    %287 = vector.multi_reduction <add>, %284, %cst_103 [1] : vector<8x32xf32> to vector<8xf32>
    %288 = vector.shape_cast %287 : vector<8xf32> to vector<8x1xf32>
    %cst_104 = arith.constant 3.200000e+01 : f32
    %289 = vector.broadcast %cst_104 : f32 to vector<8x1xf32>
    %290 = arith.divf %288, %289 : vector<8x1xf32>
    %291 = vector.broadcast %290 : vector<8x1xf32> to vector<8x32xf32>
    %292 = arith.subf %284, %291 : vector<8x32xf32>
    %293 = arith.mulf %292, %292 : vector<8x32xf32>
    %cst_105 = arith.constant dense<0.000000e+00> : vector<8xf32>
    %294 = vector.multi_reduction <add>, %293, %cst_105 [1] : vector<8x32xf32> to vector<8xf32>
    %295 = vector.shape_cast %294 : vector<8xf32> to vector<8x1xf32>
    %cst_106 = arith.constant 3.200000e+01 : f32
    %296 = vector.broadcast %cst_106 : f32 to vector<8x1xf32>
    %297 = arith.divf %295, %296 : vector<8x1xf32>
    %298 = vector.broadcast %290 : vector<8x1xf32> to vector<8x32xf32>
    %299 = arith.subf %284, %298 : vector<8x32xf32>
    %cst_107 = arith.constant 9.99999974E-6 : f32
    %300 = vector.broadcast %cst_107 : f32 to vector<8x1xf32>
    %301 = arith.addf %297, %300 : vector<8x1xf32>
    %302 = math.rsqrt %301 : vector<8x1xf32>
    %303 = vector.broadcast %302 : vector<8x1xf32> to vector<8x32xf32>
    %304 = arith.mulf %299, %303 : vector<8x32xf32>
    %305 = vector.broadcast %285 : vector<1x32xf32> to vector<8x32xf32>
    %306 = arith.mulf %304, %305 : vector<8x32xf32>
    %307 = vector.broadcast %286 : vector<1x32xf32> to vector<8x32xf32>
    %308 = arith.addf %306, %307 : vector<8x32xf32>
    %309 = arith.truncf %308 : vector<8x32xf32> to vector<8x32xbf16>
    %c0_108 = arith.constant 0 : index
    %c0_109 = arith.constant 0 : index
    %310 = vector.load %arg21[%c0_108, %c0_109] : memref<32x32xbf16, #tpu.memory_space<vmem>>, vector<32x32xbf16>
    %cst_110 = arith.constant dense<0.000000e+00> : vector<8x32xf32>
    %311 = tpu.matmul %309, %310, %cst_110 {dimension_numbers = #tpu.dot_dimension_numbers<[1], [0], [0], [1], [0, 0, 1, 1], [], []>} : vector<8x32xbf16>, vector<32x32xbf16>, vector<8x32xf32> -> vector<8x32xf32>
    %c0_111 = arith.constant 0 : index
    %c0_112 = arith.constant 0 : index
    %312 = vector.load %arg22[%c0_111, %c0_112] : memref<1x32xf32, #tpu.memory_space<vmem>>, vector<1x32xf32>
    %313 = vector.broadcast %312 : vector<1x32xf32> to vector<8x32xf32>
    %314 = arith.addf %311, %313 : vector<8x32xf32>
    %315 = arith.addf %252, %314 : vector<8x32xf32>
    %c0_113 = arith.constant 0 : index
    %c0_114 = arith.constant 0 : index
    %c0_115 = arith.constant 0 : index
    %316 = vector.load %arg23[%c0_113, %c0_114, %c0_115] : memref<1x8x32xf32, #tpu.memory_space<vmem>>, vector<1x8x32xf32>
    %317 = vector.shape_cast %316 : vector<1x8x32xf32> to vector<8x32xf32>
    %318 = vector.shape_cast %315 : vector<8x32xf32> to vector<1x8x32xf32>
    tpu.vector_store %arg23[%c0_113, %c0_114, %c0_115], %318 {strides = array<i32>} : memref<1x8x32xf32, #tpu.memory_space<vmem>>, vector<1x8x32xf32>,
    return
  }
  func.func @transform_0(%arg0: i32) -> (i32, i32, i32) {
    %c0_i32 = arith.constant 0 : i32
    %c0_i32_0 = arith.constant 0 : i32
    %c0_i32_1 = arith.constant 0 : i32
    return %arg0, %c0_i32, %c0_i32_0 : i32, i32, i32
  }
  func.func @transform_1(%arg0: i32) -> (i32, i32, i32) {
    %c0_i32 = arith.constant 0 : i32
    %c0_i32_0 = arith.constant 0 : i32
    %c0_i32_1 = arith.constant 0 : i32
    return %arg0, %c0_i32, %c0_i32_0 : i32, i32, i32
  }
  func.func @transform_2(%arg0: i32) -> (i32, i32) {
    %c0_i32 = arith.constant 0 : i32
    %c0_i32_0 = arith.constant 0 : i32
    %c0_i32_1 = arith.constant 0 : i32
    return %c0_i32, %c0_i32_0 : i32, i32
  }
  func.func @transform_3(%arg0: i32) -> (i32, i32) {
    %c0_i32 = arith.constant 0 : i32
    %c0_i32_0 = arith.constant 0 : i32
    %c0_i32_1 = arith.constant 0 : i32
    return %c0_i32, %c0_i32_0 : i32, i32
  }
  func.func @transform_4(%arg0: i32) -> (i32, i32) {
    %c0_i32 = arith.constant 0 : i32
    %c0_i32_0 = arith.constant 0 : i32
    %c0_i32_1 = arith.constant 0 : i32
    return %c0_i32, %c0_i32_0 : i32, i32
  }
  func.func @transform_5(%arg0: i32) -> (i32, i32) {
    %c0_i32 = arith.constant 0 : i32
    %c0_i32_0 = arith.constant 0 : i32
    %c0_i32_1 = arith.constant 0 : i32
    return %c0_i32, %c0_i32_0 : i32, i32
  }
  func.func @transform_6(%arg0: i32) -> (i32, i32) {
    %c0_i32 = arith.constant 0 : i32
    %c0_i32_0 = arith.constant 0 : i32
    %c0_i32_1 = arith.constant 0 : i32
    return %c0_i32, %c0_i32_0 : i32, i32
  }
  func.func @transform_7(%arg0: i32) -> (i32, i32) {
    %c0_i32 = arith.constant 0 : i32
    %c0_i32_0 = arith.constant 0 : i32
    %c0_i32_1 = arith.constant 0 : i32
    return %c0_i32, %c0_i32_0 : i32, i32
  }
  func.func @transform_8(%arg0: i32) -> (i32, i32) {
    %c0_i32 = arith.constant 0 : i32
    %c0_i32_0 = arith.constant 0 : i32
    %c0_i32_1 = arith.constant 0 : i32
    return %c0_i32, %c0_i32_0 : i32, i32
  }
  func.func @transform_9(%arg0: i32) -> (i32, i32) {
    %c0_i32 = arith.constant 0 : i32
    %c0_i32_0 = arith.constant 0 : i32
    %c0_i32_1 = arith.constant 0 : i32
    return %c0_i32, %c0_i32_0 : i32, i32
  }
  func.func @transform_10(%arg0: i32) -> (i32, i32) {
    %c0_i32 = arith.constant 0 : i32
    %c0_i32_0 = arith.constant 0 : i32
    %c0_i32_1 = arith.constant 0 : i32
    return %c0_i32, %c0_i32_0 : i32, i32
  }
  func.func @transform_11(%arg0: i32) -> (i32, i32) {
    %c0_i32 = arith.constant 0 : i32
    %c0_i32_0 = arith.constant 0 : i32
    %c0_i32_1 = arith.constant 0 : i32
    return %c0_i32, %c0_i32_0 : i32, i32
  }
  func.func @transform_12(%arg0: i32) -> (i32, i32) {
    %c0_i32 = arith.constant 0 : i32
    %c0_i32_0 = arith.constant 0 : i32
    %c0_i32_1 = arith.constant 0 : i32
    return %c0_i32, %c0_i32_0 : i32, i32
  }
  func.func @transform_13(%arg0: i32) -> (i32, i32) {
    %c0_i32 = arith.constant 0 : i32
    %c0_i32_0 = arith.constant 0 : i32
    %c0_i32_1 = arith.constant 0 : i32
    return %c0_i32, %c0_i32_0 : i32, i32
  }
  func.func @transform_14(%arg0: i32) -> (i32, i32) {
    %c0_i32 = arith.constant 0 : i32
    %c0_i32_0 = arith.constant 0 : i32
    %c0_i32_1 = arith.constant 0 : i32
    return %c0_i32, %c0_i32_0 : i32, i32
  }
  func.func @transform_15(%arg0: i32) -> (i32, i32) {
    %c0_i32 = arith.constant 0 : i32
    %c0_i32_0 = arith.constant 0 : i32
    %c0_i32_1 = arith.constant 0 : i32
    return %c0_i32, %c0_i32_0 : i32, i32
  }
  func.func @transform_16(%arg0: i32) -> (i32, i32) {
    %c0_i32 = arith.constant 0 : i32
    %c0_i32_0 = arith.constant 0 : i32
    %c0_i32_1 = arith.constant 0 : i32
    return %c0_i32, %c0_i32_0 : i32, i32
  }
  func.func @transform_17(%arg0: i32) -> (i32, i32) {
    %c0_i32 = arith.constant 0 : i32
    %c0_i32_0 = arith.constant 0 : i32
    %c0_i32_1 = arith.constant 0 : i32
    return %c0_i32, %c0_i32_0 : i32, i32
  }
  func.func @transform_18(%arg0: i32) -> (i32, i32) {
    %c0_i32 = arith.constant 0 : i32
    %c0_i32_0 = arith.constant 0 : i32
    %c0_i32_1 = arith.constant 0 : i32
    return %c0_i32, %c0_i32_0 : i32, i32
  }
  func.func @transform_19(%arg0: i32) -> (i32, i32) {
    %c0_i32 = arith.constant 0 : i32
    %c0_i32_0 = arith.constant 0 : i32
    %c0_i32_1 = arith.constant 0 : i32
    return %c0_i32, %c0_i32_0 : i32, i32
  }
  func.func @transform_20(%arg0: i32) -> (i32, i32) {
    %c0_i32 = arith.constant 0 : i32
    %c0_i32_0 = arith.constant 0 : i32
    %c0_i32_1 = arith.constant 0 : i32
    return %c0_i32, %c0_i32_0 : i32, i32
  }
  func.func @transform_21(%arg0: i32) -> (i32, i32) {
    %c0_i32 = arith.constant 0 : i32
    %c0_i32_0 = arith.constant 0 : i32
    %c0_i32_1 = arith.constant 0 : i32
    return %c0_i32, %c0_i32_0 : i32, i32
  }
  func.func @transform_22(%arg0: i32) -> (i32, i32, i32) {
    %c0_i32 = arith.constant 0 : i32
    %c0_i32_0 = arith.constant 0 : i32
    %c0_i32_1 = arith.constant 0 : i32
    return %arg0, %c0_i32, %c0_i32_0 : i32, i32, i32
  }
}

module attributes {stable_mosaic.version = 11 : i64} {
  func.func @kernel(%arg0: i32, %arg1: memref<16x64xf32, #tpu.memory_space<vmem>>, %arg2: memref<1x64xf32, #tpu.memory_space<vmem>>, %arg3: memref<1x64xf32, #tpu.memory_space<vmem>>, %arg4: memref<64x128xbf16, #tpu.memory_space<vmem>>, %arg5: memref<1x128xf32, #tpu.memory_space<vmem>>, %arg6: memref<16x128xf32, #tpu.memory_space<vmem>>) attributes {dimension_semantics = [#tpu.dimension_semantics<parallel>], iteration_bounds = array<i64: 1>, scalar_prefetch = 0 : i64, scratch_operands = 0 : i64, tpu.core_type = #tpu.core_type<tc>, window_params = [{transform_indices = @transform_0, window_bounds = array<i64: 16, 64>}, {pipeline_mode = #tpu.pipeline_mode<synchronous>, transform_indices = @transform_1, window_bounds = array<i64: 1, 64>}, {pipeline_mode = #tpu.pipeline_mode<synchronous>, transform_indices = @transform_2, window_bounds = array<i64: 1, 64>}, {pipeline_mode = #tpu.pipeline_mode<synchronous>, transform_indices = @transform_3, window_bounds = array<i64: 64, 128>}, {pipeline_mode = #tpu.pipeline_mode<synchronous>, transform_indices = @transform_4, window_bounds = array<i64: 1, 128>}, {transform_indices = @transform_5, window_bounds = array<i64: 16, 128>}]} {
    %c0 = arith.constant 0 : index
    %c0_0 = arith.constant 0 : index
    %0 = vector.load %arg1[%c0, %c0_0] : memref<16x64xf32, #tpu.memory_space<vmem>>, vector<16x64xf32>
    %c0_1 = arith.constant 0 : index
    %c0_2 = arith.constant 0 : index
    %1 = vector.load %arg2[%c0_1, %c0_2] : memref<1x64xf32, #tpu.memory_space<vmem>>, vector<1x64xf32>
    %c0_3 = arith.constant 0 : index
    %c0_4 = arith.constant 0 : index
    %2 = vector.load %arg3[%c0_3, %c0_4] : memref<1x64xf32, #tpu.memory_space<vmem>>, vector<1x64xf32>
    %cst = arith.constant dense<0.000000e+00> : vector<16xf32>
    %3 = vector.multi_reduction <add>, %0, %cst [1] : vector<16x64xf32> to vector<16xf32>
    %4 = vector.shape_cast %3 : vector<16xf32> to vector<16x1xf32>
    %cst_5 = arith.constant 6.400000e+01 : f32
    %5 = vector.broadcast %cst_5 : f32 to vector<16x1xf32>
    %6 = arith.divf %4, %5 : vector<16x1xf32>
    %7 = vector.broadcast %6 : vector<16x1xf32> to vector<16x64xf32>
    %8 = arith.subf %0, %7 : vector<16x64xf32>
    %9 = arith.mulf %8, %8 : vector<16x64xf32>
    %cst_6 = arith.constant dense<0.000000e+00> : vector<16xf32>
    %10 = vector.multi_reduction <add>, %9, %cst_6 [1] : vector<16x64xf32> to vector<16xf32>
    %11 = vector.shape_cast %10 : vector<16xf32> to vector<16x1xf32>
    %cst_7 = arith.constant 6.400000e+01 : f32
    %12 = vector.broadcast %cst_7 : f32 to vector<16x1xf32>
    %13 = arith.divf %11, %12 : vector<16x1xf32>
    %14 = vector.broadcast %6 : vector<16x1xf32> to vector<16x64xf32>
    %15 = arith.subf %0, %14 : vector<16x64xf32>
    %cst_8 = arith.constant 9.99999974E-6 : f32
    %16 = vector.broadcast %cst_8 : f32 to vector<16x1xf32>
    %17 = arith.addf %13, %16 : vector<16x1xf32>
    %18 = math.rsqrt %17 : vector<16x1xf32>
    %19 = vector.broadcast %18 : vector<16x1xf32> to vector<16x64xf32>
    %20 = arith.mulf %15, %19 : vector<16x64xf32>
    %21 = vector.broadcast %1 : vector<1x64xf32> to vector<16x64xf32>
    %22 = arith.mulf %20, %21 : vector<16x64xf32>
    %23 = vector.broadcast %2 : vector<1x64xf32> to vector<16x64xf32>
    %24 = arith.addf %22, %23 : vector<16x64xf32>
    %25 = arith.truncf %24 : vector<16x64xf32> to vector<16x64xbf16>
    %c0_9 = arith.constant 0 : index
    %c0_10 = arith.constant 0 : index
    %26 = vector.load %arg4[%c0_9, %c0_10] : memref<64x128xbf16, #tpu.memory_space<vmem>>, vector<64x128xbf16>
    %cst_11 = arith.constant dense<0.000000e+00> : vector<16x128xf32>
    %27 = tpu.matmul %25, %26, %cst_11 {dimension_numbers = #tpu.dot_dimension_numbers<[1], [0], [0], [1], [0, 0, 1, 1], [], []>} : vector<16x64xbf16>, vector<64x128xbf16>, vector<16x128xf32> -> vector<16x128xf32>
    %c0_12 = arith.constant 0 : index
    %c0_13 = arith.constant 0 : index
    %28 = vector.load %arg5[%c0_12, %c0_13] : memref<1x128xf32, #tpu.memory_space<vmem>>, vector<1x128xf32>
    %29 = vector.broadcast %28 : vector<1x128xf32> to vector<16x128xf32>
    %30 = arith.addf %27, %29 : vector<16x128xf32>
    %c0_14 = arith.constant 0 : index
    %c0_15 = arith.constant 0 : index
    %31 = vector.load %arg6[%c0_14, %c0_15] : memref<16x128xf32, #tpu.memory_space<vmem>>, vector<16x128xf32>
    tpu.vector_store %arg6[%c0_14, %c0_15], %30 {strides = array<i32>} : memref<16x128xf32, #tpu.memory_space<vmem>>, vector<16x128xf32>,
    return
  }
  func.func @transform_0(%arg0: i32) -> (i32, i32) {
    %c0_i32 = arith.constant 0 : i32
    %c0_i32_0 = arith.constant 0 : i32
    return %arg0, %c0_i32 : i32, i32
  }
  func.func @transform_1(%arg0: i32) -> (i32, i32) {
    %c0_i32 = arith.constant 0 : i32
    %c0_i32_0 = arith.constant 0 : i32
    %c0_i32_1 = arith.constant 0 : i32
    return %c0_i32, %c0_i32_0 : i32, i32
  }
  func.func @transform_2(%arg0: i32) -> (i32, i32) {
    %c0_i32 = arith.constant 0 : i32
    %c0_i32_0 = arith.constant 0 : i32
    %c0_i32_1 = arith.constant 0 : i32
    return %c0_i32, %c0_i32_0 : i32, i32
  }
  func.func @transform_3(%arg0: i32) -> (i32, i32) {
    %c0_i32 = arith.constant 0 : i32
    %c0_i32_0 = arith.constant 0 : i32
    %c0_i32_1 = arith.constant 0 : i32
    return %c0_i32, %c0_i32_0 : i32, i32
  }
  func.func @transform_4(%arg0: i32) -> (i32, i32) {
    %c0_i32 = arith.constant 0 : i32
    %c0_i32_0 = arith.constant 0 : i32
    %c0_i32_1 = arith.constant 0 : i32
    return %c0_i32, %c0_i32_0 : i32, i32
  }
  func.func @transform_5(%arg0: i32) -> (i32, i32) {
    %c0_i32 = arith.constant 0 : i32
    %c0_i32_0 = arith.constant 0 : i32
    return %arg0, %c0_i32 : i32, i32
  }
}

module attributes {stable_mosaic.version = 11 : i64} {
  func.func @kernel(%arg0: i32, %arg1: memref<16x32xf32, #tpu.memory_space<vmem>>, %arg2: memref<1x32xf32, #tpu.memory_space<vmem>>, %arg3: memref<1x32xf32, #tpu.memory_space<vmem>>, %arg4: memref<32x128xbf16, #tpu.memory_space<vmem>>, %arg5: memref<1x128xf32, #tpu.memory_space<vmem>>, %arg6: memref<16x128xf32, #tpu.memory_space<vmem>>) attributes {dimension_semantics = [#tpu.dimension_semantics<parallel>], iteration_bounds = array<i64: 1>, scalar_prefetch = 0 : i64, scratch_operands = 0 : i64, tpu.core_type = #tpu.core_type<tc>, window_params = [{transform_indices = @transform_0, window_bounds = array<i64: 16, 32>}, {pipeline_mode = #tpu.pipeline_mode<synchronous>, transform_indices = @transform_1, window_bounds = array<i64: 1, 32>}, {pipeline_mode = #tpu.pipeline_mode<synchronous>, transform_indices = @transform_2, window_bounds = array<i64: 1, 32>}, {pipeline_mode = #tpu.pipeline_mode<synchronous>, transform_indices = @transform_3, window_bounds = array<i64: 32, 128>}, {pipeline_mode = #tpu.pipeline_mode<synchronous>, transform_indices = @transform_4, window_bounds = array<i64: 1, 128>}, {transform_indices = @transform_5, window_bounds = array<i64: 16, 128>}]} {
    %c0 = arith.constant 0 : index
    %c0_0 = arith.constant 0 : index
    %0 = vector.load %arg1[%c0, %c0_0] : memref<16x32xf32, #tpu.memory_space<vmem>>, vector<16x32xf32>
    %c0_1 = arith.constant 0 : index
    %c0_2 = arith.constant 0 : index
    %1 = vector.load %arg2[%c0_1, %c0_2] : memref<1x32xf32, #tpu.memory_space<vmem>>, vector<1x32xf32>
    %c0_3 = arith.constant 0 : index
    %c0_4 = arith.constant 0 : index
    %2 = vector.load %arg3[%c0_3, %c0_4] : memref<1x32xf32, #tpu.memory_space<vmem>>, vector<1x32xf32>
    %cst = arith.constant dense<0.000000e+00> : vector<16xf32>
    %3 = vector.multi_reduction <add>, %0, %cst [1] : vector<16x32xf32> to vector<16xf32>
    %4 = vector.shape_cast %3 : vector<16xf32> to vector<16x1xf32>
    %cst_5 = arith.constant 3.200000e+01 : f32
    %5 = vector.broadcast %cst_5 : f32 to vector<16x1xf32>
    %6 = arith.divf %4, %5 : vector<16x1xf32>
    %7 = vector.broadcast %6 : vector<16x1xf32> to vector<16x32xf32>
    %8 = arith.subf %0, %7 : vector<16x32xf32>
    %9 = arith.mulf %8, %8 : vector<16x32xf32>
    %cst_6 = arith.constant dense<0.000000e+00> : vector<16xf32>
    %10 = vector.multi_reduction <add>, %9, %cst_6 [1] : vector<16x32xf32> to vector<16xf32>
    %11 = vector.shape_cast %10 : vector<16xf32> to vector<16x1xf32>
    %cst_7 = arith.constant 3.200000e+01 : f32
    %12 = vector.broadcast %cst_7 : f32 to vector<16x1xf32>
    %13 = arith.divf %11, %12 : vector<16x1xf32>
    %14 = vector.broadcast %6 : vector<16x1xf32> to vector<16x32xf32>
    %15 = arith.subf %0, %14 : vector<16x32xf32>
    %cst_8 = arith.constant 9.99999974E-6 : f32
    %16 = vector.broadcast %cst_8 : f32 to vector<16x1xf32>
    %17 = arith.addf %13, %16 : vector<16x1xf32>
    %18 = math.rsqrt %17 : vector<16x1xf32>
    %19 = vector.broadcast %18 : vector<16x1xf32> to vector<16x32xf32>
    %20 = arith.mulf %15, %19 : vector<16x32xf32>
    %21 = vector.broadcast %1 : vector<1x32xf32> to vector<16x32xf32>
    %22 = arith.mulf %20, %21 : vector<16x32xf32>
    %23 = vector.broadcast %2 : vector<1x32xf32> to vector<16x32xf32>
    %24 = arith.addf %22, %23 : vector<16x32xf32>
    %25 = arith.truncf %24 : vector<16x32xf32> to vector<16x32xbf16>
    %c0_9 = arith.constant 0 : index
    %c0_10 = arith.constant 0 : index
    %26 = vector.load %arg4[%c0_9, %c0_10] : memref<32x128xbf16, #tpu.memory_space<vmem>>, vector<32x128xbf16>
    %cst_11 = arith.constant dense<0.000000e+00> : vector<16x128xf32>
    %27 = tpu.matmul %25, %26, %cst_11 {dimension_numbers = #tpu.dot_dimension_numbers<[1], [0], [0], [1], [0, 0, 1, 1], [], []>} : vector<16x32xbf16>, vector<32x128xbf16>, vector<16x128xf32> -> vector<16x128xf32>
    %c0_12 = arith.constant 0 : index
    %c0_13 = arith.constant 0 : index
    %28 = vector.load %arg5[%c0_12, %c0_13] : memref<1x128xf32, #tpu.memory_space<vmem>>, vector<1x128xf32>
    %29 = vector.broadcast %28 : vector<1x128xf32> to vector<16x128xf32>
    %30 = arith.addf %27, %29 : vector<16x128xf32>
    %c0_14 = arith.constant 0 : index
    %c0_15 = arith.constant 0 : index
    %31 = vector.load %arg6[%c0_14, %c0_15] : memref<16x128xf32, #tpu.memory_space<vmem>>, vector<16x128xf32>
    tpu.vector_store %arg6[%c0_14, %c0_15], %30 {strides = array<i32>} : memref<16x128xf32, #tpu.memory_space<vmem>>, vector<16x128xf32>,
    return
  }
  func.func @transform_0(%arg0: i32) -> (i32, i32) {
    %c0_i32 = arith.constant 0 : i32
    %c0_i32_0 = arith.constant 0 : i32
    return %arg0, %c0_i32 : i32, i32
  }
  func.func @transform_1(%arg0: i32) -> (i32, i32) {
    %c0_i32 = arith.constant 0 : i32
    %c0_i32_0 = arith.constant 0 : i32
    %c0_i32_1 = arith.constant 0 : i32
    return %c0_i32, %c0_i32_0 : i32, i32
  }
  func.func @transform_2(%arg0: i32) -> (i32, i32) {
    %c0_i32 = arith.constant 0 : i32
    %c0_i32_0 = arith.constant 0 : i32
    %c0_i32_1 = arith.constant 0 : i32
    return %c0_i32, %c0_i32_0 : i32, i32
  }
  func.func @transform_3(%arg0: i32) -> (i32, i32) {
    %c0_i32 = arith.constant 0 : i32
    %c0_i32_0 = arith.constant 0 : i32
    %c0_i32_1 = arith.constant 0 : i32
    return %c0_i32, %c0_i32_0 : i32, i32
  }
  func.func @transform_4(%arg0: i32) -> (i32, i32) {
    %c0_i32 = arith.constant 0 : i32
    %c0_i32_0 = arith.constant 0 : i32
    %c0_i32_1 = arith.constant 0 : i32
    return %c0_i32, %c0_i32_0 : i32, i32
  }
  func.func @transform_5(%arg0: i32) -> (i32, i32) {
    %c0_i32 = arith.constant 0 : i32
    %c0_i32_0 = arith.constant 0 : i32
    return %arg0, %c0_i32 : i32, i32
  }
}

module attributes {stable_mosaic.version = 11 : i64} {
  func.func @kernel(%arg0: i32, %arg1: memref<1x8x32xf32, #tpu.memory_space<vmem>>, %arg2: memref<1x16x32xf32, #tpu.memory_space<vmem>>, %arg3: memref<32x32xbf16, #tpu.memory_space<vmem>>, %arg4: memref<1x32xf32, #tpu.memory_space<vmem>>, %arg5: memref<32x64xbf16, #tpu.memory_space<vmem>>, %arg6: memref<1x64xf32, #tpu.memory_space<vmem>>, %arg7: memref<32x32xbf16, #tpu.memory_space<vmem>>, %arg8: memref<1x32xf32, #tpu.memory_space<vmem>>, %arg9: memref<32x32xbf16, #tpu.memory_space<vmem>>, %arg10: memref<1x32xf32, #tpu.memory_space<vmem>>, %arg11: memref<32x64xbf16, #tpu.memory_space<vmem>>, %arg12: memref<1x64xf32, #tpu.memory_space<vmem>>, %arg13: memref<32x32xbf16, #tpu.memory_space<vmem>>, %arg14: memref<1x32xf32, #tpu.memory_space<vmem>>, %arg15: memref<1x32xf32, #tpu.memory_space<vmem>>, %arg16: memref<1x32xf32, #tpu.memory_space<vmem>>, %arg17: memref<32x32xbf16, #tpu.memory_space<vmem>>, %arg18: memref<1x32xf32, #tpu.memory_space<vmem>>, %arg19: memref<1x32xf32, #tpu.memory_space<vmem>>, %arg20: memref<1x32xf32, #tpu.memory_space<vmem>>, %arg21: memref<32x32xbf16, #tpu.memory_space<vmem>>, %arg22: memref<1x32xf32, #tpu.memory_space<vmem>>, %arg23: memref<1x8x32xf32, #tpu.memory_space<vmem>>) attributes {dimension_semantics = [#tpu.dimension_semantics<parallel>], iteration_bounds = array<i64: 2>, scalar_prefetch = 0 : i64, scratch_operands = 0 : i64, tpu.core_type = #tpu.core_type<tc>, window_params = [{transform_indices = @transform_0, window_bounds = array<i64: 1, 8, 32>}, {transform_indices = @transform_1, window_bounds = array<i64: 1, 16, 32>}, {pipeline_mode = #tpu.pipeline_mode<synchronous>, transform_indices = @transform_2, window_bounds = array<i64: 32, 32>}, {pipeline_mode = #tpu.pipeline_mode<synchronous>, transform_indices = @transform_3, window_bounds = array<i64: 1, 32>}, {pipeline_mode = #tpu.pipeline_mode<synchronous>, transform_indices = @transform_4, window_bounds = array<i64: 32, 64>}, {pipeline_mode = #tpu.pipeline_mode<synchronous>, transform_indices = @transform_5, window_bounds = array<i64: 1, 64>}, {pipeline_mode = #tpu.pipeline_mode<synchronous>, transform_indices = @transform_6, window_bounds = array<i64: 32, 32>}, {pipeline_mode = #tpu.pipeline_mode<synchronous>, transform_indices = @transform_7, window_bounds = array<i64: 1, 32>}, {pipeline_mode = #tpu.pipeline_mode<synchronous>, transform_indices = @transform_8, window_bounds = array<i64: 32, 32>}, {pipeline_mode = #tpu.pipeline_mode<synchronous>, transform_indices = @transform_9, window_bounds = array<i64: 1, 32>}, {pipeline_mode = #tpu.pipeline_mode<synchronous>, transform_indices = @transform_10, window_bounds = array<i64: 32, 64>}, {pipeline_mode = #tpu.pipeline_mode<synchronous>, transform_indices = @transform_11, window_bounds = array<i64: 1, 64>}, {pipeline_mode = #tpu.pipeline_mode<synchronous>, transform_indices = @transform_12, window_bounds = array<i64: 32, 32>}, {pipeline_mode = #tpu.pipeline_mode<synchronous>, transform_indices = @transform_13, window_bounds = array<i64: 1, 32>}, {pipeline_mode = #tpu.pipeline_mode<synchronous>, transform_indices = @transform_14, window_bounds = array<i64: 1, 32>}, {pipeline_mode = #tpu.pipeline_mode<synchronous>, transform_indices = @transform_15, window_bounds = array<i64: 1, 32>}, {pipeline_mode = #tpu.pipeline_mode<synchronous>, transform_indices = @transform_16, window_bounds = array<i64: 32, 32>}, {pipeline_mode = #tpu.pipeline_mode<synchronous>, transform_indices = @transform_17, window_bounds = array<i64: 1, 32>}, {pipeline_mode = #tpu.pipeline_mode<synchronous>, transform_indices = @transform_18, window_bounds = array<i64: 1, 32>}, {pipeline_mode = #tpu.pipeline_mode<synchronous>, transform_indices = @transform_19, window_bounds = array<i64: 1, 32>}, {pipeline_mode = #tpu.pipeline_mode<synchronous>, transform_indices = @transform_20, window_bounds = array<i64: 32, 32>}, {pipeline_mode = #tpu.pipeline_mode<synchronous>, transform_indices = @transform_21, window_bounds = array<i64: 1, 32>}, {transform_indices = @transform_22, window_bounds = array<i64: 1, 8, 32>}]} {
    %c0 = arith.constant 0 : index
    %c0_0 = arith.constant 0 : index
    %c0_1 = arith.constant 0 : index
    %0 = vector.load %arg1[%c0, %c0_0, %c0_1] : memref<1x8x32xf32, #tpu.memory_space<vmem>>, vector<1x8x32xf32>
    %1 = vector.shape_cast %0 : vector<1x8x32xf32> to vector<8x32xf32>
    %c0_2 = arith.constant 0 : index
    %c0_3 = arith.constant 0 : index
    %c0_4 = arith.constant 0 : index
    %2 = vector.load %arg2[%c0_2, %c0_3, %c0_4] : memref<1x16x32xf32, #tpu.memory_space<vmem>>, vector<1x16x32xf32>
    %3 = vector.shape_cast %2 : vector<1x16x32xf32> to vector<16x32xf32>
    %4 = tpu.iota {dimensions = array<i32: 0>} : vector<8x8xi32>
    %5 = tpu.iota {dimensions = array<i32: 1>} : vector<8x8xi32>
    %6 = arith.cmpi sge, %4, %5 : vector<8x8xi32>
    %7 = arith.truncf %1 : vector<8x32xf32> to vector<8x32xbf16>
    %c0_5 = arith.constant 0 : index
    %c0_6 = arith.constant 0 : index
    %8 = vector.load %arg3[%c0_5, %c0_6] : memref<32x32xbf16, #tpu.memory_space<vmem>>, vector<32x32xbf16>
    %cst = arith.constant dense<0.000000e+00> : vector<8x32xf32>
    %9 = tpu.matmul %7, %8, %cst {dimension_numbers = #tpu.dot_dimension_numbers<[1], [0], [0], [1], [0, 0, 1, 1], [], []>} : vector<8x32xbf16>, vector<32x32xbf16>, vector<8x32xf32> -> vector<8x32xf32>
    %c0_7 = arith.constant 0 : index
    %c0_8 = arith.constant 0 : index
    %10 = vector.load %arg4[%c0_7, %c0_8] : memref<1x32xf32, #tpu.memory_space<vmem>>, vector<1x32xf32>
    %11 = vector.broadcast %10 : vector<1x32xf32> to vector<8x32xf32>
    %12 = arith.addf %9, %11 : vector<8x32xf32>
    %13 = arith.truncf %1 : vector<8x32xf32> to vector<8x32xbf16>
    %c0_9 = arith.constant 0 : index
    %c0_10 = arith.constant 0 : index
    %14 = vector.load %arg5[%c0_9, %c0_10] : memref<32x64xbf16, #tpu.memory_space<vmem>>, vector<32x64xbf16>
    %cst_11 = arith.constant dense<0.000000e+00> : vector<8x64xf32>
    %15 = tpu.matmul %13, %14, %cst_11 {dimension_numbers = #tpu.dot_dimension_numbers<[1], [0], [0], [1], [0, 0, 1, 1], [], []>} : vector<8x32xbf16>, vector<32x64xbf16>, vector<8x64xf32> -> vector<8x64xf32>
    %c0_12 = arith.constant 0 : index
    %c0_13 = arith.constant 0 : index
    %16 = vector.load %arg6[%c0_12, %c0_13] : memref<1x64xf32, #tpu.memory_space<vmem>>, vector<1x64xf32>
    %17 = vector.broadcast %16 : vector<1x64xf32> to vector<8x64xf32>
    %18 = arith.addf %15, %17 : vector<8x64xf32>
    %19 = vector.extract_strided_slice %18 {offsets = [0, 0], sizes = [8, 32], strides = [1, 1]} : vector<8x64xf32> to vector<8x32xf32>
    %20 = vector.extract_strided_slice %18 {offsets = [0, 32], sizes = [8, 32], strides = [1, 1]} : vector<8x64xf32> to vector<8x32xf32>
    %c0_14 = arith.constant 0 : index
    %c0_15 = arith.constant 0 : index
    %21 = vector.load %arg7[%c0_14, %c0_15] : memref<32x32xbf16, #tpu.memory_space<vmem>>, vector<32x32xbf16>
    %c0_16 = arith.constant 0 : index
    %c0_17 = arith.constant 0 : index
    %22 = vector.load %arg8[%c0_16, %c0_17] : memref<1x32xf32, #tpu.memory_space<vmem>>, vector<1x32xf32>
    %23 = vector.shape_cast %22 : vector<1x32xf32> to vector<1x32xf32>
    %24 = vector.broadcast %23 : vector<1x32xf32> to vector<8x32xf32>
    %25 = vector.extract_strided_slice %12 {offsets = [0, 0], sizes = [8, 8], strides = [1, 1]} : vector<8x32xf32> to vector<8x8xf32>
    %26 = arith.truncf %25 : vector<8x8xf32> to vector<8x8xbf16>
    %27 = vector.extract_strided_slice %19 {offsets = [0, 0], sizes = [8, 8], strides = [1, 1]} : vector<8x32xf32> to vector<8x8xf32>
    %28 = arith.truncf %27 : vector<8x8xf32> to vector<8x8xbf16>
    %29 = vector.extract_strided_slice %20 {offsets = [0, 0], sizes = [8, 8], strides = [1, 1]} : vector<8x32xf32> to vector<8x8xf32>
    %30 = arith.truncf %29 : vector<8x8xf32> to vector<8x8xbf16>
    %cst_18 = arith.constant dense<0.000000e+00> : vector<8x8xf32>
    %31 = tpu.matmul %26, %28, %cst_18 {dimension_numbers = #tpu.dot_dimension_numbers<[1], [1], [0], [0], [0, 0, 1, 0], [], []>} : vector<8x8xbf16>, vector<8x8xbf16>, vector<8x8xf32> -> vector<8x8xf32>
    %cst_19 = arith.constant 0.353553385 : f32
    %32 = vector.broadcast %cst_19 : f32 to vector<8x8xf32>
    %33 = arith.mulf %31, %32 : vector<8x8xf32>
    %cst_20 = arith.constant -1.000000e+30 : f32
    %34 = vector.broadcast %cst_20 : f32 to vector<8x8xf32>
    %35 = arith.select %6, %33, %34 : vector<8x8xi1>, vector<8x8xf32>
    %cst_21 = arith.constant dense<0xFF800000> : vector<8xf32>
    %36 = vector.multi_reduction <maximumf>, %35, %cst_21 [1] : vector<8x8xf32> to vector<8xf32>
    %37 = vector.shape_cast %36 : vector<8xf32> to vector<8x1xf32>
    %38 = vector.broadcast %37 : vector<8x1xf32> to vector<8x8xf32>
    %39 = arith.subf %35, %38 : vector<8x8xf32>
    %40 = math.exp %39 : vector<8x8xf32>
    %cst_22 = arith.constant dense<0.000000e+00> : vector<8xf32>
    %41 = vector.multi_reduction <add>, %40, %cst_22 [1] : vector<8x8xf32> to vector<8xf32>
    %42 = vector.shape_cast %41 : vector<8xf32> to vector<8x1xf32>
    %43 = tpu.reciprocal %42 {approx = true} : vector<8x1xf32> -> vector<8x1xf32>
    %44 = vector.broadcast %43 : vector<8x1xf32> to vector<8x8xf32>
    %45 = arith.mulf %40, %44 : vector<8x8xf32>
    %46 = arith.truncf %45 : vector<8x8xf32> to vector<8x8xbf16>
    %cst_23 = arith.constant dense<0.000000e+00> : vector<8x8xf32>
    %47 = tpu.matmul %46, %30, %cst_23 {dimension_numbers = #tpu.dot_dimension_numbers<[1], [0], [0], [1], [0, 0, 1, 1], [], []>} : vector<8x8xbf16>, vector<8x8xbf16>, vector<8x8xf32> -> vector<8x8xf32>
    %48 = arith.truncf %47 : vector<8x8xf32> to vector<8x8xbf16>
    %49 = vector.extract_strided_slice %21 {offsets = [0, 0], sizes = [8, 32], strides = [1, 1]} : vector<32x32xbf16> to vector<8x32xbf16>
    %cst_24 = arith.constant dense<0.000000e+00> : vector<8x32xf32>
    %50 = tpu.matmul %48, %49, %cst_24 {dimension_numbers = #tpu.dot_dimension_numbers<[1], [0], [0], [1], [0, 0, 1, 1], [], []>} : vector<8x8xbf16>, vector<8x32xbf16>, vector<8x32xf32> -> vector<8x32xf32>
    %51 = arith.addf %24, %50 : vector<8x32xf32>
    %52 = vector.extract_strided_slice %12 {offsets = [0, 8], sizes = [8, 8], strides = [1, 1]} : vector<8x32xf32> to vector<8x8xf32>
    %53 = arith.truncf %52 : vector<8x8xf32> to vector<8x8xbf16>
    %54 = vector.extract_strided_slice %19 {offsets = [0, 8], sizes = [8, 8], strides = [1, 1]} : vector<8x32xf32> to vector<8x8xf32>
    %55 = arith.truncf %54 : vector<8x8xf32> to vector<8x8xbf16>
    %56 = vector.extract_strided_slice %20 {offsets = [0, 8], sizes = [8, 8], strides = [1, 1]} : vector<8x32xf32> to vector<8x8xf32>
    %57 = arith.truncf %56 : vector<8x8xf32> to vector<8x8xbf16>
    %cst_25 = arith.constant dense<0.000000e+00> : vector<8x8xf32>
    %58 = tpu.matmul %53, %55, %cst_25 {dimension_numbers = #tpu.dot_dimension_numbers<[1], [1], [0], [0], [0, 0, 1, 0], [], []>} : vector<8x8xbf16>, vector<8x8xbf16>, vector<8x8xf32> -> vector<8x8xf32>
    %cst_26 = arith.constant 0.353553385 : f32
    %59 = vector.broadcast %cst_26 : f32 to vector<8x8xf32>
    %60 = arith.mulf %58, %59 : vector<8x8xf32>
    %cst_27 = arith.constant -1.000000e+30 : f32
    %61 = vector.broadcast %cst_27 : f32 to vector<8x8xf32>
    %62 = arith.select %6, %60, %61 : vector<8x8xi1>, vector<8x8xf32>
    %cst_28 = arith.constant dense<0xFF800000> : vector<8xf32>
    %63 = vector.multi_reduction <maximumf>, %62, %cst_28 [1] : vector<8x8xf32> to vector<8xf32>
    %64 = vector.shape_cast %63 : vector<8xf32> to vector<8x1xf32>
    %65 = vector.broadcast %64 : vector<8x1xf32> to vector<8x8xf32>
    %66 = arith.subf %62, %65 : vector<8x8xf32>
    %67 = math.exp %66 : vector<8x8xf32>
    %cst_29 = arith.constant dense<0.000000e+00> : vector<8xf32>
    %68 = vector.multi_reduction <add>, %67, %cst_29 [1] : vector<8x8xf32> to vector<8xf32>
    %69 = vector.shape_cast %68 : vector<8xf32> to vector<8x1xf32>
    %70 = tpu.reciprocal %69 {approx = true} : vector<8x1xf32> -> vector<8x1xf32>
    %71 = vector.broadcast %70 : vector<8x1xf32> to vector<8x8xf32>
    %72 = arith.mulf %67, %71 : vector<8x8xf32>
    %73 = arith.truncf %72 : vector<8x8xf32> to vector<8x8xbf16>
    %cst_30 = arith.constant dense<0.000000e+00> : vector<8x8xf32>
    %74 = tpu.matmul %73, %57, %cst_30 {dimension_numbers = #tpu.dot_dimension_numbers<[1], [0], [0], [1], [0, 0, 1, 1], [], []>} : vector<8x8xbf16>, vector<8x8xbf16>, vector<8x8xf32> -> vector<8x8xf32>
    %75 = arith.truncf %74 : vector<8x8xf32> to vector<8x8xbf16>
    %76 = vector.extract_strided_slice %21 {offsets = [8, 0], sizes = [8, 32], strides = [1, 1]} : vector<32x32xbf16> to vector<8x32xbf16>
    %cst_31 = arith.constant dense<0.000000e+00> : vector<8x32xf32>
    %77 = tpu.matmul %75, %76, %cst_31 {dimension_numbers = #tpu.dot_dimension_numbers<[1], [0], [0], [1], [0, 0, 1, 1], [], []>} : vector<8x8xbf16>, vector<8x32xbf16>, vector<8x32xf32> -> vector<8x32xf32>
    %78 = arith.addf %51, %77 : vector<8x32xf32>
    %79 = vector.extract_strided_slice %12 {offsets = [0, 16], sizes = [8, 8], strides = [1, 1]} : vector<8x32xf32> to vector<8x8xf32>
    %80 = arith.truncf %79 : vector<8x8xf32> to vector<8x8xbf16>
    %81 = vector.extract_strided_slice %19 {offsets = [0, 16], sizes = [8, 8], strides = [1, 1]} : vector<8x32xf32> to vector<8x8xf32>
    %82 = arith.truncf %81 : vector<8x8xf32> to vector<8x8xbf16>
    %83 = vector.extract_strided_slice %20 {offsets = [0, 16], sizes = [8, 8], strides = [1, 1]} : vector<8x32xf32> to vector<8x8xf32>
    %84 = arith.truncf %83 : vector<8x8xf32> to vector<8x8xbf16>
    %cst_32 = arith.constant dense<0.000000e+00> : vector<8x8xf32>
    %85 = tpu.matmul %80, %82, %cst_32 {dimension_numbers = #tpu.dot_dimension_numbers<[1], [1], [0], [0], [0, 0, 1, 0], [], []>} : vector<8x8xbf16>, vector<8x8xbf16>, vector<8x8xf32> -> vector<8x8xf32>
    %cst_33 = arith.constant 0.353553385 : f32
    %86 = vector.broadcast %cst_33 : f32 to vector<8x8xf32>
    %87 = arith.mulf %85, %86 : vector<8x8xf32>
    %cst_34 = arith.constant -1.000000e+30 : f32
    %88 = vector.broadcast %cst_34 : f32 to vector<8x8xf32>
    %89 = arith.select %6, %87, %88 : vector<8x8xi1>, vector<8x8xf32>
    %cst_35 = arith.constant dense<0xFF800000> : vector<8xf32>
    %90 = vector.multi_reduction <maximumf>, %89, %cst_35 [1] : vector<8x8xf32> to vector<8xf32>
    %91 = vector.shape_cast %90 : vector<8xf32> to vector<8x1xf32>
    %92 = vector.broadcast %91 : vector<8x1xf32> to vector<8x8xf32>
    %93 = arith.subf %89, %92 : vector<8x8xf32>
    %94 = math.exp %93 : vector<8x8xf32>
    %cst_36 = arith.constant dense<0.000000e+00> : vector<8xf32>
    %95 = vector.multi_reduction <add>, %94, %cst_36 [1] : vector<8x8xf32> to vector<8xf32>
    %96 = vector.shape_cast %95 : vector<8xf32> to vector<8x1xf32>
    %97 = tpu.reciprocal %96 {approx = true} : vector<8x1xf32> -> vector<8x1xf32>
    %98 = vector.broadcast %97 : vector<8x1xf32> to vector<8x8xf32>
    %99 = arith.mulf %94, %98 : vector<8x8xf32>
    %100 = arith.truncf %99 : vector<8x8xf32> to vector<8x8xbf16>
    %cst_37 = arith.constant dense<0.000000e+00> : vector<8x8xf32>
    %101 = tpu.matmul %100, %84, %cst_37 {dimension_numbers = #tpu.dot_dimension_numbers<[1], [0], [0], [1], [0, 0, 1, 1], [], []>} : vector<8x8xbf16>, vector<8x8xbf16>, vector<8x8xf32> -> vector<8x8xf32>
    %102 = arith.truncf %101 : vector<8x8xf32> to vector<8x8xbf16>
    %103 = vector.extract_strided_slice %21 {offsets = [16, 0], sizes = [8, 32], strides = [1, 1]} : vector<32x32xbf16> to vector<8x32xbf16>
    %cst_38 = arith.constant dense<0.000000e+00> : vector<8x32xf32>
    %104 = tpu.matmul %102, %103, %cst_38 {dimension_numbers = #tpu.dot_dimension_numbers<[1], [0], [0], [1], [0, 0, 1, 1], [], []>} : vector<8x8xbf16>, vector<8x32xbf16>, vector<8x32xf32> -> vector<8x32xf32>
    %105 = arith.addf %78, %104 : vector<8x32xf32>
    %106 = vector.extract_strided_slice %12 {offsets = [0, 24], sizes = [8, 8], strides = [1, 1]} : vector<8x32xf32> to vector<8x8xf32>
    %107 = arith.truncf %106 : vector<8x8xf32> to vector<8x8xbf16>
    %108 = vector.extract_strided_slice %19 {offsets = [0, 24], sizes = [8, 8], strides = [1, 1]} : vector<8x32xf32> to vector<8x8xf32>
    %109 = arith.truncf %108 : vector<8x8xf32> to vector<8x8xbf16>
    %110 = vector.extract_strided_slice %20 {offsets = [0, 24], sizes = [8, 8], strides = [1, 1]} : vector<8x32xf32> to vector<8x8xf32>
    %111 = arith.truncf %110 : vector<8x8xf32> to vector<8x8xbf16>
    %cst_39 = arith.constant dense<0.000000e+00> : vector<8x8xf32>
    %112 = tpu.matmul %107, %109, %cst_39 {dimension_numbers = #tpu.dot_dimension_numbers<[1], [1], [0], [0], [0, 0, 1, 0], [], []>} : vector<8x8xbf16>, vector<8x8xbf16>, vector<8x8xf32> -> vector<8x8xf32>
    %cst_40 = arith.constant 0.353553385 : f32
    %113 = vector.broadcast %cst_40 : f32 to vector<8x8xf32>
    %114 = arith.mulf %112, %113 : vector<8x8xf32>
    %cst_41 = arith.constant -1.000000e+30 : f32
    %115 = vector.broadcast %cst_41 : f32 to vector<8x8xf32>
    %116 = arith.select %6, %114, %115 : vector<8x8xi1>, vector<8x8xf32>
    %cst_42 = arith.constant dense<0xFF800000> : vector<8xf32>
    %117 = vector.multi_reduction <maximumf>, %116, %cst_42 [1] : vector<8x8xf32> to vector<8xf32>
    %118 = vector.shape_cast %117 : vector<8xf32> to vector<8x1xf32>
    %119 = vector.broadcast %118 : vector<8x1xf32> to vector<8x8xf32>
    %120 = arith.subf %116, %119 : vector<8x8xf32>
    %121 = math.exp %120 : vector<8x8xf32>
    %cst_43 = arith.constant dense<0.000000e+00> : vector<8xf32>
    %122 = vector.multi_reduction <add>, %121, %cst_43 [1] : vector<8x8xf32> to vector<8xf32>
    %123 = vector.shape_cast %122 : vector<8xf32> to vector<8x1xf32>
    %124 = tpu.reciprocal %123 {approx = true} : vector<8x1xf32> -> vector<8x1xf32>
    %125 = vector.broadcast %124 : vector<8x1xf32> to vector<8x8xf32>
    %126 = arith.mulf %121, %125 : vector<8x8xf32>
    %127 = arith.truncf %126 : vector<8x8xf32> to vector<8x8xbf16>
    %cst_44 = arith.constant dense<0.000000e+00> : vector<8x8xf32>
    %128 = tpu.matmul %127, %111, %cst_44 {dimension_numbers = #tpu.dot_dimension_numbers<[1], [0], [0], [1], [0, 0, 1, 1], [], []>} : vector<8x8xbf16>, vector<8x8xbf16>, vector<8x8xf32> -> vector<8x8xf32>
    %129 = arith.truncf %128 : vector<8x8xf32> to vector<8x8xbf16>
    %130 = vector.extract_strided_slice %21 {offsets = [24, 0], sizes = [8, 32], strides = [1, 1]} : vector<32x32xbf16> to vector<8x32xbf16>
    %cst_45 = arith.constant dense<0.000000e+00> : vector<8x32xf32>
    %131 = tpu.matmul %129, %130, %cst_45 {dimension_numbers = #tpu.dot_dimension_numbers<[1], [0], [0], [1], [0, 0, 1, 1], [], []>} : vector<8x8xbf16>, vector<8x32xbf16>, vector<8x32xf32> -> vector<8x32xf32>
    %132 = arith.addf %105, %131 : vector<8x32xf32>
    %133 = arith.addf %1, %132 : vector<8x32xf32>
    %134 = arith.truncf %133 : vector<8x32xf32> to vector<8x32xbf16>
    %c0_46 = arith.constant 0 : index
    %c0_47 = arith.constant 0 : index
    %135 = vector.load %arg9[%c0_46, %c0_47] : memref<32x32xbf16, #tpu.memory_space<vmem>>, vector<32x32xbf16>
    %cst_48 = arith.constant dense<0.000000e+00> : vector<8x32xf32>
    %136 = tpu.matmul %134, %135, %cst_48 {dimension_numbers = #tpu.dot_dimension_numbers<[1], [0], [0], [1], [0, 0, 1, 1], [], []>} : vector<8x32xbf16>, vector<32x32xbf16>, vector<8x32xf32> -> vector<8x32xf32>
    %c0_49 = arith.constant 0 : index
    %c0_50 = arith.constant 0 : index
    %137 = vector.load %arg10[%c0_49, %c0_50] : memref<1x32xf32, #tpu.memory_space<vmem>>, vector<1x32xf32>
    %138 = vector.broadcast %137 : vector<1x32xf32> to vector<8x32xf32>
    %139 = arith.addf %136, %138 : vector<8x32xf32>
    %140 = arith.truncf %3 : vector<16x32xf32> to vector<16x32xbf16>
    %c0_51 = arith.constant 0 : index
    %c0_52 = arith.constant 0 : index
    %141 = vector.load %arg11[%c0_51, %c0_52] : memref<32x64xbf16, #tpu.memory_space<vmem>>, vector<32x64xbf16>
    %cst_53 = arith.constant dense<0.000000e+00> : vector<16x64xf32>
    %142 = tpu.matmul %140, %141, %cst_53 {dimension_numbers = #tpu.dot_dimension_numbers<[1], [0], [0], [1], [0, 0, 1, 1], [], []>} : vector<16x32xbf16>, vector<32x64xbf16>, vector<16x64xf32> -> vector<16x64xf32>
    %c0_54 = arith.constant 0 : index
    %c0_55 = arith.constant 0 : index
    %143 = vector.load %arg12[%c0_54, %c0_55] : memref<1x64xf32, #tpu.memory_space<vmem>>, vector<1x64xf32>
    %144 = vector.broadcast %143 : vector<1x64xf32> to vector<16x64xf32>
    %145 = arith.addf %142, %144 : vector<16x64xf32>
    %146 = vector.extract_strided_slice %145 {offsets = [0, 0], sizes = [16, 32], strides = [1, 1]} : vector<16x64xf32> to vector<16x32xf32>
    %147 = vector.extract_strided_slice %145 {offsets = [0, 32], sizes = [16, 32], strides = [1, 1]} : vector<16x64xf32> to vector<16x32xf32>
    %c0_56 = arith.constant 0 : index
    %c0_57 = arith.constant 0 : index
    %148 = vector.load %arg13[%c0_56, %c0_57] : memref<32x32xbf16, #tpu.memory_space<vmem>>, vector<32x32xbf16>
    %c0_58 = arith.constant 0 : index
    %c0_59 = arith.constant 0 : index
    %149 = vector.load %arg14[%c0_58, %c0_59] : memref<1x32xf32, #tpu.memory_space<vmem>>, vector<1x32xf32>
    %150 = vector.shape_cast %149 : vector<1x32xf32> to vector<1x32xf32>
    %151 = vector.broadcast %150 : vector<1x32xf32> to vector<8x32xf32>
    %152 = vector.extract_strided_slice %139 {offsets = [0, 0], sizes = [8, 8], strides = [1, 1]} : vector<8x32xf32> to vector<8x8xf32>
    %153 = arith.truncf %152 : vector<8x8xf32> to vector<8x8xbf16>
    %154 = vector.extract_strided_slice %146 {offsets = [0, 0], sizes = [16, 8], strides = [1, 1]} : vector<16x32xf32> to vector<16x8xf32>
    %155 = arith.truncf %154 : vector<16x8xf32> to vector<16x8xbf16>
    %156 = vector.extract_strided_slice %147 {offsets = [0, 0], sizes = [16, 8], strides = [1, 1]} : vector<16x32xf32> to vector<16x8xf32>
    %157 = arith.truncf %156 : vector<16x8xf32> to vector<16x8xbf16>
    %cst_60 = arith.constant dense<0.000000e+00> : vector<8x16xf32>
    %158 = tpu.matmul %153, %155, %cst_60 {dimension_numbers = #tpu.dot_dimension_numbers<[1], [1], [0], [0], [0, 0, 1, 0], [], []>} : vector<8x8xbf16>, vector<16x8xbf16>, vector<8x16xf32> -> vector<8x16xf32>
    %cst_61 = arith.constant 0.353553385 : f32
    %159 = vector.broadcast %cst_61 : f32 to vector<8x16xf32>
    %160 = arith.mulf %158, %159 : vector<8x16xf32>
    %cst_62 = arith.constant dense<0xFF800000> : vector<8xf32>
    %161 = vector.multi_reduction <maximumf>, %160, %cst_62 [1] : vector<8x16xf32> to vector<8xf32>
    %162 = vector.shape_cast %161 : vector<8xf32> to vector<8x1xf32>
    %163 = vector.broadcast %162 : vector<8x1xf32> to vector<8x16xf32>
    %164 = arith.subf %160, %163 : vector<8x16xf32>
    %165 = math.exp %164 : vector<8x16xf32>
    %cst_63 = arith.constant dense<0.000000e+00> : vector<8xf32>
    %166 = vector.multi_reduction <add>, %165, %cst_63 [1] : vector<8x16xf32> to vector<8xf32>
    %167 = vector.shape_cast %166 : vector<8xf32> to vector<8x1xf32>
    %168 = tpu.reciprocal %167 {approx = true} : vector<8x1xf32> -> vector<8x1xf32>
    %169 = vector.broadcast %168 : vector<8x1xf32> to vector<8x16xf32>
    %170 = arith.mulf %165, %169 : vector<8x16xf32>
    %171 = arith.truncf %170 : vector<8x16xf32> to vector<8x16xbf16>
    %cst_64 = arith.constant dense<0.000000e+00> : vector<8x8xf32>
    %172 = tpu.matmul %171, %157, %cst_64 {dimension_numbers = #tpu.dot_dimension_numbers<[1], [0], [0], [1], [0, 0, 1, 1], [], []>} : vector<8x16xbf16>, vector<16x8xbf16>, vector<8x8xf32> -> vector<8x8xf32>
    %173 = arith.truncf %172 : vector<8x8xf32> to vector<8x8xbf16>
    %174 = vector.extract_strided_slice %148 {offsets = [0, 0], sizes = [8, 32], strides = [1, 1]} : vector<32x32xbf16> to vector<8x32xbf16>
    %cst_65 = arith.constant dense<0.000000e+00> : vector<8x32xf32>
    %175 = tpu.matmul %173, %174, %cst_65 {dimension_numbers = #tpu.dot_dimension_numbers<[1], [0], [0], [1], [0, 0, 1, 1], [], []>} : vector<8x8xbf16>, vector<8x32xbf16>, vector<8x32xf32> -> vector<8x32xf32>
    %176 = arith.addf %151, %175 : vector<8x32xf32>
    %177 = vector.extract_strided_slice %139 {offsets = [0, 8], sizes = [8, 8], strides = [1, 1]} : vector<8x32xf32> to vector<8x8xf32>
    %178 = arith.truncf %177 : vector<8x8xf32> to vector<8x8xbf16>
    %179 = vector.extract_strided_slice %146 {offsets = [0, 8], sizes = [16, 8], strides = [1, 1]} : vector<16x32xf32> to vector<16x8xf32>
    %180 = arith.truncf %179 : vector<16x8xf32> to vector<16x8xbf16>
    %181 = vector.extract_strided_slice %147 {offsets = [0, 8], sizes = [16, 8], strides = [1, 1]} : vector<16x32xf32> to vector<16x8xf32>
    %182 = arith.truncf %181 : vector<16x8xf32> to vector<16x8xbf16>
    %cst_66 = arith.constant dense<0.000000e+00> : vector<8x16xf32>
    %183 = tpu.matmul %178, %180, %cst_66 {dimension_numbers = #tpu.dot_dimension_numbers<[1], [1], [0], [0], [0, 0, 1, 0], [], []>} : vector<8x8xbf16>, vector<16x8xbf16>, vector<8x16xf32> -> vector<8x16xf32>
    %cst_67 = arith.constant 0.353553385 : f32
    %184 = vector.broadcast %cst_67 : f32 to vector<8x16xf32>
    %185 = arith.mulf %183, %184 : vector<8x16xf32>
    %cst_68 = arith.constant dense<0xFF800000> : vector<8xf32>
    %186 = vector.multi_reduction <maximumf>, %185, %cst_68 [1] : vector<8x16xf32> to vector<8xf32>
    %187 = vector.shape_cast %186 : vector<8xf32> to vector<8x1xf32>
    %188 = vector.broadcast %187 : vector<8x1xf32> to vector<8x16xf32>
    %189 = arith.subf %185, %188 : vector<8x16xf32>
    %190 = math.exp %189 : vector<8x16xf32>
    %cst_69 = arith.constant dense<0.000000e+00> : vector<8xf32>
    %191 = vector.multi_reduction <add>, %190, %cst_69 [1] : vector<8x16xf32> to vector<8xf32>
    %192 = vector.shape_cast %191 : vector<8xf32> to vector<8x1xf32>
    %193 = tpu.reciprocal %192 {approx = true} : vector<8x1xf32> -> vector<8x1xf32>
    %194 = vector.broadcast %193 : vector<8x1xf32> to vector<8x16xf32>
    %195 = arith.mulf %190, %194 : vector<8x16xf32>
    %196 = arith.truncf %195 : vector<8x16xf32> to vector<8x16xbf16>
    %cst_70 = arith.constant dense<0.000000e+00> : vector<8x8xf32>
    %197 = tpu.matmul %196, %182, %cst_70 {dimension_numbers = #tpu.dot_dimension_numbers<[1], [0], [0], [1], [0, 0, 1, 1], [], []>} : vector<8x16xbf16>, vector<16x8xbf16>, vector<8x8xf32> -> vector<8x8xf32>
    %198 = arith.truncf %197 : vector<8x8xf32> to vector<8x8xbf16>
    %199 = vector.extract_strided_slice %148 {offsets = [8, 0], sizes = [8, 32], strides = [1, 1]} : vector<32x32xbf16> to vector<8x32xbf16>
    %cst_71 = arith.constant dense<0.000000e+00> : vector<8x32xf32>
    %200 = tpu.matmul %198, %199, %cst_71 {dimension_numbers = #tpu.dot_dimension_numbers<[1], [0], [0], [1], [0, 0, 1, 1], [], []>} : vector<8x8xbf16>, vector<8x32xbf16>, vector<8x32xf32> -> vector<8x32xf32>
    %201 = arith.addf %176, %200 : vector<8x32xf32>
    %202 = vector.extract_strided_slice %139 {offsets = [0, 16], sizes = [8, 8], strides = [1, 1]} : vector<8x32xf32> to vector<8x8xf32>
    %203 = arith.truncf %202 : vector<8x8xf32> to vector<8x8xbf16>
    %204 = vector.extract_strided_slice %146 {offsets = [0, 16], sizes = [16, 8], strides = [1, 1]} : vector<16x32xf32> to vector<16x8xf32>
    %205 = arith.truncf %204 : vector<16x8xf32> to vector<16x8xbf16>
    %206 = vector.extract_strided_slice %147 {offsets = [0, 16], sizes = [16, 8], strides = [1, 1]} : vector<16x32xf32> to vector<16x8xf32>
    %207 = arith.truncf %206 : vector<16x8xf32> to vector<16x8xbf16>
    %cst_72 = arith.constant dense<0.000000e+00> : vector<8x16xf32>
    %208 = tpu.matmul %203, %205, %cst_72 {dimension_numbers = #tpu.dot_dimension_numbers<[1], [1], [0], [0], [0, 0, 1, 0], [], []>} : vector<8x8xbf16>, vector<16x8xbf16>, vector<8x16xf32> -> vector<8x16xf32>
    %cst_73 = arith.constant 0.353553385 : f32
    %209 = vector.broadcast %cst_73 : f32 to vector<8x16xf32>
    %210 = arith.mulf %208, %209 : vector<8x16xf32>
    %cst_74 = arith.constant dense<0xFF800000> : vector<8xf32>
    %211 = vector.multi_reduction <maximumf>, %210, %cst_74 [1] : vector<8x16xf32> to vector<8xf32>
    %212 = vector.shape_cast %211 : vector<8xf32> to vector<8x1xf32>
    %213 = vector.broadcast %212 : vector<8x1xf32> to vector<8x16xf32>
    %214 = arith.subf %210, %213 : vector<8x16xf32>
    %215 = math.exp %214 : vector<8x16xf32>
    %cst_75 = arith.constant dense<0.000000e+00> : vector<8xf32>
    %216 = vector.multi_reduction <add>, %215, %cst_75 [1] : vector<8x16xf32> to vector<8xf32>
    %217 = vector.shape_cast %216 : vector<8xf32> to vector<8x1xf32>
    %218 = tpu.reciprocal %217 {approx = true} : vector<8x1xf32> -> vector<8x1xf32>
    %219 = vector.broadcast %218 : vector<8x1xf32> to vector<8x16xf32>
    %220 = arith.mulf %215, %219 : vector<8x16xf32>
    %221 = arith.truncf %220 : vector<8x16xf32> to vector<8x16xbf16>
    %cst_76 = arith.constant dense<0.000000e+00> : vector<8x8xf32>
    %222 = tpu.matmul %221, %207, %cst_76 {dimension_numbers = #tpu.dot_dimension_numbers<[1], [0], [0], [1], [0, 0, 1, 1], [], []>} : vector<8x16xbf16>, vector<16x8xbf16>, vector<8x8xf32> -> vector<8x8xf32>
    %223 = arith.truncf %222 : vector<8x8xf32> to vector<8x8xbf16>
    %224 = vector.extract_strided_slice %148 {offsets = [16, 0], sizes = [8, 32], strides = [1, 1]} : vector<32x32xbf16> to vector<8x32xbf16>
    %cst_77 = arith.constant dense<0.000000e+00> : vector<8x32xf32>
    %225 = tpu.matmul %223, %224, %cst_77 {dimension_numbers = #tpu.dot_dimension_numbers<[1], [0], [0], [1], [0, 0, 1, 1], [], []>} : vector<8x8xbf16>, vector<8x32xbf16>, vector<8x32xf32> -> vector<8x32xf32>
    %226 = arith.addf %201, %225 : vector<8x32xf32>
    %227 = vector.extract_strided_slice %139 {offsets = [0, 24], sizes = [8, 8], strides = [1, 1]} : vector<8x32xf32> to vector<8x8xf32>
    %228 = arith.truncf %227 : vector<8x8xf32> to vector<8x8xbf16>
    %229 = vector.extract_strided_slice %146 {offsets = [0, 24], sizes = [16, 8], strides = [1, 1]} : vector<16x32xf32> to vector<16x8xf32>
    %230 = arith.truncf %229 : vector<16x8xf32> to vector<16x8xbf16>
    %231 = vector.extract_strided_slice %147 {offsets = [0, 24], sizes = [16, 8], strides = [1, 1]} : vector<16x32xf32> to vector<16x8xf32>
    %232 = arith.truncf %231 : vector<16x8xf32> to vector<16x8xbf16>
    %cst_78 = arith.constant dense<0.000000e+00> : vector<8x16xf32>
    %233 = tpu.matmul %228, %230, %cst_78 {dimension_numbers = #tpu.dot_dimension_numbers<[1], [1], [0], [0], [0, 0, 1, 0], [], []>} : vector<8x8xbf16>, vector<16x8xbf16>, vector<8x16xf32> -> vector<8x16xf32>
    %cst_79 = arith.constant 0.353553385 : f32
    %234 = vector.broadcast %cst_79 : f32 to vector<8x16xf32>
    %235 = arith.mulf %233, %234 : vector<8x16xf32>
    %cst_80 = arith.constant dense<0xFF800000> : vector<8xf32>
    %236 = vector.multi_reduction <maximumf>, %235, %cst_80 [1] : vector<8x16xf32> to vector<8xf32>
    %237 = vector.shape_cast %236 : vector<8xf32> to vector<8x1xf32>
    %238 = vector.broadcast %237 : vector<8x1xf32> to vector<8x16xf32>
    %239 = arith.subf %235, %238 : vector<8x16xf32>
    %240 = math.exp %239 : vector<8x16xf32>
    %cst_81 = arith.constant dense<0.000000e+00> : vector<8xf32>
    %241 = vector.multi_reduction <add>, %240, %cst_81 [1] : vector<8x16xf32> to vector<8xf32>
    %242 = vector.shape_cast %241 : vector<8xf32> to vector<8x1xf32>
    %243 = tpu.reciprocal %242 {approx = true} : vector<8x1xf32> -> vector<8x1xf32>
    %244 = vector.broadcast %243 : vector<8x1xf32> to vector<8x16xf32>
    %245 = arith.mulf %240, %244 : vector<8x16xf32>
    %246 = arith.truncf %245 : vector<8x16xf32> to vector<8x16xbf16>
    %cst_82 = arith.constant dense<0.000000e+00> : vector<8x8xf32>
    %247 = tpu.matmul %246, %232, %cst_82 {dimension_numbers = #tpu.dot_dimension_numbers<[1], [0], [0], [1], [0, 0, 1, 1], [], []>} : vector<8x16xbf16>, vector<16x8xbf16>, vector<8x8xf32> -> vector<8x8xf32>
    %248 = arith.truncf %247 : vector<8x8xf32> to vector<8x8xbf16>
    %249 = vector.extract_strided_slice %148 {offsets = [24, 0], sizes = [8, 32], strides = [1, 1]} : vector<32x32xbf16> to vector<8x32xbf16>
    %cst_83 = arith.constant dense<0.000000e+00> : vector<8x32xf32>
    %250 = tpu.matmul %248, %249, %cst_83 {dimension_numbers = #tpu.dot_dimension_numbers<[1], [0], [0], [1], [0, 0, 1, 1], [], []>} : vector<8x8xbf16>, vector<8x32xbf16>, vector<8x32xf32> -> vector<8x32xf32>
    %251 = arith.addf %226, %250 : vector<8x32xf32>
    %252 = arith.addf %133, %251 : vector<8x32xf32>
    %c0_84 = arith.constant 0 : index
    %c0_85 = arith.constant 0 : index
    %253 = vector.load %arg15[%c0_84, %c0_85] : memref<1x32xf32, #tpu.memory_space<vmem>>, vector<1x32xf32>
    %c0_86 = arith.constant 0 : index
    %c0_87 = arith.constant 0 : index
    %254 = vector.load %arg16[%c0_86, %c0_87] : memref<1x32xf32, #tpu.memory_space<vmem>>, vector<1x32xf32>
    %cst_88 = arith.constant dense<0.000000e+00> : vector<8xf32>
    %255 = vector.multi_reduction <add>, %252, %cst_88 [1] : vector<8x32xf32> to vector<8xf32>
    %256 = vector.shape_cast %255 : vector<8xf32> to vector<8x1xf32>
    %cst_89 = arith.constant 3.200000e+01 : f32
    %257 = vector.broadcast %cst_89 : f32 to vector<8x1xf32>
    %258 = arith.divf %256, %257 : vector<8x1xf32>
    %259 = vector.broadcast %258 : vector<8x1xf32> to vector<8x32xf32>
    %260 = arith.subf %252, %259 : vector<8x32xf32>
    %261 = arith.mulf %260, %260 : vector<8x32xf32>
    %cst_90 = arith.constant dense<0.000000e+00> : vector<8xf32>
    %262 = vector.multi_reduction <add>, %261, %cst_90 [1] : vector<8x32xf32> to vector<8xf32>
    %263 = vector.shape_cast %262 : vector<8xf32> to vector<8x1xf32>
    %cst_91 = arith.constant 3.200000e+01 : f32
    %264 = vector.broadcast %cst_91 : f32 to vector<8x1xf32>
    %265 = arith.divf %263, %264 : vector<8x1xf32>
    %266 = vector.broadcast %258 : vector<8x1xf32> to vector<8x32xf32>
    %267 = arith.subf %252, %266 : vector<8x32xf32>
    %cst_92 = arith.constant 9.99999974E-6 : f32
    %268 = vector.broadcast %cst_92 : f32 to vector<8x1xf32>
    %269 = arith.addf %265, %268 : vector<8x1xf32>
    %270 = math.rsqrt %269 : vector<8x1xf32>
    %271 = vector.broadcast %270 : vector<8x1xf32> to vector<8x32xf32>
    %272 = arith.mulf %267, %271 : vector<8x32xf32>
    %273 = vector.broadcast %253 : vector<1x32xf32> to vector<8x32xf32>
    %274 = arith.mulf %272, %273 : vector<8x32xf32>
    %275 = vector.broadcast %254 : vector<1x32xf32> to vector<8x32xf32>
    %276 = arith.addf %274, %275 : vector<8x32xf32>
    %277 = arith.truncf %276 : vector<8x32xf32> to vector<8x32xbf16>
    %c0_93 = arith.constant 0 : index
    %c0_94 = arith.constant 0 : index
    %278 = vector.load %arg17[%c0_93, %c0_94] : memref<32x32xbf16, #tpu.memory_space<vmem>>, vector<32x32xbf16>
    %cst_95 = arith.constant dense<0.000000e+00> : vector<8x32xf32>
    %279 = tpu.matmul %277, %278, %cst_95 {dimension_numbers = #tpu.dot_dimension_numbers<[1], [0], [0], [1], [0, 0, 1, 1], [], []>} : vector<8x32xbf16>, vector<32x32xbf16>, vector<8x32xf32> -> vector<8x32xf32>
    %c0_96 = arith.constant 0 : index
    %c0_97 = arith.constant 0 : index
    %280 = vector.load %arg18[%c0_96, %c0_97] : memref<1x32xf32, #tpu.memory_space<vmem>>, vector<1x32xf32>
    %281 = vector.broadcast %280 : vector<1x32xf32> to vector<8x32xf32>
    %282 = arith.addf %279, %281 : vector<8x32xf32>
    %cst_98 = arith.constant 0.000000e+00 : f32
    %283 = vector.broadcast %cst_98 : f32 to vector<8x32xf32>
    %284 = arith.maximumf %282, %283 : vector<8x32xf32>
    %c0_99 = arith.constant 0 : index
    %c0_100 = arith.constant 0 : index
    %285 = vector.load %arg19[%c0_99, %c0_100] : memref<1x32xf32, #tpu.memory_space<vmem>>, vector<1x32xf32>
    %c0_101 = arith.constant 0 : index
    %c0_102 = arith.constant 0 : index
    %286 = vector.load %arg20[%c0_101, %c0_102] : memref<1x32xf32, #tpu.memory_space<vmem>>, vector<1x32xf32>
    %cst_103 = arith.constant dense<0.000000e+00> : vector<8xf32>
    %287 = vector.multi_reduction <add>, %284, %cst_103 [1] : vector<8x32xf32> to vector<8xf32>
    %288 = vector.shape_cast %287 : vector<8xf32> to vector<8x1xf32>
    %cst_104 = arith.constant 3.200000e+01 : f32
    %289 = vector.broadcast %cst_104 : f32 to vector<8x1xf32>
    %290 = arith.divf %288, %289 : vector<8x1xf32>
    %291 = vector.broadcast %290 : vector<8x1xf32> to vector<8x32xf32>
    %292 = arith.subf %284, %291 : vector<8x32xf32>
    %293 = arith.mulf %292, %292 : vector<8x32xf32>
    %cst_105 = arith.constant dense<0.000000e+00> : vector<8xf32>
    %294 = vector.multi_reduction <add>, %293, %cst_105 [1] : vector<8x32xf32> to vector<8xf32>
    %295 = vector.shape_cast %294 : vector<8xf32> to vector<8x1xf32>
    %cst_106 = arith.constant 3.200000e+01 : f32
    %296 = vector.broadcast %cst_106 : f32 to vector<8x1xf32>
    %297 = arith.divf %295, %296 : vector<8x1xf32>
    %298 = vector.broadcast %290 : vector<8x1xf32> to vector<8x32xf32>
    %299 = arith.subf %284, %298 : vector<8x32xf32>
    %cst_107 = arith.constant 9.99999974E-6 : f32
    %300 = vector.broadcast %cst_107 : f32 to vector<8x1xf32>
    %301 = arith.addf %297, %300 : vector<8x1xf32>
    %302 = math.rsqrt %301 : vector<8x1xf32>
    %303 = vector.broadcast %302 : vector<8x1xf32> to vector<8x32xf32>
    %304 = arith.mulf %299, %303 : vector<8x32xf32>
    %305 = vector.broadcast %285 : vector<1x32xf32> to vector<8x32xf32>
    %306 = arith.mulf %304, %305 : vector<8x32xf32>
    %307 = vector.broadcast %286 : vector<1x32xf32> to vector<8x32xf32>
    %308 = arith.addf %306, %307 : vector<8x32xf32>
    %309 = arith.truncf %308 : vector<8x32xf32> to vector<8x32xbf16>
    %c0_108 = arith.constant 0 : index
    %c0_109 = arith.constant 0 : index
    %310 = vector.load %arg21[%c0_108, %c0_109] : memref<32x32xbf16, #tpu.memory_space<vmem>>, vector<32x32xbf16>
    %cst_110 = arith.constant dense<0.000000e+00> : vector<8x32xf32>
    %311 = tpu.matmul %309, %310, %cst_110 {dimension_numbers = #tpu.dot_dimension_numbers<[1], [0], [0], [1], [0, 0, 1, 1], [], []>} : vector<8x32xbf16>, vector<32x32xbf16>, vector<8x32xf32> -> vector<8x32xf32>
    %c0_111 = arith.constant 0 : index
    %c0_112 = arith.constant 0 : index
    %312 = vector.load %arg22[%c0_111, %c0_112] : memref<1x32xf32, #tpu.memory_space<vmem>>, vector<1x32xf32>
    %313 = vector.broadcast %312 : vector<1x32xf32> to vector<8x32xf32>
    %314 = arith.addf %311, %313 : vector<8x32xf32>
    %315 = arith.addf %252, %314 : vector<8x32xf32>
    %c0_113 = arith.constant 0 : index
    %c0_114 = arith.constant 0 : index
    %c0_115 = arith.constant 0 : index
    %316 = vector.load %arg23[%c0_113, %c0_114, %c0_115] : memref<1x8x32xf32, #tpu.memory_space<vmem>>, vector<1x8x32xf32>
    %317 = vector.shape_cast %316 : vector<1x8x32xf32> to vector<8x32xf32>
    %318 = vector.shape_cast %315 : vector<8x32xf32> to vector<1x8x32xf32>
    tpu.vector_store %arg23[%c0_113, %c0_114, %c0_115], %318 {strides = array<i32>} : memref<1x8x32xf32, #tpu.memory_space<vmem>>, vector<1x8x32xf32>,
    return
  }
  func.func @transform_0(%arg0: i32) -> (i32, i32, i32) {
    %c0_i32 = arith.constant 0 : i32
    %c0_i32_0 = arith.constant 0 : i32
    %c0_i32_1 = arith.constant 0 : i32
    return %arg0, %c0_i32, %c0_i32_0 : i32, i32, i32
  }
  func.func @transform_1(%arg0: i32) -> (i32, i32, i32) {
    %c0_i32 = arith.constant 0 : i32
    %c0_i32_0 = arith.constant 0 : i32
    %c0_i32_1 = arith.constant 0 : i32
    return %arg0, %c0_i32, %c0_i32_0 : i32, i32, i32
  }
  func.func @transform_2(%arg0: i32) -> (i32, i32) {
    %c0_i32 = arith.constant 0 : i32
    %c0_i32_0 = arith.constant 0 : i32
    %c0_i32_1 = arith.constant 0 : i32
    return %c0_i32, %c0_i32_0 : i32, i32
  }
  func.func @transform_3(%arg0: i32) -> (i32, i32) {
    %c0_i32 = arith.constant 0 : i32
    %c0_i32_0 = arith.constant 0 : i32
    %c0_i32_1 = arith.constant 0 : i32
    return %c0_i32, %c0_i32_0 : i32, i32
  }
  func.func @transform_4(%arg0: i32) -> (i32, i32) {
    %c0_i32 = arith.constant 0 : i32
    %c0_i32_0 = arith.constant 0 : i32
    %c0_i32_1 = arith.constant 0 : i32
    return %c0_i32, %c0_i32_0 : i32, i32
  }
  func.func @transform_5(%arg0: i32) -> (i32, i32) {
    %c0_i32 = arith.constant 0 : i32
    %c0_i32_0 = arith.constant 0 : i32
    %c0_i32_1 = arith.constant 0 : i32
    return %c0_i32, %c0_i32_0 : i32, i32
  }
  func.func @transform_6(%arg0: i32) -> (i32, i32) {
    %c0_i32 = arith.constant 0 : i32
    %c0_i32_0 = arith.constant 0 : i32
    %c0_i32_1 = arith.constant 0 : i32
    return %c0_i32, %c0_i32_0 : i32, i32
  }
  func.func @transform_7(%arg0: i32) -> (i32, i32) {
    %c0_i32 = arith.constant 0 : i32
    %c0_i32_0 = arith.constant 0 : i32
    %c0_i32_1 = arith.constant 0 : i32
    return %c0_i32, %c0_i32_0 : i32, i32
  }
  func.func @transform_8(%arg0: i32) -> (i32, i32) {
    %c0_i32 = arith.constant 0 : i32
    %c0_i32_0 = arith.constant 0 : i32
    %c0_i32_1 = arith.constant 0 : i32
    return %c0_i32, %c0_i32_0 : i32, i32
  }
  func.func @transform_9(%arg0: i32) -> (i32, i32) {
    %c0_i32 = arith.constant 0 : i32
    %c0_i32_0 = arith.constant 0 : i32
    %c0_i32_1 = arith.constant 0 : i32
    return %c0_i32, %c0_i32_0 : i32, i32
  }
  func.func @transform_10(%arg0: i32) -> (i32, i32) {
    %c0_i32 = arith.constant 0 : i32
    %c0_i32_0 = arith.constant 0 : i32
    %c0_i32_1 = arith.constant 0 : i32
    return %c0_i32, %c0_i32_0 : i32, i32
  }
  func.func @transform_11(%arg0: i32) -> (i32, i32) {
    %c0_i32 = arith.constant 0 : i32
    %c0_i32_0 = arith.constant 0 : i32
    %c0_i32_1 = arith.constant 0 : i32
    return %c0_i32, %c0_i32_0 : i32, i32
  }
  func.func @transform_12(%arg0: i32) -> (i32, i32) {
    %c0_i32 = arith.constant 0 : i32
    %c0_i32_0 = arith.constant 0 : i32
    %c0_i32_1 = arith.constant 0 : i32
    return %c0_i32, %c0_i32_0 : i32, i32
  }
  func.func @transform_13(%arg0: i32) -> (i32, i32) {
    %c0_i32 = arith.constant 0 : i32
    %c0_i32_0 = arith.constant 0 : i32
    %c0_i32_1 = arith.constant 0 : i32
    return %c0_i32, %c0_i32_0 : i32, i32
  }
  func.func @transform_14(%arg0: i32) -> (i32, i32) {
    %c0_i32 = arith.constant 0 : i32
    %c0_i32_0 = arith.constant 0 : i32
    %c0_i32_1 = arith.constant 0 : i32
    return %c0_i32, %c0_i32_0 : i32, i32
  }
  func.func @transform_15(%arg0: i32) -> (i32, i32) {
    %c0_i32 = arith.constant 0 : i32
    %c0_i32_0 = arith.constant 0 : i32
    %c0_i32_1 = arith.constant 0 : i32
    return %c0_i32, %c0_i32_0 : i32, i32
  }
  func.func @transform_16(%arg0: i32) -> (i32, i32) {
    %c0_i32 = arith.constant 0 : i32
    %c0_i32_0 = arith.constant 0 : i32
    %c0_i32_1 = arith.constant 0 : i32
    return %c0_i32, %c0_i32_0 : i32, i32
  }
  func.func @transform_17(%arg0: i32) -> (i32, i32) {
    %c0_i32 = arith.constant 0 : i32
    %c0_i32_0 = arith.constant 0 : i32
    %c0_i32_1 = arith.constant 0 : i32
    return %c0_i32, %c0_i32_0 : i32, i32
  }
  func.func @transform_18(%arg0: i32) -> (i32, i32) {
    %c0_i32 = arith.constant 0 : i32
    %c0_i32_0 = arith.constant 0 : i32
    %c0_i32_1 = arith.constant 0 : i32
    return %c0_i32, %c0_i32_0 : i32, i32
  }
  func.func @transform_19(%arg0: i32) -> (i32, i32) {
    %c0_i32 = arith.constant 0 : i32
    %c0_i32_0 = arith.constant 0 : i32
    %c0_i32_1 = arith.constant 0 : i32
    return %c0_i32, %c0_i32_0 : i32, i32
  }
  func.func @transform_20(%arg0: i32) -> (i32, i32) {
    %c0_i32 = arith.constant 0 : i32
    %c0_i32_0 = arith.constant 0 : i32
    %c0_i32_1 = arith.constant 0 : i32
    return %c0_i32, %c0_i32_0 : i32, i32
  }
  func.func @transform_21(%arg0: i32) -> (i32, i32) {
    %c0_i32 = arith.constant 0 : i32
    %c0_i32_0 = arith.constant 0 : i32
    %c0_i32_1 = arith.constant 0 : i32
    return %c0_i32, %c0_i32_0 : i32, i32
  }
  func.func @transform_22(%arg0: i32) -> (i32, i32, i32) {
    %c0_i32 = arith.constant 0 : i32
    %c0_i32_0 = arith.constant 0 : i32
    %c0_i32_1 = arith.constant 0 : i32
    return %arg0, %c0_i32, %c0_i32_0 : i32, i32, i32
  }
}

module attributes {stable_mosaic.version = 11 : i64} {
  func.func @kernel(%arg0: i32, %arg1: memref<32x32xf32, #tpu.memory_space<vmem>>, %arg2: memref<1x32xf32, #tpu.memory_space<vmem>>, %arg3: memref<1x32xf32, #tpu.memory_space<vmem>>, %arg4: memref<32x128xbf16, #tpu.memory_space<vmem>>, %arg5: memref<1x128xf32, #tpu.memory_space<vmem>>, %arg6: memref<32x128xf32, #tpu.memory_space<vmem>>) attributes {dimension_semantics = [#tpu.dimension_semantics<parallel>], iteration_bounds = array<i64: 1>, scalar_prefetch = 0 : i64, scratch_operands = 0 : i64, tpu.core_type = #tpu.core_type<tc>, window_params = [{transform_indices = @transform_0, window_bounds = array<i64: 32, 32>}, {pipeline_mode = #tpu.pipeline_mode<synchronous>, transform_indices = @transform_1, window_bounds = array<i64: 1, 32>}, {pipeline_mode = #tpu.pipeline_mode<synchronous>, transform_indices = @transform_2, window_bounds = array<i64: 1, 32>}, {pipeline_mode = #tpu.pipeline_mode<synchronous>, transform_indices = @transform_3, window_bounds = array<i64: 32, 128>}, {pipeline_mode = #tpu.pipeline_mode<synchronous>, transform_indices = @transform_4, window_bounds = array<i64: 1, 128>}, {transform_indices = @transform_5, window_bounds = array<i64: 32, 128>}]} {
    %c0 = arith.constant 0 : index
    %c0_0 = arith.constant 0 : index
    %0 = vector.load %arg1[%c0, %c0_0] : memref<32x32xf32, #tpu.memory_space<vmem>>, vector<32x32xf32>
    %c0_1 = arith.constant 0 : index
    %c0_2 = arith.constant 0 : index
    %1 = vector.load %arg2[%c0_1, %c0_2] : memref<1x32xf32, #tpu.memory_space<vmem>>, vector<1x32xf32>
    %c0_3 = arith.constant 0 : index
    %c0_4 = arith.constant 0 : index
    %2 = vector.load %arg3[%c0_3, %c0_4] : memref<1x32xf32, #tpu.memory_space<vmem>>, vector<1x32xf32>
    %cst = arith.constant dense<0.000000e+00> : vector<32xf32>
    %3 = vector.multi_reduction <add>, %0, %cst [1] : vector<32x32xf32> to vector<32xf32>
    %4 = vector.shape_cast %3 : vector<32xf32> to vector<32x1xf32>
    %cst_5 = arith.constant 3.200000e+01 : f32
    %5 = vector.broadcast %cst_5 : f32 to vector<32x1xf32>
    %6 = arith.divf %4, %5 : vector<32x1xf32>
    %7 = vector.broadcast %6 : vector<32x1xf32> to vector<32x32xf32>
    %8 = arith.subf %0, %7 : vector<32x32xf32>
    %9 = arith.mulf %8, %8 : vector<32x32xf32>
    %cst_6 = arith.constant dense<0.000000e+00> : vector<32xf32>
    %10 = vector.multi_reduction <add>, %9, %cst_6 [1] : vector<32x32xf32> to vector<32xf32>
    %11 = vector.shape_cast %10 : vector<32xf32> to vector<32x1xf32>
    %cst_7 = arith.constant 3.200000e+01 : f32
    %12 = vector.broadcast %cst_7 : f32 to vector<32x1xf32>
    %13 = arith.divf %11, %12 : vector<32x1xf32>
    %14 = vector.broadcast %6 : vector<32x1xf32> to vector<32x32xf32>
    %15 = arith.subf %0, %14 : vector<32x32xf32>
    %cst_8 = arith.constant 9.99999974E-6 : f32
    %16 = vector.broadcast %cst_8 : f32 to vector<32x1xf32>
    %17 = arith.addf %13, %16 : vector<32x1xf32>
    %18 = math.rsqrt %17 : vector<32x1xf32>
    %19 = vector.broadcast %18 : vector<32x1xf32> to vector<32x32xf32>
    %20 = arith.mulf %15, %19 : vector<32x32xf32>
    %21 = vector.broadcast %1 : vector<1x32xf32> to vector<32x32xf32>
    %22 = arith.mulf %20, %21 : vector<32x32xf32>
    %23 = vector.broadcast %2 : vector<1x32xf32> to vector<32x32xf32>
    %24 = arith.addf %22, %23 : vector<32x32xf32>
    %25 = arith.truncf %24 : vector<32x32xf32> to vector<32x32xbf16>
    %c0_9 = arith.constant 0 : index
    %c0_10 = arith.constant 0 : index
    %26 = vector.load %arg4[%c0_9, %c0_10] : memref<32x128xbf16, #tpu.memory_space<vmem>>, vector<32x128xbf16>
    %cst_11 = arith.constant dense<0.000000e+00> : vector<32x128xf32>
    %27 = tpu.matmul %25, %26, %cst_11 {dimension_numbers = #tpu.dot_dimension_numbers<[1], [0], [0], [1], [0, 0, 1, 1], [], []>} : vector<32x32xbf16>, vector<32x128xbf16>, vector<32x128xf32> -> vector<32x128xf32>
    %c0_12 = arith.constant 0 : index
    %c0_13 = arith.constant 0 : index
    %28 = vector.load %arg5[%c0_12, %c0_13] : memref<1x128xf32, #tpu.memory_space<vmem>>, vector<1x128xf32>
    %29 = vector.broadcast %28 : vector<1x128xf32> to vector<32x128xf32>
    %30 = arith.addf %27, %29 : vector<32x128xf32>
    %c0_14 = arith.constant 0 : index
    %c0_15 = arith.constant 0 : index
    %31 = vector.load %arg6[%c0_14, %c0_15] : memref<32x128xf32, #tpu.memory_space<vmem>>, vector<32x128xf32>
    tpu.vector_store %arg6[%c0_14, %c0_15], %30 {strides = array<i32>} : memref<32x128xf32, #tpu.memory_space<vmem>>, vector<32x128xf32>,
    return
  }
  func.func @transform_0(%arg0: i32) -> (i32, i32) {
    %c0_i32 = arith.constant 0 : i32
    %c0_i32_0 = arith.constant 0 : i32
    return %arg0, %c0_i32 : i32, i32
  }
  func.func @transform_1(%arg0: i32) -> (i32, i32) {
    %c0_i32 = arith.constant 0 : i32
    %c0_i32_0 = arith.constant 0 : i32
    %c0_i32_1 = arith.constant 0 : i32
    return %c0_i32, %c0_i32_0 : i32, i32
  }
  func.func @transform_2(%arg0: i32) -> (i32, i32) {
    %c0_i32 = arith.constant 0 : i32
    %c0_i32_0 = arith.constant 0 : i32
    %c0_i32_1 = arith.constant 0 : i32
    return %c0_i32, %c0_i32_0 : i32, i32
  }
  func.func @transform_3(%arg0: i32) -> (i32, i32) {
    %c0_i32 = arith.constant 0 : i32
    %c0_i32_0 = arith.constant 0 : i32
    %c0_i32_1 = arith.constant 0 : i32
    return %c0_i32, %c0_i32_0 : i32, i32
  }
  func.func @transform_4(%arg0: i32) -> (i32, i32) {
    %c0_i32 = arith.constant 0 : i32
    %c0_i32_0 = arith.constant 0 : i32
    %c0_i32_1 = arith.constant 0 : i32
    return %c0_i32, %c0_i32_0 : i32, i32
  }
  func.func @transform_5(%arg0: i32) -> (i32, i32) {
    %c0_i32 = arith.constant 0 : i32
    %c0_i32_0 = arith.constant 0 : i32
    return %arg0, %c0_i32 : i32, i32
  }
}

module attributes {stable_mosaic.version = 11 : i64} {
  func.func @kernel(%arg0: i32, %arg1: memref<16x32xf32, #tpu.memory_space<vmem>>, %arg2: memref<1x32xf32, #tpu.memory_space<vmem>>, %arg3: memref<1x32xf32, #tpu.memory_space<vmem>>, %arg4: memref<32x128xbf16, #tpu.memory_space<vmem>>, %arg5: memref<1x128xf32, #tpu.memory_space<vmem>>, %arg6: memref<16x128xf32, #tpu.memory_space<vmem>>) attributes {dimension_semantics = [#tpu.dimension_semantics<parallel>], iteration_bounds = array<i64: 1>, scalar_prefetch = 0 : i64, scratch_operands = 0 : i64, tpu.core_type = #tpu.core_type<tc>, window_params = [{transform_indices = @transform_0, window_bounds = array<i64: 16, 32>}, {pipeline_mode = #tpu.pipeline_mode<synchronous>, transform_indices = @transform_1, window_bounds = array<i64: 1, 32>}, {pipeline_mode = #tpu.pipeline_mode<synchronous>, transform_indices = @transform_2, window_bounds = array<i64: 1, 32>}, {pipeline_mode = #tpu.pipeline_mode<synchronous>, transform_indices = @transform_3, window_bounds = array<i64: 32, 128>}, {pipeline_mode = #tpu.pipeline_mode<synchronous>, transform_indices = @transform_4, window_bounds = array<i64: 1, 128>}, {transform_indices = @transform_5, window_bounds = array<i64: 16, 128>}]} {
    %c0 = arith.constant 0 : index
    %c0_0 = arith.constant 0 : index
    %0 = vector.load %arg1[%c0, %c0_0] : memref<16x32xf32, #tpu.memory_space<vmem>>, vector<16x32xf32>
    %c0_1 = arith.constant 0 : index
    %c0_2 = arith.constant 0 : index
    %1 = vector.load %arg2[%c0_1, %c0_2] : memref<1x32xf32, #tpu.memory_space<vmem>>, vector<1x32xf32>
    %c0_3 = arith.constant 0 : index
    %c0_4 = arith.constant 0 : index
    %2 = vector.load %arg3[%c0_3, %c0_4] : memref<1x32xf32, #tpu.memory_space<vmem>>, vector<1x32xf32>
    %cst = arith.constant dense<0.000000e+00> : vector<16xf32>
    %3 = vector.multi_reduction <add>, %0, %cst [1] : vector<16x32xf32> to vector<16xf32>
    %4 = vector.shape_cast %3 : vector<16xf32> to vector<16x1xf32>
    %cst_5 = arith.constant 3.200000e+01 : f32
    %5 = vector.broadcast %cst_5 : f32 to vector<16x1xf32>
    %6 = arith.divf %4, %5 : vector<16x1xf32>
    %7 = vector.broadcast %6 : vector<16x1xf32> to vector<16x32xf32>
    %8 = arith.subf %0, %7 : vector<16x32xf32>
    %9 = arith.mulf %8, %8 : vector<16x32xf32>
    %cst_6 = arith.constant dense<0.000000e+00> : vector<16xf32>
    %10 = vector.multi_reduction <add>, %9, %cst_6 [1] : vector<16x32xf32> to vector<16xf32>
    %11 = vector.shape_cast %10 : vector<16xf32> to vector<16x1xf32>
    %cst_7 = arith.constant 3.200000e+01 : f32
    %12 = vector.broadcast %cst_7 : f32 to vector<16x1xf32>
    %13 = arith.divf %11, %12 : vector<16x1xf32>
    %14 = vector.broadcast %6 : vector<16x1xf32> to vector<16x32xf32>
    %15 = arith.subf %0, %14 : vector<16x32xf32>
    %cst_8 = arith.constant 9.99999974E-6 : f32
    %16 = vector.broadcast %cst_8 : f32 to vector<16x1xf32>
    %17 = arith.addf %13, %16 : vector<16x1xf32>
    %18 = math.rsqrt %17 : vector<16x1xf32>
    %19 = vector.broadcast %18 : vector<16x1xf32> to vector<16x32xf32>
    %20 = arith.mulf %15, %19 : vector<16x32xf32>
    %21 = vector.broadcast %1 : vector<1x32xf32> to vector<16x32xf32>
    %22 = arith.mulf %20, %21 : vector<16x32xf32>
    %23 = vector.broadcast %2 : vector<1x32xf32> to vector<16x32xf32>
    %24 = arith.addf %22, %23 : vector<16x32xf32>
    %25 = arith.truncf %24 : vector<16x32xf32> to vector<16x32xbf16>
    %c0_9 = arith.constant 0 : index
    %c0_10 = arith.constant 0 : index
    %26 = vector.load %arg4[%c0_9, %c0_10] : memref<32x128xbf16, #tpu.memory_space<vmem>>, vector<32x128xbf16>
    %cst_11 = arith.constant dense<0.000000e+00> : vector<16x128xf32>
    %27 = tpu.matmul %25, %26, %cst_11 {dimension_numbers = #tpu.dot_dimension_numbers<[1], [0], [0], [1], [0, 0, 1, 1], [], []>} : vector<16x32xbf16>, vector<32x128xbf16>, vector<16x128xf32> -> vector<16x128xf32>
    %c0_12 = arith.constant 0 : index
    %c0_13 = arith.constant 0 : index
    %28 = vector.load %arg5[%c0_12, %c0_13] : memref<1x128xf32, #tpu.memory_space<vmem>>, vector<1x128xf32>
    %29 = vector.broadcast %28 : vector<1x128xf32> to vector<16x128xf32>
    %30 = arith.addf %27, %29 : vector<16x128xf32>
    %31 = arith.negf %30 : vector<16x128xf32>
    %32 = math.exp %31 : vector<16x128xf32>
    %cst_14 = arith.constant 1.000000e+00 : f32
    %33 = vector.broadcast %cst_14 : f32 to vector<16x128xf32>
    %34 = arith.addf %33, %32 : vector<16x128xf32>
    %35 = arith.divf %33, %34 : vector<16x128xf32>
    %c0_15 = arith.constant 0 : index
    %c0_16 = arith.constant 0 : index
    %36 = vector.load %arg6[%c0_15, %c0_16] : memref<16x128xf32, #tpu.memory_space<vmem>>, vector<16x128xf32>
    tpu.vector_store %arg6[%c0_15, %c0_16], %35 {strides = array<i32>} : memref<16x128xf32, #tpu.memory_space<vmem>>, vector<16x128xf32>,
    return
  }
  func.func @transform_0(%arg0: i32) -> (i32, i32) {
    %c0_i32 = arith.constant 0 : i32
    %c0_i32_0 = arith.constant 0 : i32
    return %arg0, %c0_i32 : i32, i32
  }
  func.func @transform_1(%arg0: i32) -> (i32, i32) {
    %c0_i32 = arith.constant 0 : i32
    %c0_i32_0 = arith.constant 0 : i32
    %c0_i32_1 = arith.constant 0 : i32
    return %c0_i32, %c0_i32_0 : i32, i32
  }
  func.func @transform_2(%arg0: i32) -> (i32, i32) {
    %c0_i32 = arith.constant 0 : i32
    %c0_i32_0 = arith.constant 0 : i32
    %c0_i32_1 = arith.constant 0 : i32
    return %c0_i32, %c0_i32_0 : i32, i32
  }
  func.func @transform_3(%arg0: i32) -> (i32, i32) {
    %c0_i32 = arith.constant 0 : i32
    %c0_i32_0 = arith.constant 0 : i32
    %c0_i32_1 = arith.constant 0 : i32
    return %c0_i32, %c0_i32_0 : i32, i32
  }
  func.func @transform_4(%arg0: i32) -> (i32, i32) {
    %c0_i32 = arith.constant 0 : i32
    %c0_i32_0 = arith.constant 0 : i32
    %c0_i32_1 = arith.constant 0 : i32
    return %c0_i32, %c0_i32_0 : i32, i32
  }
  func.func @transform_5(%arg0: i32) -> (i32, i32) {
    %c0_i32 = arith.constant 0 : i32
    %c0_i32_0 = arith.constant 0 : i32
    return %arg0, %c0_i32 : i32, i32
  }
}

</mosaic_0001>

<bundles_post_ra>
// kernel: eq.1
= control target key start
LH: loop header
LB: loop body
LE: loop exit
PB: predicated region body
PF: predicated region fallthrough
CT: control target
= control target key end

     0   :  { %vm7_vm0 = vcmask 64512   ;;  %vm13_vm1 = vcmask 130112   ;;  %s39_s0 = inlined_call_operand.vmem [shape: s32[2,8], index: 0, kind: input, shape index: {}]   ;;  %s40_s1 = inlined_call_operand.vmem [shape: s32[16], index: 1, kind: output, shape index: {}]  }
   0x1   :  { %v4_v0 = vld [vmem:[%s39_s0] sm:$0x3]  ;;  %s22_s0 = smov 8  }
   0x2   :  { %5 = vst [vmem:[#allocation1] sm:$0x3] %v4_v0 }
   0x9   :  { %v10_v1 = vld [vmem:[#allocation1 + $0x1] sm:$0x1]   ;;  %v6_v2 = vld [vmem:[#allocation1] sm:$0x1]  }
   0xa   :  { %11 = vrot.lane.b32.xlu0 %v10_v1, %s22_s0  ;;  %8 = vst.msk [vmem:[#allocation0] sm:$0x1] %vm7_vm0, %v6_v2  }
  0x7c   :  { %v12_v3 = vpop.permute.xlu0 %11  }
  0x7d   :  { %14 = vst.msk [vmem:[#allocation0] sm:$0x1] %vm13_vm1, %v12_v3  }
  0x84   :  { %v18_v4 = vld [vmem:[#allocation0] sm:$0x1] }
  0x85   :  { %20 = vst [vmem:[%s40_s1] sm:$0x1] %v18_v4 }

// kernel: table_decoder_fwd.7
= control target key start
LH: loop header
LB: loop body
LE: loop exit
PB: predicated region body
PF: predicated region fallthrough
CT: control target
= control target key end

     0   :  { %vm27_vm0 = vcmask 277504   ;;  %vm136_vm1 = vcmask 1040384   ;;  %s314_s0 = inlined_call_operand.vmem [shape: f32[32,34], index: 0, kind: input, shape index: {}]   ;;  %s315_s3 = inlined_call_operand.vmem [shape: bf16[34,128], index: 3, kind: input, shape index: {}]   ;;  %s316_s1 = inlined_call_operand.vmem [shape: f32[1,34], index: 1, kind: input, shape index: {}]   ;;  %s317_s2 = inlined_call_operand.vmem [shape: f32[1,34], index: 2, kind: input, shape index: {}]   ;;  %s318_s4 = inlined_call_operand.vmem [shape: f32[1,128], index: 4, kind: input, shape index: {}]   ;;  %s319_s5 = inlined_call_operand.vmem [shape: f32[32,128], index: 5, kind: output, shape index: {}]  }
   0x1   :  { %v21_v0 = vld [vmem:[%s314_s0] sm:$0xff]  ;;  %v23_v1 = vld [vmem:[%s314_s0 + $0x10] sm:$0xff]  ;;  %v22_v2 = vld [vmem:[%s314_s0 + $0x8] sm:$0xff] }
   0x2   :  { %v28_v3 = vsel %vm27_vm0, %v21_v0, 0.0  ;;  %v34_v4 = vsel %vm27_vm0, %v23_v1, 0.0  ;;  %v24_v5 = vld [vmem:[%s314_s0 + $0x18] sm:$0xff]  ;;  %v31_v6 = vsel %vm27_vm0, %v22_v2, 0.0  ;;  %v221_v28 = vld [vmem:[%s315_s3] sm:$0xff]   ;;  %v222_v29 = vld [vmem:[%s315_s3 + $0x8] sm:$0xff]  }
   0x3   :  { %29 = vadd.xlane.f32.xlu0 %v28_v3  ;;  %35 = vadd.xlane.f32.xlu1 %v34_v4  ;;  %v37_v7 = vsel %vm27_vm0, %v24_v5, 0.0  ;;  %v223_v30 = vld [vmem:[%s315_s3 + $0x10] ss:$0 sps:$4 sm:$0x11]   ;;  %v197_v46 = vld [vmem:[%s316_s1] ss:$0 sm:$0xff] }
   0x4   :  { %210 = vmatprep.subr.bf16.mxu0 %v221_v28  ;;  %v138_v31 = vsel %vm136_vm1, %v223_v30, 0  ;;  %v198_v52 = vld [vmem:[%s317_s2] ss:$0 sm:$0xff] }
   0x5   :  { %211 = vmatpush3.bf16.msra.mxu0 %v221_v28 }
   0x6   :  { %212 = vmatprep.subr.bf16.mxu0 %v222_v29 }
   0x7   :  { %32 = vadd.xlane.f32.xlu0 %v31_v6  ;;  %38 = vadd.xlane.f32.xlu1 %v37_v7 }
   0x9   :  { %213 = vmatpush3.bf16.msra.mxu0 %v222_v29 }
   0xa   :  { %220 = vmatprep.subr.msk.bf16.mxu0 %vm136_vm1, %v223_v30 }
   0xd   :  { %215 = vmatpush3.bf16.msra.mxu0 %v138_v31 }
  0x90   :  { %v30_v8 = vpop.xlane.xlu0 %29  ;;  %v36_v9 = vpop.xlane.xlu1 %35 }
  0x91   :  { %v41_v10 = vmul.f32 0.029411765, %v30_v8  ;;  %v43_v11 = vmul.f32 0.029411765, %v36_v9 }
  0x93   :  { %v45_v12 = vsub.f32 %v21_v0, %v41_v10  ;;  %v47_v13 = vsub.f32 %v23_v1, %v43_v11  ;;  %v199_v0 = vld [vmem:[%s318_s4] ss:$0 sm:$0xff] }
  0x94   :  { %v33_v14 = vpop.xlane.xlu0 %32  ;;  %v39_v15 = vpop.xlane.xlu1 %38 }
  0x95   :  { %v42_v16 = vmul.f32 0.029411765, %v33_v14  ;;  %v44_v17 = vmul.f32 0.029411765, %v39_v15  ;;  %v49_v18 = vmul.f32 %v45_v12, %v45_v12  ;;  %v51_v19 = vmul.f32 %v47_v13, %v47_v13 }
  0x97   :  { %v46_v20 = vsub.f32 %v22_v2, %v42_v16  ;;  %v48_v21 = vsub.f32 %v24_v5, %v44_v17  ;;  %v53_v22 = vsel %vm27_vm0, %v49_v18, 0.0  ;;  %v59_v23 = vsel %vm27_vm0, %v51_v19, 0.0 }
  0x98   :  { %54 = vadd.xlane.f32.xlu0 %v53_v22 }
  0x99   :  { %v50_v24 = vmul.f32 %v46_v20, %v46_v20  ;;  %v52_v25 = vmul.f32 %v48_v21, %v48_v21 }
  0x9b   :  { %v56_v26 = vsel %vm27_vm0, %v50_v24, 0.0  ;;  %v62_v27 = vsel %vm27_vm0, %v52_v25, 0.0 }
  0x9c   :  { %60 = vadd.xlane.f32.xlu0 %v59_v23  ;;  %57 = vadd.xlane.f32.xlu1 %v56_v26 }
  0xa0   :  { %63 = vadd.xlane.f32.xlu1 %v62_v27 }
 0x125   :  { %v55_v32 = vpop.xlane.xlu0 %54 }
 0x126   :  { %v65_v33 = vmul.f32 0.029411765, %v55_v32 }
 0x128   :  { %v69_v34 = vadd.f32 1e-05, %v65_v33 }
 0x129   :  { %v58_v35 = vpop.xlane.xlu1 %57  ;;  %v61_v36 = vpop.xlane.xlu0 %60 }
 0x12a   :  { %224 = vrsqrt.f32 %v69_v34  ;;  %v66_v37 = vmul.f32 0.029411765, %v58_v35  ;;  %v67_v38 = vmul.f32 0.029411765, %v61_v36 }
 0x12c   :  { %v70_v39 = vadd.f32 1e-05, %v66_v37  ;;  %v71_v40 = vadd.f32 1e-05, %v67_v38 }
 0x12d   :  { %v64_v41 = vpop.xlane.xlu1 %63 }
 0x12e   :  { %226 = vrsqrt.f32 %v70_v39  ;;  %v68_v42 = vmul.f32 0.029411765, %v64_v41 }
 0x12f   :  { %228 = vrsqrt.f32 %v71_v40 }
 0x130   :  { %v72_v43 = vadd.f32 1e-05, %v68_v42 }
 0x132   :  { %230 = vrsqrt.f32 %v72_v43 }
 0x134   :  { %v225_v44 = vpop.eup %224 }
 0x135   :  { %v77_v45 = vmul.f32 %v225_v44, %v45_v12 }
 0x137   :  { %v87_v50 = vmul.f32 %v197_v46, %v77_v45 }
 0x138   :  { %v227_v47 = vpop.eup %226 }
 0x139   :  { %v229_v48 = vpop.eup %228  ;;  %v78_v49 = vmul.f32 %v227_v47, %v46_v20  ;;  %v97_v56 = vadd.f32 %v198_v52, %v87_v50 }
 0x13a   :  { %v79_v51 = vmul.f32 %v229_v48, %v47_v13 }
 0x13b   :  { %v88_v53 = vmul.f32 %v197_v46, %v78_v49 }
 0x13c   :  { %v231_v54 = vpop.eup %230  ;;  %v89_v58 = vmul.f32 %v197_v46, %v79_v51 }
 0x13d   :  { %v80_v55 = vmul.f32 %v231_v54, %v48_v21  ;;  %v98_v57 = vadd.f32 %v198_v52, %v88_v53 }
 0x13e   :  { %v99_v61 = vadd.f32 %v198_v52, %v89_v58 }
 0x13f   :  { %v101_v59 = vpack.c.bf16 %v98_v57, %v97_v56  ;;  %v90_v60 = vmul.f32 %v197_v46, %v80_v55 }
 0x141   :  { %216 = vmatprep.mubr.msk.bf16.mxu0 %vm27_vm0, %v101_v59  ;;  %v100_v62 = vadd.f32 %v198_v52, %v90_v60 }
 0x143   :  { %v102_v63 = vpack.c.bf16 %v100_v62, %v99_v61 }
 0x145   :  { %217 = vmatmul.mubr.msk.bf16.vlgmr.msra.gmra.mrb[0].mxu0 %vm27_vm0, %v102_v63 }
 0x218   :  { %v218_v1 = vpop.f32.mrb[0].mxu0 }
 0x219   :  { %v183_v2 = vadd.f32 %v218_v1, %v199_v0  ;;  %v174_v3 = vpop.f32.mrb[1].mxu0 }
 0x21a   :  { %v175_v4 = vadd.f32 %v199_v0, %v174_v3  ;;  %v219_v5 = vpop.f32.mrb[2].mxu0 }
 0x21b   :  { %191 = vst [vmem:[%s319_s5 + $0x10] sm:$0xff] %v183_v2  ;;  %v186_v6 = vadd.f32 %v219_v5, %v199_v0  ;;  %v177_v7 = vpop.f32.mrb[3].mxu0 }
 0x21c   :  { %189 = vst [vmem:[%s319_s5] sm:$0xff] %v175_v4  ;;  %v178_v8 = vadd.f32 %v199_v0, %v177_v7 }
 0x21d   :  { %192 = vst [vmem:[%s319_s5 + $0x18] sm:$0xff] %v186_v6 }
 0x21e   :  { %190 = vst [vmem:[%s319_s5 + $0x8] sm:$0xff] %v178_v8 }

// kernel: table_decoder_fwd.10
= control target key start
LH: loop header
LB: loop body
LE: loop exit
PB: predicated region body
PF: predicated region fallthrough
CT: control target
= control target key end

     0   :  { %vm25_vm0 = vcmask 523264   ;;  %v194_v15 = vmov 0.0   ;;  %vm195_vm1 = vmmov 0   ;;  %s264_s0 = inlined_call_operand.vmem [shape: f32[16,64], index: 0, kind: input, shape index: {}]   ;;  %s265_s3 = inlined_call_operand.vmem [shape: bf16[64,128], index: 3, kind: input, shape index: {}]   ;;  %s266_s1 = inlined_call_operand.vmem [shape: f32[1,64], index: 1, kind: input, shape index: {}]   ;;  %s267_s2 = inlined_call_operand.vmem [shape: f32[1,64], index: 2, kind: input, shape index: {}]   ;;  %s268_s4 = inlined_call_operand.vmem [shape: f32[1,128], index: 4, kind: input, shape index: {}]   ;;  %s269_s5 = inlined_call_operand.vmem [shape: f32[16,128], index: 5, kind: output, shape index: {}]  }
   0x1   :  { %v21_v0 = vld [vmem:[%s264_s0] sm:$0xff]  ;;  %v22_v1 = vld [vmem:[%s264_s0 + $0x8] sm:$0xff]  ;;  %172 = vmatprep.subr.bf16.mxu0 %v194_v15  ;;  %v188_v17 = vld [vmem:[%s265_s3 + $0x10] sm:$0xff]   ;;  %180 = vmatprep.mubr.msk.bf16.mxu0 %vm195_vm1, %v194_v15 }
   0x2   :  { %v26_v2 = vsel %vm25_vm0, %v21_v0, 0.0  ;;  %v29_v3 = vsel %vm25_vm0, %v22_v1, 0.0  ;;  %v186_v14 = vld [vmem:[%s265_s3] sm:$0xff]   ;;  %v187_v16 = vld [vmem:[%s265_s3 + $0x8] sm:$0xff]   ;;  %v189_v18 = vld [vmem:[%s265_s3 + $0x18] sm:$0xff]  }
   0x3   :  { %27 = vadd.xlane.f32.xlu0 %v26_v2  ;;  %173 = vmatpush3.bf16.msra.mxu0 %v186_v14  ;;  %v159_v27 = vld [vmem:[%s266_s1] ss:$0 sm:$0xff] }
   0x4   :  { %174 = vmatprep.subr.bf16.mxu0 %v194_v15  ;;  %v160_v31 = vld [vmem:[%s267_s2] ss:$0 sm:$0xff] }
   0x5   :  { %v161_v36 = vld [vmem:[%s268_s4] ss:$0 sm:$0xff] }
   0x7   :  { %30 = vadd.xlane.f32.xlu0 %v29_v3  ;;  %175 = vmatpush3.bf16.msra.mxu0 %v187_v16 }
   0x8   :  { %176 = vmatprep.subr.bf16.mxu0 %v194_v15 }
   0xb   :  { %177 = vmatpush3.bf16.msra.mxu0 %v188_v17 }
   0xc   :  { %178 = vmatprep.subr.bf16.mxu0 %v194_v15 }
   0xf   :  { %179 = vmatpush3.bf16.msra.mxu0 %v189_v18 }
  0x90   :  { %v28_v4 = vpop.xlane.xlu0 %27 }
  0x91   :  { %v33_v5 = vmul.f32 0.015625, %v28_v4 }
  0x93   :  { %v35_v6 = vsub.f32 %v21_v0, %v33_v5 }
  0x94   :  { %v31_v7 = vpop.xlane.xlu0 %30 }
  0x95   :  { %v34_v8 = vmul.f32 0.015625, %v31_v7  ;;  %v37_v9 = vmul.f32 %v35_v6, %v35_v6 }
  0x97   :  { %v36_v10 = vsub.f32 %v22_v1, %v34_v8  ;;  %v39_v11 = vsel %vm25_vm0, %v37_v9, 0.0 }
  0x98   :  { %40 = vadd.xlane.f32.xlu1 %v39_v11 }
  0x99   :  { %v38_v12 = vmul.f32 %v36_v10, %v36_v10 }
  0x9b   :  { %v42_v13 = vsel %vm25_vm0, %v38_v12, 0.0 }
  0x9c   :  { %43 = vadd.xlane.f32.xlu1 %v42_v13 }
 0x125   :  { %v41_v19 = vpop.xlane.xlu1 %40 }
 0x126   :  { %v45_v20 = vmul.f32 0.015625, %v41_v19 }
 0x128   :  { %v47_v21 = vadd.f32 1e-05, %v45_v20 }
 0x129   :  { %v44_v22 = vpop.xlane.xlu1 %43 }
 0x12a   :  { %190 = vrsqrt.f32 %v47_v21  ;;  %v46_v23 = vmul.f32 0.015625, %v44_v22 }
 0x12c   :  { %v48_v24 = vadd.f32 1e-05, %v46_v23 }
 0x12e   :  { %192 = vrsqrt.f32 %v48_v24 }
 0x134   :  { %v191_v25 = vpop.eup %190 }
 0x135   :  { %v51_v26 = vmul.f32 %v191_v25, %v35_v6 }
 0x137   :  { %v59_v30 = vmul.f32 %v159_v27, %v51_v26 }
 0x138   :  { %v193_v28 = vpop.eup %192 }
 0x139   :  { %v52_v29 = vmul.f32 %v193_v28, %v36_v10  ;;  %v67_v33 = vadd.f32 %v160_v31, %v59_v30 }
 0x13b   :  { %v60_v32 = vmul.f32 %v159_v27, %v52_v29 }
 0x13d   :  { %v68_v34 = vadd.f32 %v160_v31, %v60_v32 }
 0x13f   :  { %v69_v35 = vpack.c.bf16 %v68_v34, %v67_v33 }
 0x141   :  { %181 = vmatmul.mubr.msk.bf16.vlgmr.msra.gmra.mrb[0].mxu0 %vm25_vm0, %v69_v35 }
 0x214   :  { %v146_v37 = vpop.f32.mrb[0].mxu0 }
 0x215   :  { %v147_v38 = vadd.f32 %v161_v36, %v146_v37  ;;  %v182_v39 = vpop.f32.mrb[1].mxu0 }
 0x216   :  { %v149_v40 = vpop.f32.mrb[2].mxu0 }
 0x217   :  { %153 = vst [vmem:[%s269_s5] sm:$0xff] %v147_v38  ;;  %v150_v41 = vadd.f32 %v161_v36, %v149_v40  ;;  %v183_v42 = vpop.f32.mrb[3].mxu0 }
 0x219   :  { %154 = vst [vmem:[%s269_s5 + $0x8] sm:$0xff] %v150_v41 }

// kernel: table_decoder_fwd.12
= control target key start
LH: loop header
LB: loop body
LE: loop exit
PB: predicated region body
PF: predicated region fallthrough
CT: control target
= control target key end

     0   :  { %vm25_vm0 = vcmask 261120   ;;  %v168_v15 = vmov 0.0   ;;  %vm169_vm1 = vmmov 0   ;;  %s232_s0 = inlined_call_operand.vmem [shape: f32[16,32], index: 0, kind: input, shape index: {}]   ;;  %s233_s3 = inlined_call_operand.vmem [shape: bf16[32,128], index: 3, kind: input, shape index: {}]   ;;  %s234_s1 = inlined_call_operand.vmem [shape: f32[1,32], index: 1, kind: input, shape index: {}]   ;;  %s235_s2 = inlined_call_operand.vmem [shape: f32[1,32], index: 2, kind: input, shape index: {}]   ;;  %s236_s4 = inlined_call_operand.vmem [shape: f32[1,128], index: 4, kind: input, shape index: {}]   ;;  %s237_s5 = inlined_call_operand.vmem [shape: f32[16,128], index: 5, kind: output, shape index: {}]  }
   0x1   :  { %v21_v0 = vld [vmem:[%s232_s0] sm:$0xff]  ;;  %v22_v1 = vld [vmem:[%s232_s0 + $0x8] sm:$0xff]  ;;  %152 = vmatprep.subr.bf16.mxu0 %v168_v15  ;;  %156 = vmatprep.mubr.msk.bf16.mxu0 %vm169_vm1, %v168_v15 }
   0x2   :  { %v26_v2 = vsel %vm25_vm0, %v21_v0, 0.0  ;;  %v29_v3 = vsel %vm25_vm0, %v22_v1, 0.0  ;;  %v162_v14 = vld [vmem:[%s233_s3] sm:$0xff]   ;;  %v163_v16 = vld [vmem:[%s233_s3 + $0x8] sm:$0xff]  }
   0x3   :  { %27 = vadd.xlane.f32.xlu0 %v26_v2  ;;  %153 = vmatpush3.bf16.msra.mxu0 %v162_v14  ;;  %v143_v25 = vld [vmem:[%s234_s1] ss:$0 sm:$0xff] }
   0x4   :  { %154 = vmatprep.subr.bf16.mxu0 %v168_v15  ;;  %v144_v29 = vld [vmem:[%s235_s2] ss:$0 sm:$0xff] }
   0x5   :  { %v145_v34 = vld [vmem:[%s236_s4] ss:$0 sm:$0xff] }
   0x7   :  { %30 = vadd.xlane.f32.xlu0 %v29_v3  ;;  %155 = vmatpush3.bf16.msra.mxu0 %v163_v16 }
  0x90   :  { %v28_v4 = vpop.xlane.xlu0 %27 }
  0x91   :  { %v33_v5 = vmul.f32 0.03125, %v28_v4 }
  0x93   :  { %v35_v6 = vsub.f32 %v21_v0, %v33_v5 }
  0x94   :  { %v31_v7 = vpop.xlane.xlu0 %30 }
  0x95   :  { %v34_v8 = vmul.f32 0.03125, %v31_v7  ;;  %v37_v9 = vmul.f32 %v35_v6, %v35_v6 }
  0x97   :  { %v36_v10 = vsub.f32 %v22_v1, %v34_v8  ;;  %v39_v11 = vsel %vm25_vm0, %v37_v9, 0.0 }
  0x98   :  { %40 = vadd.xlane.f32.xlu1 %v39_v11 }
  0x99   :  { %v38_v12 = vmul.f32 %v36_v10, %v36_v10 }
  0x9b   :  { %v42_v13 = vsel %vm25_vm0, %v38_v12, 0.0 }
  0x9c   :  { %43 = vadd.xlane.f32.xlu1 %v42_v13 }
 0x125   :  { %v41_v17 = vpop.xlane.xlu1 %40 }
 0x126   :  { %v45_v18 = vmul.f32 0.03125, %v41_v17 }
 0x128   :  { %v47_v19 = vadd.f32 1e-05, %v45_v18 }
 0x129   :  { %v44_v20 = vpop.xlane.xlu1 %43 }
 0x12a   :  { %164 = vrsqrt.f32 %v47_v19  ;;  %v46_v21 = vmul.f32 0.03125, %v44_v20 }
 0x12c   :  { %v48_v22 = vadd.f32 1e-05, %v46_v21 }
 0x12e   :  { %166 = vrsqrt.f32 %v48_v22 }
 0x134   :  { %v165_v23 = vpop.eup %164 }
 0x135   :  { %v51_v24 = vmul.f32 %v165_v23, %v35_v6 }
 0x137   :  { %v59_v28 = vmul.f32 %v143_v25, %v51_v24 }
 0x138   :  { %v167_v26 = vpop.eup %166 }
 0x139   :  { %v52_v27 = vmul.f32 %v167_v26, %v36_v10  ;;  %v67_v31 = vadd.f32 %v144_v29, %v59_v28 }
 0x13b   :  { %v60_v30 = vmul.f32 %v143_v25, %v52_v27 }
 0x13d   :  { %v68_v32 = vadd.f32 %v144_v29, %v60_v30 }
 0x13f   :  { %v69_v33 = vpack.c.bf16 %v68_v32, %v67_v31 }
 0x141   :  { %157 = vmatmul.mubr.msk.bf16.vlgmr.msra.gmra.mrb[0].mxu0 %vm25_vm0, %v69_v33 }
 0x214   :  { %v130_v35 = vpop.f32.mrb[0].mxu0 }
 0x215   :  { %v131_v36 = vadd.f32 %v145_v34, %v130_v35  ;;  %v158_v37 = vpop.f32.mrb[1].mxu0 }
 0x216   :  { %v133_v38 = vpop.f32.mrb[2].mxu0 }
 0x217   :  { %137 = vst [vmem:[%s237_s5] sm:$0xff] %v131_v36  ;;  %v134_v39 = vadd.f32 %v145_v34, %v133_v38  ;;  %v159_v40 = vpop.f32.mrb[3].mxu0 }
 0x219   :  { %138 = vst [vmem:[%s237_s5 + $0x8] sm:$0xff] %v134_v39 }

// kernel: table_decoder_fwd.8
= control target key start
LH: loop header
LB: loop body
LE: loop exit
PB: predicated region body
PF: predicated region fallthrough
CT: control target
= control target key end

     0   :  { %s3427_s0 = inlined_call_operand.vmem [shape: f32[4,8,32], index: 0, kind: input, shape index: {}]   ;;  %s3428_s1 = inlined_call_operand.vmem [shape: f32[4,16,32], index: 1, kind: input, shape index: {}]   ;;  %s3429_s2 = inlined_call_operand.vmem [shape: bf16[32,32], index: 2, kind: input, shape index: {}]   ;;  %s3430_s3 = inlined_call_operand.vmem [shape: f32[1,32], index: 3, kind: input, shape index: {}]   ;;  %s3431_s4 = inlined_call_operand.vmem [shape: bf16[32,64], index: 4, kind: input, shape index: {}]   ;;  %s3432_s5 = inlined_call_operand.vmem [shape: f32[1,64], index: 5, kind: input, shape index: {}]   ;;  %s3433_s6 = inlined_call_operand.vmem [shape: bf16[32,32], index: 6, kind: input, shape index: {}]   ;;  %s3434_s7 = inlined_call_operand.vmem [shape: f32[1,32], index: 7, kind: input, shape index: {}]   ;;  %s3435_s8 = inlined_call_operand.vmem [shape: bf16[32,32], index: 8, kind: input, shape index: {}]   ;;  %s3436_s9 = inlined_call_operand.vmem [shape: f32[1,32], index: 9, kind: input, shape index: {}]   ;;  %s3437_s10 = inlined_call_operand.vmem [shape: bf16[32,64], index: 10, kind: input, shape index: {}]   ;;  %s3438_s11 = inlined_call_operand.vmem [shape: f32[1,64], index: 11, kind: input, shape index: {}]   ;;  %s3439_s12 = inlined_call_operand.vmem [shape: bf16[32,32], index: 12, kind: input, shape index: {}]   ;;  %s3440_s13 = inlined_call_operand.vmem [shape: f32[1,32], index: 13, kind: input, shape index: {}]   ;;  %s3441_s14 = inlined_call_operand.vmem [shape: f32[1,32], index: 14, kind: input, shape index: {}]   ;;  %s3442_s15 = inlined_call_operand.vmem [shape: f32[1,32], index: 15, kind: input, shape index: {}]   ;;  %s3443_s16 = inlined_call_operand.vmem [shape: bf16[32,32], index: 16, kind: input, shape index: {}]   ;;  %s3444_s17 = inlined_call_operand.vmem [shape: f32[1,32], index: 17, kind: input, shape index: {}]   ;;  %s3445_s18 = inlined_call_operand.vmem [shape: f32[1,32], index: 18, kind: input, shape index: {}]   ;;  %s3446_s19 = inlined_call_operand.vmem [shape: f32[1,32], index: 19, kind: input, shape index: {}]   ;;  %s3447_s20 = inlined_call_operand.vmem [shape: bf16[32,32], index: 20, kind: input, shape index: {}]   ;;  %s3448_s21 = inlined_call_operand.vmem [shape: f32[1,32], index: 21, kind: input, shape index: {}]   ;;  %s3449_s22 = inlined_call_operand.vmem [shape: f32[4,8,32], index: 22, kind: output, shape index: {}]  }
   0x1   :  { %3462 = sst [smem:[#allocation2_spill]] %s3427_s0 }
   0x2   :  { %3463 = sst [smem:[#allocation3_spill]] %s3428_s1 }
   0x3   :  { %3464 = sst [smem:[#allocation4_spill]] %s3429_s2 }
   0x4   :  { %3465 = sst [smem:[#allocation5_spill]] %s3430_s3  ;;  %s3051_s3 = smov 0  }
   0x5   :  { %3466 = sst [smem:[#allocation6_spill]] %s3431_s4 }
   0x6   :  { %3467 = sst [smem:[#allocation7_spill]] %s3432_s5 }
   0x7   :  { %3468 = sst [smem:[#allocation8_spill]] %s3433_s6 }
   0x8 LB: > { %s2530_s28 = sadd.s32 4294967295, %s2925_s3   ;;  %p2534_p0 = scmp.ge.s32.totalorder %s2925_s3, 1  ;;  %s2925_s3 = sphi %s3051_s3, %s32_s3  }
   0x9   : > { %p621_p1 = scmp.lt.s32.totalorder %s2925_s3, 5 }
   0xb   : > { %p622_p2 = pnand %p2534_p0, %p621_p1 }
   0xc   : > { %s3469_s4 = sld [smem:[#allocation6_spill]] (!%p622_p2)  ;;  %v2927_v1 = vmov (!%p622_p2), 0.0   ;;  %s3470_s24 = sld [smem:[#allocation4_spill]] (!%p622_p2)  ;;  %vm2928_vm0 = vmmov (!%p622_p2), 0   ;;  %vm732_vm1 = vcmask (!%p622_p2), 261120   ;;  %vm852_vm2 = vcmask (!%p622_p2), 64512  }
   0xd   : > { %625 = sbr.rel (%p622_p2) target bundleno = 6683 (0x1a1b), region = 108  ;;  %2670 = vmatprep.subr.bf16.mxu1 (!%p622_p2), %v2927_v1  ;;  %2662 = vmatprep.subr.bf16.mxu0 (!%p622_p2), %v2927_v1  ;;  %p686_p3 = scmp.lt.s32.totalorder (!%p622_p2), %s2530_s28, 3  ;;  %vm919_vm3 = vcmask (!%p622_p2), 1043456   ;;  %v703_v24 = vlaneseq (!%p622_p2)  ;;  %vm1688_vm5 = vcmask (!%p622_p2), 130048  }
   0xe   : > { %2674 = vmatprep.mubr.msk.bf16.mxu1 (!%p622_p2), %vm2928_vm0, %v2927_v1  ;;  %2666 = vmatprep.mubr.msk.bf16.mxu0 (!%p622_p2), %vm2928_vm0, %v2927_v1  ;;  %s3471_s29 = sld [smem:[#allocation2_spill]] (!%p622_p2)  ;;  %s3472_s1 = sld [smem:[#allocation7_spill]] (!%p622_p2) }
   0xf   : > { %s3473_s25 = sld [smem:[#allocation5_spill]] (!%p622_p2)  ;;  %s3461_s2 = smov (!%p622_p2), 96   ;;  %v3122_v25 = vshrl.u32 (!%p622_p2), %v703_v24, 7  ;;  %v3124_v26 = vand.u32 (!%p622_p2), 127, %v703_v24 }
  0x10   : > { %s2930_s27 = smov (!%p622_p2), 120   ;;  %s3474_s0 = sld [smem:[#allocation8_spill]] (!%p622_p2) }
  0x11   : > { %vm707_vm4 = vcmp.ge.s32.totalorder (!%p622_p2), %v3122_v25, %v3124_v26  ;;  %s3460_s23 = smov (!%p622_p2), 88   ;;  %s3454_s5 = smov (!%p622_p2), 72  }
  0x12   : > { %v2871_v0 = vld [vmem:[%s3469_s4] sm:$0xff] (!%p622_p2)   ;;  %v2872_v2 = vld [vmem:[%s3469_s4 + $0x8] sm:$0xff] (!%p622_p2)  }
  0x13   : > { %2671 = vmatpush3.bf16.msra.mxu1 (!%p622_p2), %v2871_v0  ;;  %v2873_v3 = vld [vmem:[%s3470_s24] sm:$0xff] (!%p622_p2)   ;;  %v2874_v4 = vld [vmem:[%s3470_s24 + $0x8] sm:$0xff] (!%p622_p2)  }
  0x14   : > { %2672 = vmatprep.subr.bf16.mxu1 %v2927_v1  ;;  %2663 = vmatpush3.bf16.msra.mxu0 %v2873_v3  ;;  %s3484_s28 = smov (!%p686_p3, %s2530_s28), 3  ;;  %v2543_v7 = vld [vmem:[%s3472_s1] ss:$0 sm:$0xff]  ;;  %s3458_s1 = smov 112  }
  0x15   : > { %2664 = vmatprep.subr.bf16.mxu0 %v2927_v1  ;;  %s3453_s26 = sshll.u32 %s3484_s28, 3  ;;  %v2539_v14 = vld [vmem:[%s3473_s25] ss:$0 sm:$0xff]  ;;  %s3457_s25 = smov 80  }
  0x16   : > { %s689_s30 = scalar_lea.vmem %s3471_s29, %s3453_s26  ;;  %v839_v46 = vld [vmem:[%s3474_s0] sm:$0xf]  ;;  %s3455_s29 = smov 104   ;;  %v842_v26 = vld [vmem:[%s3474_s0 + $0xc] sm:$0xf] }
  0x17   : > { %2673 = vmatpush3.bf16.msra.mxu1 %v2872_v2  ;;  %v3088_v5 = vld [vmem:[%s689_s30] sm:$0xff]  ;;  %v968_v47 = vsel %vm919_vm3, %v839_v46, 0  ;;  %s2595_s6 = sshll.u32 %s3484_s28, 4 }
  0x18   : > { %2684 = vmatprep.subr.bf16.mxu1 %v2927_v1  ;;  %2665 = vmatpush3.bf16.msra.mxu0 %v2874_v4  ;;  %v708_v6 = vpack.c.bf16 %v3088_v5, %v3088_v5 }
  0x19   : > { %2678 = vmatprep.subr.bf16.mxu0 %v2927_v1 }
  0x1a   : > { %2675 = vmatmul.mubr.msk.bf16.vlgmr.msra.gmra.mrb[0].mxu1 %vm732_vm1, %v708_v6 }
  0x1b   : > { %2667 = vmatmul.mubr.msk.bf16.vlgmr.msra.gmra.mrb[0].mxu0 %vm732_vm1, %v708_v6  ;;  %2686 = vmatprep.mubr.msk.bf16.mxu1 %vm2928_vm0, %v2927_v1 }
  0x1c   : > { %2680 = vmatprep.mubr.msk.bf16.mxu0 %vm2928_vm0, %v2927_v1 }
  0xed   : > { %v833_v8 = vpop.f32.mrb[0].mxu1 }
  0xee   : > { %v770_v9 = vpop.f32.mrb[0].mxu0  ;;  %v834_v10 = vadd.f32 %v2543_v7, %v833_v8  ;;  %v2676_v11 = vpop.f32.mrb[1].mxu1 }
  0xef   : > { %v2668_v12 = vpop.f32.mrb[1].mxu0  ;;  %v836_v13 = vpop.f32.mrb[2].mxu1  ;;  %v771_v19 = vadd.f32 %v2539_v14, %v770_v9 }
  0xf0   : > { %v773_v15 = vpop.f32.mrb[2].mxu0  ;;  %v3105_v16 = vpack.c.bf16 %v834_v10, %v834_v10  ;;  %v2677_v17 = vpop.f32.mrb[3].mxu1 }
  0xf1   : > { %v2669_v18 = vpop.f32.mrb[3].mxu0  ;;  %v3112_v21 = vpack.c.bf16 %v771_v19, %v771_v19  ;;  %v840_v17 = vld [vmem:[%s3474_s0 + $0x4] sm:$0xf] }
  0xf2   : > { %914 = vrot.lane.b32.xlu1 %v3105_v16, %s3461_s2  ;;  %v857_v20 = vsel %vm852_vm2, %v3105_v16, 0  ;;  %v1129_v18 = vsel %vm919_vm3, %v840_v17, 0  ;;  %s3478_s2 = smov 112  }
  0xf3   : > { %2679 = vmatpush3.bf16.xpose.msra.mxu0 %v857_v20 }
  0xf4   : > { %2690 = vmatprep.subr.bf16.mxu0 %v2927_v1 }
  0xf6   : > { %1014 = vrot.lane.b32.xlu1 %v3105_v16, %s2930_s27 }
  0xfa   : > { %2681 = vmatmul.mubr.msk.bf16.vlgmr.msra.gmra.mrb[4].mxu0 %vm852_vm2, %v3112_v21 }
  0xfb   : > { %2692 = vmatprep.mubr.msk.bf16.mxu0 %vm2928_vm0, %v2927_v1  ;;  %2691 = vmatpush3.bf16.msra.mxu0 %v968_v47 }
  0xfc   : > { %2702 = vmatprep.subr.bf16.mxu0 %v2927_v1 }
 0x164   : > { %v915_v22 = vpop.permute.xlu1 %914 }
 0x165   : > { %v921_v23 = vsel %vm919_vm3, %v915_v22, 0 }
 0x166   : > { %2685 = vmatpush3.bf16.msra.mxu1 %v921_v23 }
 0x167   : > { %2696 = vmatprep.subr.bf16.mxu1 %v2927_v1 }
 0x168   : > { %v1015_v42 = vpop.permute.xlu1 %1014 }
 0x169   : > { %v1020_v44 = vsel %vm852_vm2, %v1015_v42, 0 }
 0x1cd   : > { %v893_v27 = vpop.f32.mrb[4].mxu0 }
 0x1ce   : > { %v899_v28 = vmul.f32 0.35355338, %v893_v27  ;;  %v2682_v29 = vpop.f32.mrb[5].mxu0 }
 0x1cf   : > { %v896_v30 = vpop.f32.mrb[6].mxu0 }
 0x1d0   : > { %v2683_v31 = vpop.f32.mrb[7].mxu0  ;;  %v900_v32 = vsel %vm707_vm4, %v899_v28, -1e+30 }
 0x1d1   : > { %v901_v33 = vsel %vm852_vm2, %v900_v32, -inf }
 0x1d2   : > { %902 = vmax.xlane.f32.xlu0 %v901_v33 }
 0x25f   : > { %v903_v34 = vpop.xlane.xlu0 %902 }
 0x260   : > { %v904_v35 = vsub.f32 %v900_v32, %v903_v34 }
 0x262   : > { %v905_v36 = vmul.f32 1.442695, %v904_v35 }
 0x264   : > { %2883 = vpow2.f32 %v905_v36 }
 0x26e   : > { %v2884_v37 = vpop.eup %2883 }
 0x26f   : > { %v907_v38 = vsel %vm852_vm2, %v2884_v37, 0.0 }
 0x270   : > { %908 = vadd.xlane.f32.xlu0 %v907_v38 }
 0x286   : > { %1012 = vrot.lane.b32.xlu0 %v3112_v21, %s2930_s27 }
 0x2fd   : > { %v909_v39 = vpop.xlane.xlu0 %908 }
 0x2fe   : > { %2885 = vrcp.f32 %v909_v39 }
 0x301   : > { %v1013_v45 = vpop.permute.xlu0 %1012 }
 0x308   : > { %v2886_v40 = vpop.eup %2885 }
 0x309   : > { %v911_v41 = vmul.f32 %v2886_v40, %v2884_v37 }
 0x30b   : > { %v912_v43 = vpack.c.bf16 %v911_v41, %v911_v41 }
 0x30d   : > { %2687 = vmatmul.mubr.msk.bf16.vlgmr.msra.gmra.mrb[4].mxu1 %vm852_vm2, %v912_v43 }
 0x30e   : > { %2697 = vmatpush3.bf16.xpose.msra.mxu1 %v1020_v44  ;;  %2698 = vmatprep.mubr.msk.bf16.mxu1 %vm2928_vm0, %v2927_v1 }
 0x30f   : > { %2708 = vmatprep.subr.bf16.mxu1 %v2927_v1 }
 0x315   : > { %2699 = vmatmul.mubr.msk.bf16.vlgmr.msra.gmra.mrb[8].mxu1 %vm852_vm2, %v1013_v45 }
 0x316   : > { %2710 = vmatprep.mubr.msk.bf16.mxu1 %vm2928_vm0, %v2927_v1  ;;  %2709 = vmatpush3.bf16.msra.mxu1 %v1129_v18 }
 0x317   : > { %2720 = vmatprep.subr.bf16.mxu1 %v2927_v1 }
 0x3e0   : > { %v957_v48 = vpop.f32.mrb[4].mxu1 }
 0x3e1   : > { %v963_v49 = vpack.c.bf16 %v957_v48, %v957_v48  ;;  %v2688_v50 = vpop.f32.mrb[5].mxu1 }
 0x3e2   : > { %v960_v51 = vpop.f32.mrb[6].mxu1 }
 0x3e3   : > { %v2689_v52 = vpop.f32.mrb[7].mxu1  ;;  %2693 = vmatmul.mubr.msk.bf16.vlgmr.msra.gmra.mrb[8].mxu0 %vm852_vm2, %v963_v49 }
 0x3e4   : > { %2704 = vmatprep.mubr.msk.bf16.mxu0 %vm2928_vm0, %v2927_v1 }
 0x3e8   : > { %v1056_v53 = vpop.f32.mrb[8].mxu1 }
 0x3e9   : > { %v1062_v54 = vmul.f32 0.35355338, %v1056_v53  ;;  %v2700_v55 = vpop.f32.mrb[9].mxu1 }
 0x3ea   : > { %v1059_v56 = vpop.f32.mrb[10].mxu1 }
 0x3eb   : > { %v2701_v57 = vpop.f32.mrb[11].mxu1  ;;  %v1063_v58 = vsel %vm707_vm4, %v1062_v54, -1e+30  ;;  %v841_v54 = vld [vmem:[%s3474_s0 + $0x8] sm:$0xf] }
 0x3ec   : > { %v1064_v59 = vsel %vm852_vm2, %v1063_v58, -inf  ;;  %v1289_v55 = vsel %vm919_vm3, %v841_v54, 0 }
 0x3ed   : > { %1065 = vmax.xlane.f32.xlu1 %v1064_v59 }
 0x3fe   : > { %1076 = vrot.lane.b32.xlu1 %v3105_v16, %s3460_s23 }
 0x402   : > { %1172 = vrot.lane.b32.xlu1 %v3112_v21, %s3458_s1 }
 0x47a   : > { %v1066_v60 = vpop.xlane.xlu1 %1065 }
 0x47b   : > { %v1067_v61 = vsub.f32 %v1063_v58, %v1066_v60 }
 0x47d   : > { %v1068_v62 = vmul.f32 1.442695, %v1067_v61 }
 0x47e   : > { %v1077_v63 = vpop.permute.xlu1 %1076 }
 0x47f   : > { %2887 = vpow2.f32 %v1068_v62  ;;  %v1082_v0 = vsel %vm919_vm3, %v1077_v63, 0 }
 0x480   : > { %2703 = vmatpush3.bf16.msra.mxu0 %v1082_v0 }
 0x481   : > { %2714 = vmatprep.subr.bf16.mxu0 %v2927_v1 }
 0x482   : > { %v1173_v15 = vpop.permute.xlu1 %1172 }
 0x489   : > { %v2888_v2 = vpop.eup %2887 }
 0x48a   : > { %v1070_v3 = vsel %vm852_vm2, %v2888_v2, 0.0 }
 0x48b   : > { %1071 = vadd.xlane.f32.xlu0 %v1070_v3 }
 0x4a1   : > { %1174 = vrot.lane.b32.xlu0 %v3105_v16, %s3458_s1 }
 0x4b6   : > { %v1004_v4 = vpop.f32.mrb[8].mxu0 }
 0x4b7   : > { %v2694_v6 = vpop.f32.mrb[9].mxu0 }
 0x4b8   : > { %v1007_v7 = vpop.f32.mrb[10].mxu0 }
 0x4b9   : > { %v2695_v8 = vpop.f32.mrb[11].mxu0 }
 0x518   : > { %v1072_v9 = vpop.xlane.xlu0 %1071 }
 0x519   : > { %2889 = vrcp.f32 %v1072_v9 }
 0x51c   : > { %v1175_v12 = vpop.permute.xlu0 %1174 }
 0x51d   : > { %v1180_v14 = vsel %vm852_vm2, %v1175_v12, 0 }
 0x523   : > { %v2890_v10 = vpop.eup %2889 }
 0x524   : > { %v1074_v11 = vmul.f32 %v2890_v10, %v2888_v2 }
 0x526   : > { %v1075_v13 = vpack.c.bf16 %v1074_v11, %v1074_v11 }
 0x528   : > { %2705 = vmatmul.mubr.msk.bf16.vlgmr.msra.gmra.mrb[12].mxu0 %vm852_vm2, %v1075_v13 }
 0x529   : > { %2715 = vmatpush3.bf16.xpose.msra.mxu0 %v1180_v14  ;;  %2716 = vmatprep.mubr.msk.bf16.mxu0 %vm2928_vm0, %v2927_v1 }
 0x52a   : > { %2726 = vmatprep.subr.bf16.mxu0 %v2927_v1 }
 0x530   : > { %2717 = vmatmul.mubr.msk.bf16.vlgmr.msra.gmra.mrb[16].mxu0 %vm852_vm2, %v1173_v15 }
 0x531   : > { %2728 = vmatprep.mubr.msk.bf16.mxu0 %vm2928_vm0, %v2927_v1  ;;  %2727 = vmatpush3.bf16.msra.mxu0 %v1289_v55 }
 0x532   : > { %2738 = vmatprep.subr.bf16.mxu0 %v2927_v1 }
 0x5fb   : > { %v1118_v19 = vpop.f32.mrb[12].mxu0 }
 0x5fc   : > { %v1124_v20 = vpack.c.bf16 %v1118_v19, %v1118_v19  ;;  %v2706_v22 = vpop.f32.mrb[13].mxu0 }
 0x5fd   : > { %v1121_v23 = vpop.f32.mrb[14].mxu0 }
 0x5fe   : > { %v2707_v24 = vpop.f32.mrb[15].mxu0  ;;  %2711 = vmatmul.mubr.msk.bf16.vlgmr.msra.gmra.mrb[12].mxu1 %vm852_vm2, %v1124_v20 }
 0x5ff   : > { %2722 = vmatprep.mubr.msk.bf16.mxu1 %vm2928_vm0, %v2927_v1  ;;  %v2875_v24 = vld [vmem:[%s3437_s10] sm:$0xff]  }
 0x603   : > { %v1216_v27 = vpop.f32.mrb[16].mxu0 }
 0x604   : > { %v1222_v28 = vmul.f32 0.35355338, %v1216_v27  ;;  %v2718_v29 = vpop.f32.mrb[17].mxu0 }
 0x605   : > { %v1219_v30 = vpop.f32.mrb[18].mxu0 }
 0x606   : > { %v2719_v31 = vpop.f32.mrb[19].mxu0  ;;  %v1223_v32 = vsel %vm707_vm4, %v1222_v28, -1e+30 }
 0x607   : > { %v1224_v33 = vsel %vm852_vm2, %v1223_v32, -inf  ;;  %v2876_v31 = vld [vmem:[%s3437_s10 + $0x8] sm:$0xff]  }
 0x608   : > { %1225 = vmax.xlane.f32.xlu1 %v1224_v33 }
 0x619   : > { %1236 = vrot.lane.b32.xlu1 %v3105_v16, %s3457_s25  ;;  %s3475_s25 = sld [smem:[#allocation3_spill]] }
 0x61d   : > { %1332 = vrot.lane.b32.xlu1 %v3112_v21, %s3455_s29  ;;  %v2547_v21 = vld [vmem:[%s3434_s7] ss:$0 sm:$0xff] }
 0x61e   : > { %v1010_v41 = vadd.f32 %v2547_v21, %v1004_v4 }
 0x61f   : > { %s694_s1 = scalar_lea.vmem %s3475_s25, %s2595_s6  ;;  %s3477_s25 = smov 88  }
 0x620   : > { %v702_v33 = vld [vmem:[%s694_s1 + $0x8] sm:$0xff] }
 0x695   : > { %v1226_v34 = vpop.xlane.xlu1 %1225 }
 0x696   : > { %v1227_v35 = vsub.f32 %v1223_v32, %v1226_v34  ;;  %v701_v32 = vld [vmem:[%s694_s1] sm:$0xff]  ;;  %s3482_s1 = sshll.u32 %s3484_s28, 3 }
 0x697   : > { %v1560_v34 = vpack.c.bf16 %v702_v33, %v701_v32  ;;  %s698_s6 = scalar_lea.vmem %s3449_s22, %s3482_s1 }
 0x698   : > { %v1228_v36 = vmul.f32 1.442695, %v1227_v35  ;;  %v2877_v35 = vld [vmem:[%s3435_s8] sm:$0xff]  }
 0x699   : > { %v1237_v37 = vpop.permute.xlu1 %1236 }
 0x69a   : > { %2891 = vpow2.f32 %v1228_v36  ;;  %v1242_v38 = vsel %vm919_vm3, %v1237_v37, 0  ;;  %v2878_v36 = vld [vmem:[%s3435_s8 + $0x8] sm:$0xff]  }
 0x69b   : > { %2721 = vmatpush3.bf16.msra.mxu1 %v1242_v38 }
 0x69c   : > { %2732 = vmatprep.subr.bf16.mxu1 %v2927_v1 }
 0x69d   : > { %v1333_v53 = vpop.permute.xlu1 %1332 }
 0x6a4   : > { %v2892_v39 = vpop.eup %2891 }
 0x6a5   : > { %v1230_v40 = vsel %vm852_vm2, %v2892_v39, 0.0 }
 0x6a6   : > { %1231 = vadd.xlane.f32.xlu0 %v1230_v40 }
 0x6bc   : > { %1334 = vrot.lane.b32.xlu0 %v3105_v16, %s3455_s29  ;;  %s3479_s29 = smov 80  }
 0x6d1   : > { %v1165_v42 = vpop.f32.mrb[12].mxu1 }
 0x6d2   : > { %v1171_v43 = vadd.f32 %v1165_v42, %v1010_v41  ;;  %v2712_v44 = vpop.f32.mrb[13].mxu1 }
 0x6d3   : > { %v1168_v45 = vpop.f32.mrb[14].mxu1 }
 0x6d4   : > { %v2713_v46 = vpop.f32.mrb[15].mxu1 }
 0x733   : > { %v1232_v47 = vpop.xlane.xlu0 %1231 }
 0x734   : > { %2893 = vrcp.f32 %v1232_v47 }
 0x737   : > { %v1335_v50 = vpop.permute.xlu0 %1334 }
 0x738   : > { %v1340_v52 = vsel %vm852_vm2, %v1335_v50, 0 }
 0x73e   : > { %v2894_v48 = vpop.eup %2893 }
 0x73f   : > { %v1234_v49 = vmul.f32 %v2894_v48, %v2892_v39 }
 0x741   : > { %v1235_v51 = vpack.c.bf16 %v1234_v49, %v1234_v49 }
 0x743   : > { %2723 = vmatmul.mubr.msk.bf16.vlgmr.msra.gmra.mrb[16].mxu1 %vm852_vm2, %v1235_v51  ;;  %v2560_v51 = vld [vmem:[%s3436_s9] ss:$0 sm:$0xff] }
 0x744   : > { %2733 = vmatpush3.bf16.xpose.msra.mxu1 %v1340_v52  ;;  %2734 = vmatprep.mubr.msk.bf16.mxu1 %vm2928_vm0, %v2927_v1 }
 0x745   : > { %2744 = vmatprep.subr.bf16.mxu1 %v2927_v1 }
 0x74b   : > { %2735 = vmatmul.mubr.msk.bf16.vlgmr.msra.gmra.mrb[20].mxu1 %vm852_vm2, %v1333_v53 }
 0x74c   : > { %2746 = vmatprep.mubr.msk.bf16.mxu1 %vm2928_vm0, %v2927_v1 }
 0x816   : > { %v1278_v56 = vpop.f32.mrb[16].mxu1 }
 0x817   : > { %v1284_v57 = vpack.c.bf16 %v1278_v56, %v1278_v56  ;;  %v2724_v58 = vpop.f32.mrb[17].mxu1 }
 0x818   : > { %v1281_v59 = vpop.f32.mrb[18].mxu1 }
 0x819   : > { %v2725_v60 = vpop.f32.mrb[19].mxu1  ;;  %2729 = vmatmul.mubr.msk.bf16.vlgmr.msra.gmra.mrb[20].mxu0 %vm852_vm2, %v1284_v57 }
 0x81a   : > { %2740 = vmatprep.mubr.msk.bf16.mxu0 %vm2928_vm0, %v2927_v1 }
 0x81e   : > { %v1376_v61 = vpop.f32.mrb[20].mxu1 }
 0x81f   : > { %v1382_v62 = vmul.f32 0.35355338, %v1376_v61  ;;  %v2736_v63 = vpop.f32.mrb[21].mxu1 }
 0x820   : > { %v1379_v0 = vpop.f32.mrb[22].mxu1 }
 0x821   : > { %v2737_v2 = vpop.f32.mrb[23].mxu1  ;;  %v1383_v3 = vsel %vm707_vm4, %v1382_v62, -1e+30 }
 0x822   : > { %v1384_v4 = vsel %vm852_vm2, %v1383_v3, -inf }
 0x823   : > { %1385 = vmax.xlane.f32.xlu1 %v1384_v4 }
 0x834   : > { %1396 = vrot.lane.b32.xlu1 %v3105_v16, %s3454_s5  ;;  %v1449_v16 = vsel %vm919_vm3, %v842_v26, 0  ;;  %s3480_s5 = smov 104  }
 0x835   : > { %2745 = vmatpush3.bf16.msra.mxu1 %v1449_v16 }
 0x836   : > { %2758 = vmatprep.subr.bf16.mxu1 %v2927_v1 }
 0x8b0   : > { %v1386_v6 = vpop.xlane.xlu1 %1385 }
 0x8b1   : > { %v1387_v7 = vsub.f32 %v1383_v3, %v1386_v6 }
 0x8b3   : > { %v1388_v8 = vmul.f32 1.442695, %v1387_v7 }
 0x8b4   : > { %v1397_v9 = vpop.permute.xlu1 %1396 }
 0x8b5   : > { %2895 = vpow2.f32 %v1388_v8  ;;  %v1402_v10 = vsel %vm919_vm3, %v1397_v9, 0 }
 0x8b6   : > { %2739 = vmatpush3.bf16.msra.mxu0 %v1402_v10 }
 0x8b7   : > { %2750 = vmatprep.subr.bf16.mxu0 %v2927_v1 }
 0x8bf   : > { %v2896_v11 = vpop.eup %2895 }
 0x8c0   : > { %v1390_v25 = vsel %vm852_vm2, %v2896_v11, 0.0 }
 0x8c1   : > { %1391 = vadd.xlane.f32.xlu0 %v1390_v25 }
 0x8ec   : > { %v1325_v12 = vpop.f32.mrb[20].mxu0 }
 0x8ed   : > { %v1331_v13 = vadd.f32 %v1325_v12, %v1171_v43  ;;  %v2730_v14 = vpop.f32.mrb[21].mxu0  ;;  %v2564_v43 = vld [vmem:[%s3438_s11] ss:$0 sm:$0xff] }
 0x8ee   : > { %v1328_v15 = vpop.f32.mrb[22].mxu0  ;;  %v1628_v12 = vld [vmem:[%s3439_s12] sm:$0xf] }
 0x8ef   : > { %v2731_v17 = vpop.f32.mrb[23].mxu0 }
 0x94e   : > { %v1392_v18 = vpop.xlane.xlu0 %1391 }
 0x94f   : > { %2897 = vrcp.f32 %v1392_v18 }
 0x959   : > { %v2898_v19 = vpop.eup %2897 }
 0x95a   : > { %v1394_v20 = vmul.f32 %v2898_v19, %v2896_v11 }
 0x95c   : > { %v1395_v22 = vpack.c.bf16 %v1394_v20, %v1394_v20 }
 0x95e   : > { %2741 = vmatmul.mubr.msk.bf16.vlgmr.msra.gmra.mrb[24].mxu0 %vm852_vm2, %v1395_v22 }
 0x95f   : > { %2754 = vmatprep.mubr.msk.bf16.mxu0 %vm2928_vm0, %v2927_v1  ;;  %2751 = vmatpush3.bf16.msra.mxu0 %v2877_v35 }
 0x960   : > { %2752 = vmatprep.subr.bf16.mxu0 %v2927_v1 }
 0x963   : > { %2753 = vmatpush3.bf16.msra.mxu0 %v2878_v36 }
 0x964   : > { %2766 = vmatprep.subr.bf16.mxu0 %v2927_v1 }
 0xa31   : > { %v1438_v23 = vpop.f32.mrb[24].mxu0 }
 0xa32   : > { %v1444_v27 = vpack.c.bf16 %v1438_v23, %v1438_v23  ;;  %v2742_v28 = vpop.f32.mrb[25].mxu0 }
 0xa33   : > { %v1441_v29 = vpop.f32.mrb[26].mxu0 }
 0xa34   : > { %v2743_v30 = vpop.f32.mrb[27].mxu0  ;;  %2747 = vmatmul.mubr.msk.bf16.vlgmr.msra.gmra.mrb[24].mxu1 %vm852_vm2, %v1444_v27 }
 0xa35   : > { %2759 = vmatpush3.bf16.msra.mxu1 %v2875_v24  ;;  %2762 = vmatprep.mubr.msk.bf16.mxu1 %vm2928_vm0, %v2927_v1 }
 0xa36   : > { %2760 = vmatprep.subr.bf16.mxu1 %v2927_v1 }
 0xa39   : > { %2761 = vmatpush3.bf16.msra.mxu1 %v2876_v31 }
 0xa3a   : > { %2772 = vmatprep.subr.bf16.mxu1 %v2927_v1 }
 0xa3c   : > { %2763 = vmatmul.mubr.msk.bf16.vlgmr.msra.gmra.mrb[28].mxu1 %vm732_vm1, %v1560_v34 }
 0xa3d   : > { %2774 = vmatprep.mubr.msk.bf16.mxu1 %vm2928_vm0, %v2927_v1 }
 0xb07   : > { %v1485_v37 = vpop.f32.mrb[24].mxu1 }
 0xb08   : > { %v1491_v38 = vadd.f32 %v1485_v37, %v1331_v13  ;;  %v2748_v39 = vpop.f32.mrb[25].mxu1  ;;  %v1753_v13 = vsel %vm919_vm3, %v1628_v12, 0 }
 0xb09   : > { %v1488_v40 = vpop.f32.mrb[26].mxu1 }
 0xb0a   : > { %v3256_v21 = vadd.f32 %v1491_v38, %v3088_v5  ;;  %v2749_v41 = vpop.f32.mrb[27].mxu1 }
 0xb0c   : > { %v1493_v42 = vpack.c.bf16 %v3256_v21, %v3256_v21 }
 0xb0e   : > { %2755 = vmatmul.mubr.msk.bf16.vlgmr.msra.gmra.mrb[28].mxu0 %vm732_vm1, %v1493_v42 }
 0xb0f   : > { %v1621_v44 = vpop.f32.mrb[28].mxu1  ;;  %2768 = vmatprep.mubr.msk.bf16.mxu0 %vm2928_vm0, %v2927_v1 }
 0xb10   : > { %v1622_v45 = vadd.f32 %v2564_v43, %v1621_v44  ;;  %v2764_v46 = vpop.f32.mrb[29].mxu1 }
 0xb11   : > { %v1624_v47 = vpop.f32.mrb[30].mxu1  ;;  %v1629_v46 = vld [vmem:[%s3439_s12 + $0x4] sm:$0xf] }
 0xb12   : > { %v1625_v48 = vadd.f32 %v2564_v43, %v1624_v47  ;;  %v2765_v5 = vpop.f32.mrb[31].mxu1  ;;  %v1911_v47 = vsel %vm919_vm3, %v1629_v46, 0 }
 0xb14   : > { %v3266_v49 = vpack.c.bf16 %v1625_v48, %v1622_v45 }
 0xb16   : > { %1799 = vrot.lane.b32.xlu1 %v3266_v49, %s2930_s27  ;;  %v1645_v50 = vsel %vm852_vm2, %v3266_v49, 0 }
 0xb17   : > { %2767 = vmatpush3.bf16.xpose.msra.mxu0 %v1645_v50 }
 0xb18   : > { %2778 = vmatprep.subr.bf16.mxu0 %v2927_v1 }
 0xb88   : > { %v1800_v11 = vpop.permute.xlu1 %1799 }
 0xb89   : > { %v1805_v26 = vsel %vm852_vm2, %v1800_v11, 0 }
 0xbe1   : > { %v1554_v52 = vpop.f32.mrb[28].mxu0 }
 0xbe2   : > { %v1555_v53 = vadd.f32 %v2560_v51, %v1554_v52  ;;  %v2756_v54 = vpop.f32.mrb[29].mxu0 }
 0xbe3   : > { %v1557_v55 = vpop.f32.mrb[30].mxu0 }
 0xbe4   : > { %v3276_v56 = vpack.c.bf16 %v1555_v53, %v1555_v53  ;;  %v2757_v57 = vpop.f32.mrb[31].mxu0 }
 0xbe6   : > { %1797 = vrot.lane.b32.xlu1 %v3276_v56, %s2930_s27  ;;  %2769 = vmatmul.mubr.msk.bf16.vlgmr.msra.gmra.mrb[32].mxu0 %vm852_vm2, %v3276_v56  ;;  %s3476_s27 = smov 96  }
 0xbe7   : > { %2780 = vmatprep.mubr.msk.bf16.mxu0 %vm2928_vm0, %v2927_v1  ;;  %2779 = vmatpush3.bf16.msra.mxu0 %v1753_v13 }
 0xbe8   : > { %2790 = vmatprep.subr.bf16.mxu0 %v2927_v1 }
 0xc58   : > { %v1798_v16 = vpop.permute.xlu1 %1797 }
 0xcb9   : > { %v1681_v58 = vpop.f32.mrb[32].mxu0 }
 0xcba   : > { %v1687_v59 = vmul.f32 0.35355338, %v1681_v58  ;;  %v2770_v60 = vpop.f32.mrb[33].mxu0 }
 0xcbb   : > { %v1684_v61 = vpop.f32.mrb[34].mxu0 }
 0xcbc   : > { %v2771_v62 = vpop.f32.mrb[35].mxu0  ;;  %v1689_v63 = vsel %vm1688_vm5, %v1687_v59, -inf }
 0xcbd   : > { %1690 = vmax.xlane.f32.xlu0 %v1689_v63 }
 0xd4a   : > { %v1691_v0 = vpop.xlane.xlu0 %1690 }
 0xd4b   : > { %v1692_v2 = vsub.f32 %v1687_v59, %v1691_v0 }
 0xd4d   : > { %v1693_v3 = vmul.f32 1.442695, %v1692_v2 }
 0xd4f   : > { %2899 = vpow2.f32 %v1693_v3  ;;  %v2568_v3 = vld [vmem:[%s3440_s13] ss:$0 sm:$0xff] }
 0xd59   : > { %v2900_v4 = vpop.eup %2899 }
 0xd5a   : > { %v1695_v6 = vsel %vm1688_vm5, %v2900_v4, 0.0 }
 0xd5b   : > { %1696 = vadd.xlane.f32.xlu0 %v1695_v6 }
 0xd71   : > { %1702 = vrot.lane.b32.xlu0 %v3266_v49, %s3476_s27 }
 0xde8   : > { %v1697_v7 = vpop.xlane.xlu0 %1696 }
 0xde9   : > { %2901 = vrcp.f32 %v1697_v7 }
 0xdec   : > { %v1703_v8 = vpop.permute.xlu0 %1702 }
 0xded   : > { %2773 = vmatpush3.bf16.msra.mxu1 %v1703_v8 }
 0xdee   : > { %2784 = vmatprep.subr.bf16.mxu1 %v2927_v1 }
 0xdf3   : > { %v2902_v9 = vpop.eup %2901 }
 0xdf4   : > { %v1699_v10 = vmul.f32 %v2902_v9, %v2900_v4 }
 0xdf6   : > { %v1700_v25 = vpack.c.bf16 %v1699_v10, %v1699_v10 }
 0xdf8   : > { %2775 = vmatmul.mubr.msk.bf16.vlgmr.msra.gmra.mrb[32].mxu1 %vm1688_vm5, %v1700_v25 }
 0xdf9   : > { %2785 = vmatpush3.bf16.xpose.msra.mxu1 %v1805_v26  ;;  %2786 = vmatprep.mubr.msk.bf16.mxu1 %vm2928_vm0, %v2927_v1 }
 0xdfa   : > { %2796 = vmatprep.subr.bf16.mxu1 %v2927_v1 }
 0xe00   : > { %2787 = vmatmul.mubr.msk.bf16.vlgmr.msra.gmra.mrb[36].mxu1 %vm852_vm2, %v1798_v16 }
 0xe01   : > { %2798 = vmatprep.mubr.msk.bf16.mxu1 %vm2928_vm0, %v2927_v1  ;;  %2797 = vmatpush3.bf16.msra.mxu1 %v1911_v47 }
 0xe02   : > { %2808 = vmatprep.subr.bf16.mxu1 %v2927_v1 }
 0xecb   : > { %v1742_v14 = vpop.f32.mrb[32].mxu1 }
 0xecc   : > { %v1748_v15 = vpack.c.bf16 %v1742_v14, %v1742_v14  ;;  %v2776_v17 = vpop.f32.mrb[33].mxu1  ;;  %v1630_v14 = vld [vmem:[%s3439_s12 + $0x8] sm:$0xf] }
 0xecd   : > { %v1745_v18 = vpop.f32.mrb[34].mxu1 }
 0xece   : > { %v2777_v19 = vpop.f32.mrb[35].mxu1  ;;  %2781 = vmatmul.mubr.msk.bf16.vlgmr.msra.gmra.mrb[36].mxu0 %vm852_vm2, %v1748_v15  ;;  %v2068_v15 = vsel %vm919_vm3, %v1630_v14, 0 }
 0xecf   : > { %2792 = vmatprep.mubr.msk.bf16.mxu0 %vm2928_vm0, %v2927_v1 }
 0xed3   : > { %v1841_v20 = vpop.f32.mrb[36].mxu1 }
 0xed4   : > { %v1847_v22 = vmul.f32 0.35355338, %v1841_v20  ;;  %v2788_v23 = vpop.f32.mrb[37].mxu1 }
 0xed5   : > { %v1844_v24 = vpop.f32.mrb[38].mxu1 }
 0xed6   : > { %v2789_v27 = vpop.f32.mrb[39].mxu1  ;;  %v1848_v28 = vsel %vm1688_vm5, %v1847_v22, -inf }
 0xed7   : > { %1849 = vmax.xlane.f32.xlu1 %v1848_v28 }
 0xee8   : > { %1860 = vrot.lane.b32.xlu1 %v3266_v49, %s3477_s25  ;;  %s3481_s25 = smov 72  }
 0xeec   : > { %1954 = vrot.lane.b32.xlu1 %v3276_v56, %s3478_s2 }
 0xf64   : > { %v1850_v29 = vpop.xlane.xlu1 %1849 }
 0xf65   : > { %v1851_v30 = vsub.f32 %v1847_v22, %v1850_v29 }
 0xf67   : > { %v1852_v31 = vmul.f32 1.442695, %v1851_v30 }
 0xf68   : > { %v1861_v32 = vpop.permute.xlu1 %1860 }
 0xf69   : > { %2903 = vpow2.f32 %v1852_v31  ;;  %2791 = vmatpush3.bf16.msra.mxu0 %v1861_v32 }
 0xf6a   : > { %2802 = vmatprep.subr.bf16.mxu0 %v2927_v1 }
 0xf6c   : > { %v1955_v45 = vpop.permute.xlu1 %1954 }
 0xf73   : > { %v2904_v33 = vpop.eup %2903 }
 0xf74   : > { %v1854_v34 = vsel %vm1688_vm5, %v2904_v33, 0.0 }
 0xf75   : > { %1855 = vadd.xlane.f32.xlu0 %v1854_v34 }
 0xf8b   : > { %1956 = vrot.lane.b32.xlu0 %v3266_v49, %s3478_s2 }
 0xfa1   : > { %v1789_v35 = vpop.f32.mrb[36].mxu0 }
 0xfa2   : > { %v2782_v36 = vpop.f32.mrb[37].mxu0 }
 0xfa3   : > { %v1792_v37 = vpop.f32.mrb[38].mxu0 }
 0xfa4   : > { %v2783_v38 = vpop.f32.mrb[39].mxu0  ;;  %v1631_v37 = vld [vmem:[%s3439_s12 + $0xc] sm:$0xf] }
 0xfa5   : > { %v2225_v38 = vsel %vm919_vm3, %v1631_v37, 0 }
0x1002   : > { %v1856_v39 = vpop.xlane.xlu0 %1855 }
0x1003   : > { %2905 = vrcp.f32 %v1856_v39 }
0x1006   : > { %v1957_v42 = vpop.permute.xlu0 %1956 }
0x1007   : > { %v1962_v44 = vsel %vm852_vm2, %v1957_v42, 0 }
0x100d   : > { %v2906_v40 = vpop.eup %2905 }
0x100e   : > { %v1858_v41 = vmul.f32 %v2906_v40, %v2904_v33 }
0x1010   : > { %v1859_v43 = vpack.c.bf16 %v1858_v41, %v1858_v41 }
0x1012   : > { %2793 = vmatmul.mubr.msk.bf16.vlgmr.msra.gmra.mrb[40].mxu0 %vm1688_vm5, %v1859_v43 }
0x1013   : > { %2803 = vmatpush3.bf16.xpose.msra.mxu0 %v1962_v44  ;;  %2804 = vmatprep.mubr.msk.bf16.mxu0 %vm2928_vm0, %v2927_v1 }
0x1014   : > { %2814 = vmatprep.subr.bf16.mxu0 %v2927_v1 }
0x101a   : > { %2805 = vmatmul.mubr.msk.bf16.vlgmr.msra.gmra.mrb[44].mxu0 %vm852_vm2, %v1955_v45 }
0x101b   : > { %2816 = vmatprep.mubr.msk.bf16.mxu0 %vm2928_vm0, %v2927_v1  ;;  %2815 = vmatpush3.bf16.msra.mxu0 %v2068_v15 }
0x101c   : > { %2826 = vmatprep.subr.bf16.mxu0 %v2927_v1 }
0x10e5   : > { %v1900_v48 = vpop.f32.mrb[40].mxu0 }
0x10e6   : > { %v1906_v5 = vpack.c.bf16 %v1900_v48, %v1900_v48  ;;  %v2794_v50 = vpop.f32.mrb[41].mxu0 }
0x10e7   : > { %v1903_v51 = vpop.f32.mrb[42].mxu0 }
0x10e8   : > { %v2795_v52 = vpop.f32.mrb[43].mxu0  ;;  %2799 = vmatmul.mubr.msk.bf16.vlgmr.msra.gmra.mrb[40].mxu1 %vm852_vm2, %v1906_v5 }
0x10e9   : > { %2810 = vmatprep.mubr.msk.bf16.mxu1 %vm2928_vm0, %v2927_v1 }
0x10ed   : > { %v1998_v53 = vpop.f32.mrb[44].mxu0 }
0x10ee   : > { %v2004_v54 = vmul.f32 0.35355338, %v1998_v53  ;;  %v2806_v55 = vpop.f32.mrb[45].mxu0 }
0x10ef   : > { %v2001_v57 = vpop.f32.mrb[46].mxu0 }
0x10f0   : > { %v2807_v58 = vpop.f32.mrb[47].mxu0  ;;  %v2005_v59 = vsel %vm1688_vm5, %v2004_v54, -inf }
0x10f1   : > { %2006 = vmax.xlane.f32.xlu1 %v2005_v59 }
0x1102   : > { %2017 = vrot.lane.b32.xlu1 %v3266_v49, %s3479_s29 }
0x1106   : > { %2111 = vrot.lane.b32.xlu1 %v3276_v56, %s3480_s5  ;;  %v1795_v56 = vadd.f32 %v2568_v3, %v1789_v35 }
0x117e   : > { %v2007_v60 = vpop.xlane.xlu1 %2006 }
0x117f   : > { %v2008_v61 = vsub.f32 %v2004_v54, %v2007_v60 }
0x1181   : > { %v2009_v62 = vmul.f32 1.442695, %v2008_v61 }
0x1182   : > { %v2018_v63 = vpop.permute.xlu1 %2017 }
0x1183   : > { %2907 = vpow2.f32 %v2009_v62  ;;  %2809 = vmatpush3.bf16.msra.mxu1 %v2018_v63 }
0x1184   : > { %2820 = vmatprep.subr.bf16.mxu1 %v2927_v1 }
0x1186   : > { %v2112_v13 = vpop.permute.xlu1 %2111 }
0x118d   : > { %v2908_v0 = vpop.eup %2907 }
0x118e   : > { %v2011_v2 = vsel %vm1688_vm5, %v2908_v0, 0.0 }
0x118f   : > { %2012 = vadd.xlane.f32.xlu0 %v2011_v2  ;;  %v2879_v2 = vld [vmem:[%s3443_s16] sm:$0xff]  }
0x11a5   : > { %2113 = vrot.lane.b32.xlu0 %v3266_v49, %s3480_s5 }
0x11bb   : > { %v1947_v4 = vpop.f32.mrb[40].mxu1 }
0x11bc   : > { %v1953_v6 = vadd.f32 %v1947_v4, %v1795_v56  ;;  %v2800_v7 = vpop.f32.mrb[41].mxu1 }
0x11bd   : > { %v1950_v8 = vpop.f32.mrb[42].mxu1  ;;  %v2581_v7 = vld [vmem:[%s3441_s14] ss:$0 sm:$0xff] }
0x11be   : > { %v2801_v9 = vpop.f32.mrb[43].mxu1 }
0x11bf   : > { %v2582_v9 = vld [vmem:[%s3442_s15] ss:$0 sm:$0xff] }
0x121c   : > { %v2013_v10 = vpop.xlane.xlu0 %2012 }
0x121d   : > { %2909 = vrcp.f32 %v2013_v10 }
0x1220   : > { %v2114_v26 = vpop.permute.xlu0 %2113 }
0x1221   : > { %v2119_v12 = vsel %vm852_vm2, %v2114_v26, 0  ;;  %v2583_v26 = vld [vmem:[%s3444_s17] ss:$0 sm:$0xff] }
0x1227   : > { %v2910_v11 = vpop.eup %2909 }
0x1228   : > { %v2015_v25 = vmul.f32 %v2910_v11, %v2908_v0 }
0x122a   : > { %v2016_v16 = vpack.c.bf16 %v2015_v25, %v2015_v25 }
0x122c   : > { %2811 = vmatmul.mubr.msk.bf16.vlgmr.msra.gmra.mrb[44].mxu1 %vm1688_vm5, %v2016_v16 }
0x122d   : > { %2821 = vmatpush3.bf16.xpose.msra.mxu1 %v2119_v12  ;;  %2822 = vmatprep.mubr.msk.bf16.mxu1 %vm2928_vm0, %v2927_v1 }
0x122e   : > { %2832 = vmatprep.subr.bf16.mxu1 %v2927_v1 }
0x1234   : > { %2823 = vmatmul.mubr.msk.bf16.vlgmr.msra.gmra.mrb[48].mxu1 %vm852_vm2, %v2112_v13 }
0x1235   : > { %2834 = vmatprep.mubr.msk.bf16.mxu1 %vm2928_vm0, %v2927_v1  ;;  %2833 = vmatpush3.bf16.msra.mxu1 %v2225_v38 }
0x1236   : > { %2846 = vmatprep.subr.bf16.mxu1 %v2927_v1 }
0x12ff   : > { %v2057_v17 = vpop.f32.mrb[44].mxu1 }
0x1300   : > { %v2063_v18 = vpack.c.bf16 %v2057_v17, %v2057_v17  ;;  %v2812_v19 = vpop.f32.mrb[45].mxu1 }
0x1301   : > { %v2060_v20 = vpop.f32.mrb[46].mxu1 }
0x1302   : > { %v2813_v22 = vpop.f32.mrb[47].mxu1  ;;  %2817 = vmatmul.mubr.msk.bf16.vlgmr.msra.gmra.mrb[48].mxu0 %vm852_vm2, %v2063_v18 }
0x1303   : > { %2828 = vmatprep.mubr.msk.bf16.mxu0 %vm2928_vm0, %v2927_v1 }
0x1307   : > { %v2155_v23 = vpop.f32.mrb[48].mxu1 }
0x1308   : > { %v2161_v24 = vmul.f32 0.35355338, %v2155_v23  ;;  %v2824_v27 = vpop.f32.mrb[49].mxu1 }
0x1309   : > { %v2158_v28 = vpop.f32.mrb[50].mxu1  ;;  %v2881_v27 = vld [vmem:[%s3447_s20] sm:$0xff]  }
0x130a   : > { %v2825_v29 = vpop.f32.mrb[51].mxu1  ;;  %v2162_v30 = vsel %vm1688_vm5, %v2161_v24, -inf  ;;  %v2882_v28 = vld [vmem:[%s3447_s20 + $0x8] sm:$0xff]  }
0x130b   : > { %2163 = vmax.xlane.f32.xlu1 %v2162_v30 }
0x131c   : > { %2174 = vrot.lane.b32.xlu1 %v3266_v49, %s3481_s25 }
0x1398   : > { %v2164_v31 = vpop.xlane.xlu1 %2163 }
0x1399   : > { %v2165_v32 = vsub.f32 %v2161_v24, %v2164_v31 }
0x139b   : > { %v2166_v33 = vmul.f32 1.442695, %v2165_v32 }
0x139c   : > { %v2175_v34 = vpop.permute.xlu1 %2174 }
0x139d   : > { %2911 = vpow2.f32 %v2166_v33  ;;  %2827 = vmatpush3.bf16.msra.mxu0 %v2175_v34  ;;  %v2587_v33 = vld [vmem:[%s3445_s18] ss:$0 sm:$0xff] }
0x139e   : > { %2838 = vmatprep.subr.bf16.mxu0 %v2927_v1 }
0x13a7   : > { %v2912_v35 = vpop.eup %2911 }
0x13a8   : > { %v2168_v36 = vsel %vm1688_vm5, %v2912_v35, 0.0 }
0x13a9   : > { %2169 = vadd.xlane.f32.xlu0 %v2168_v36 }
0x13d5   : > { %v2104_v49 = vpop.f32.mrb[48].mxu0 }
0x13d6   : > { %v2110_v39 = vadd.f32 %v2104_v49, %v1953_v6  ;;  %v2818_v40 = vpop.f32.mrb[49].mxu0 }
0x13d7   : > { %v2107_v41 = vpop.f32.mrb[50].mxu0 }
0x13d8   : > { %v2819_v42 = vpop.f32.mrb[51].mxu0 }
0x1436   : > { %v2170_v43 = vpop.xlane.xlu0 %2169 }
0x1437   : > { %2913 = vrcp.f32 %v2170_v43 }
0x1441   : > { %v2914_v44 = vpop.eup %2913 }
0x1442   : > { %v2172_v45 = vmul.f32 %v2914_v44, %v2912_v35  ;;  %v2588_v35 = vld [vmem:[%s3446_s19] ss:$0 sm:$0xff] }
0x1444   : > { %v2173_v46 = vpack.c.bf16 %v2172_v45, %v2172_v45 }
0x1446   : > { %2829 = vmatmul.mubr.msk.bf16.vlgmr.msra.gmra.mrb[52].mxu0 %vm1688_vm5, %v2173_v46 }
0x1447   : > { %2842 = vmatprep.mubr.msk.bf16.mxu0 %vm2928_vm0, %v2927_v1  ;;  %2839 = vmatpush3.bf16.msra.mxu0 %v2879_v2 }
0x1448   : > { %2840 = vmatprep.subr.bf16.mxu0 %v2927_v1 }
0x1519   : > { %v2214_v47 = vpop.f32.mrb[52].mxu0 }
0x151a   : > { %v2220_v48 = vpack.c.bf16 %v2214_v47, %v2214_v47  ;;  %v2830_v5 = vpop.f32.mrb[53].mxu0 }
0x151b   : > { %v2217_v50 = vpop.f32.mrb[54].mxu0 }
0x151c   : > { %v2831_v51 = vpop.f32.mrb[55].mxu0  ;;  %2835 = vmatmul.mubr.msk.bf16.vlgmr.msra.gmra.mrb[52].mxu1 %vm852_vm2, %v2220_v48 }
0x151d   : > { %2850 = vmatprep.mubr.msk.bf16.mxu1 %vm2928_vm0, %v2927_v1  ;;  %2847 = vmatpush3.bf16.msra.mxu1 %v2881_v27 }
0x151e   : > { %2848 = vmatprep.subr.bf16.mxu1 %v2927_v1  ;;  %v2589_v1 = vld [vmem:[%s3448_s21] ss:$0 sm:$0xff] }
0x1521   : > { %2849 = vmatpush3.bf16.msra.mxu1 %v2882_v28 }
0x15ef   : > { %v2261_v52 = vpop.f32.mrb[52].mxu1 }
0x15f0   : > { %v2267_v53 = vadd.f32 %v2261_v52, %v2110_v39  ;;  %v2836_v54 = vpop.f32.mrb[53].mxu1 }
0x15f1   : > { %v2264_v55 = vpop.f32.mrb[54].mxu1 }
0x15f2   : > { %v3375_v57 = vadd.f32 %v2267_v53, %v3256_v21  ;;  %v2837_v58 = vpop.f32.mrb[55].mxu1  ;;  %v2880_v21 = vld [vmem:[%s3443_s16 + $0x8] sm:$0xff]  }
0x15f3   : > { %2841 = vmatpush3.bf16.msra.mxu0 %v2880_v21 }
0x15f4   : > { %v2271_v59 = vsel %vm732_vm1, %v3375_v57, 0.0 }
0x15f5   : > { %2272 = vadd.xlane.f32.xlu0 %v2271_v59 }
0x1682   : > { %v2273_v60 = vpop.xlane.xlu0 %2272 }
0x1683   : > { %v2275_v61 = vmul.f32 0.03125, %v2273_v60 }
0x1685   : > { %v2276_v62 = vsub.f32 %v3375_v57, %v2275_v61 }
0x1687   : > { %v2277_v63 = vmul.f32 %v2276_v62, %v2276_v62 }
0x1689   : > { %v2278_v0 = vsel %vm732_vm1, %v2277_v63, 0.0 }
0x168a   : > { %2279 = vadd.xlane.f32.xlu0 %v2278_v0 }
0x1717   : > { %v2280_v3 = vpop.xlane.xlu0 %2279 }
0x1718   : > { %v2281_v56 = vmul.f32 0.03125, %v2280_v3 }
0x171a   : > { %v2282_v4 = vadd.f32 1e-05, %v2281_v56 }
0x171c   : > { %2915 = vrsqrt.f32 %v2282_v4 }
0x1726   : > { %v2916_v6 = vpop.eup %2915 }
0x1727   : > { %v2284_v8 = vmul.f32 %v2916_v6, %v2276_v62 }
0x1729   : > { %v2291_v10 = vmul.f32 %v2581_v7, %v2284_v8 }
0x172b   : > { %v2298_v11 = vadd.f32 %v2582_v9, %v2291_v10 }
0x172d   : > { %v2299_v25 = vpack.c.bf16 %v2298_v11, %v2298_v11 }
0x172f   : > { %2843 = vmatmul.mubr.msk.bf16.vlgmr.msra.gmra.mrb[56].mxu0 %vm732_vm1, %v2299_v25 }
0x1802   : > { %v2360_v16 = vpop.f32.mrb[56].mxu0 }
0x1803   : > { %v2361_v12 = vadd.f32 %v2583_v26, %v2360_v16  ;;  %v2844_v13 = vpop.f32.mrb[57].mxu0 }
0x1804   : > { %v2363_v14 = vpop.f32.mrb[58].mxu0 }
0x1805   : > { %v2366_v15 = vmax.f32 %v2361_v12, 0.0  ;;  %v2845_v17 = vpop.f32.mrb[59].mxu0 }
0x1807   : > { %v2369_v18 = vsel %vm732_vm1, %v2366_v15, 0.0 }
0x1808   : > { %2370 = vadd.xlane.f32.xlu0 %v2369_v18 }
0x1895   : > { %v2371_v19 = vpop.xlane.xlu0 %2370 }
0x1896   : > { %v2372_v20 = vmul.f32 0.03125, %v2371_v19 }
0x1898   : > { %v2373_v22 = vsub.f32 %v2366_v15, %v2372_v20 }
0x189a   : > { %v2374_v23 = vmul.f32 %v2373_v22, %v2373_v22 }
0x189c   : > { %v2375_v24 = vsel %vm732_vm1, %v2374_v23, 0.0 }
0x189d   : > { %2376 = vadd.xlane.f32.xlu0 %v2375_v24 }
0x192a   : > { %v2377_v29 = vpop.xlane.xlu0 %2376 }
0x192b   : > { %v2378_v30 = vmul.f32 0.03125, %v2377_v29 }
0x192d   : > { %v2379_v31 = vadd.f32 1e-05, %v2378_v30 }
0x192f   : > { %2917 = vrsqrt.f32 %v2379_v31 }
0x1939   : > { %v2918_v32 = vpop.eup %2917 }
0x193a   : > { %v2381_v34 = vmul.f32 %v2918_v32, %v2373_v22 }
0x193c   : > { %v2388_v36 = vmul.f32 %v2587_v33, %v2381_v34 }
0x193e   : > { %v2395_v37 = vadd.f32 %v2588_v35, %v2388_v36 }
0x1940   : > { %v2396_v38 = vpack.c.bf16 %v2395_v37, %v2395_v37 }
0x1942   : > { %2851 = vmatmul.mubr.msk.bf16.vlgmr.msra.gmra.mrb[56].mxu1 %vm732_vm1, %v2396_v38 }
0x1a15   : > { %v2457_v49 = vpop.f32.mrb[56].mxu1 }
0x1a16   : > { %v2458_v39 = vadd.f32 %v2589_v1, %v2457_v49  ;;  %v2852_v40 = vpop.f32.mrb[57].mxu1 }
0x1a17   : > { %v2460_v41 = vpop.f32.mrb[58].mxu1 }
0x1a18   : > { %v2463_v42 = vadd.f32 %v2458_v39, %v3375_v57  ;;  %v2853_v43 = vpop.f32.mrb[59].mxu1 }
0x1a1a   : > { %2464 = vst.msk [vmem:[%s698_s6] sm:$0xff] %vm732_vm1, %v2463_v42 }
0x1a1b PF: > { %s32_s3 = sadd.s32 1, %s2925_s3  }
0x1a1c   : > { %p29_p4 = scmp.ge.s32.totalorder %s32_s3, 6  }
0x1a1e   :  { %31 = sbr.rel (!%p29_p4) target bundleno = 8 (0x8), region = 141 }

// kernel: table_decoder_fwd.9
= control target key start
LH: loop header
LB: loop body
LE: loop exit
PB: predicated region body
PF: predicated region fallthrough
CT: control target
= control target key end

     0   :  { %vm27_vm0 = vcmask 261120   ;;  %s297_s0 = inlined_call_operand.vmem [shape: f32[32,32], index: 0, kind: input, shape index: {}]   ;;  %s298_s3 = inlined_call_operand.vmem [shape: bf16[32,128], index: 3, kind: input, shape index: {}]   ;;  %s299_s1 = inlined_call_operand.vmem [shape: f32[1,32], index: 1, kind: input, shape index: {}]   ;;  %s300_s2 = inlined_call_operand.vmem [shape: f32[1,32], index: 2, kind: input, shape index: {}]   ;;  %s301_s4 = inlined_call_operand.vmem [shape: f32[1,128], index: 4, kind: input, shape index: {}]   ;;  %s302_s5 = inlined_call_operand.vmem [shape: f32[32,128], index: 5, kind: output, shape index: {}]  }
   0x1   :  { %v21_v0 = vld [vmem:[%s297_s0] sm:$0xff]  ;;  %v23_v1 = vld [vmem:[%s297_s0 + $0x10] sm:$0xff]  ;;  %v22_v2 = vld [vmem:[%s297_s0 + $0x8] sm:$0xff] }
   0x2   :  { %v28_v3 = vsel %vm27_vm0, %v21_v0, 0.0  ;;  %v34_v4 = vsel %vm27_vm0, %v23_v1, 0.0  ;;  %v24_v5 = vld [vmem:[%s297_s0 + $0x18] sm:$0xff]  ;;  %v31_v6 = vsel %vm27_vm0, %v22_v2, 0.0  ;;  %v208_v28 = vld [vmem:[%s298_s3] sm:$0xff]   ;;  %v209_v29 = vld [vmem:[%s298_s3 + $0x8] sm:$0xff]  }
   0x3   :  { %29 = vadd.xlane.f32.xlu0 %v28_v3  ;;  %35 = vadd.xlane.f32.xlu1 %v34_v4  ;;  %v37_v7 = vsel %vm27_vm0, %v24_v5, 0.0  ;;  %v189_v44 = vld [vmem:[%s299_s1] ss:$0 sm:$0xff] }
   0x4   :  { %200 = vmatprep.subr.bf16.mxu0 %v208_v28  ;;  %v190_v50 = vld [vmem:[%s300_s2] ss:$0 sm:$0xff] }
   0x5   :  { %201 = vmatpush3.bf16.msra.mxu0 %v208_v28  ;;  %v191_v62 = vld [vmem:[%s301_s4] ss:$0 sm:$0xff] }
   0x6   :  { %202 = vmatprep.subr.bf16.mxu0 %v209_v29 }
   0x7   :  { %32 = vadd.xlane.f32.xlu0 %v31_v6  ;;  %38 = vadd.xlane.f32.xlu1 %v37_v7 }
   0x9   :  { %203 = vmatpush3.bf16.msra.mxu0 %v209_v29 }
  0x90   :  { %v30_v8 = vpop.xlane.xlu0 %29  ;;  %v36_v9 = vpop.xlane.xlu1 %35 }
  0x91   :  { %v41_v10 = vmul.f32 0.03125, %v30_v8  ;;  %v43_v11 = vmul.f32 0.03125, %v36_v9 }
  0x93   :  { %v45_v12 = vsub.f32 %v21_v0, %v41_v10  ;;  %v47_v13 = vsub.f32 %v23_v1, %v43_v11 }
  0x94   :  { %v33_v14 = vpop.xlane.xlu0 %32  ;;  %v39_v15 = vpop.xlane.xlu1 %38 }
  0x95   :  { %v42_v16 = vmul.f32 0.03125, %v33_v14  ;;  %v44_v17 = vmul.f32 0.03125, %v39_v15  ;;  %v49_v18 = vmul.f32 %v45_v12, %v45_v12  ;;  %v51_v19 = vmul.f32 %v47_v13, %v47_v13 }
  0x97   :  { %v46_v20 = vsub.f32 %v22_v2, %v42_v16  ;;  %v48_v21 = vsub.f32 %v24_v5, %v44_v17  ;;  %v53_v22 = vsel %vm27_vm0, %v49_v18, 0.0  ;;  %v59_v23 = vsel %vm27_vm0, %v51_v19, 0.0 }
  0x98   :  { %54 = vadd.xlane.f32.xlu0 %v53_v22 }
  0x99   :  { %v50_v24 = vmul.f32 %v46_v20, %v46_v20  ;;  %v52_v25 = vmul.f32 %v48_v21, %v48_v21 }
  0x9b   :  { %v56_v26 = vsel %vm27_vm0, %v50_v24, 0.0  ;;  %v62_v27 = vsel %vm27_vm0, %v52_v25, 0.0 }
  0x9c   :  { %60 = vadd.xlane.f32.xlu0 %v59_v23  ;;  %57 = vadd.xlane.f32.xlu1 %v56_v26 }
  0xa0   :  { %63 = vadd.xlane.f32.xlu1 %v62_v27 }
 0x125   :  { %v55_v30 = vpop.xlane.xlu0 %54 }
 0x126   :  { %v65_v31 = vmul.f32 0.03125, %v55_v30 }
 0x128   :  { %v69_v32 = vadd.f32 1e-05, %v65_v31 }
 0x129   :  { %v58_v33 = vpop.xlane.xlu1 %57  ;;  %v61_v34 = vpop.xlane.xlu0 %60 }
 0x12a   :  { %210 = vrsqrt.f32 %v69_v32  ;;  %v66_v35 = vmul.f32 0.03125, %v58_v33  ;;  %v67_v36 = vmul.f32 0.03125, %v61_v34 }
 0x12c   :  { %v70_v37 = vadd.f32 1e-05, %v66_v35  ;;  %v71_v38 = vadd.f32 1e-05, %v67_v36 }
 0x12d   :  { %v64_v39 = vpop.xlane.xlu1 %63 }
 0x12e   :  { %212 = vrsqrt.f32 %v70_v37  ;;  %v68_v40 = vmul.f32 0.03125, %v64_v39 }
 0x12f   :  { %214 = vrsqrt.f32 %v71_v38 }
 0x130   :  { %v72_v41 = vadd.f32 1e-05, %v68_v40 }
 0x132   :  { %216 = vrsqrt.f32 %v72_v41 }
 0x134   :  { %v211_v42 = vpop.eup %210 }
 0x135   :  { %v77_v43 = vmul.f32 %v211_v42, %v45_v12 }
 0x137   :  { %v87_v48 = vmul.f32 %v189_v44, %v77_v43 }
 0x138   :  { %v213_v45 = vpop.eup %212 }
 0x139   :  { %v215_v46 = vpop.eup %214  ;;  %v78_v47 = vmul.f32 %v213_v45, %v46_v20  ;;  %v97_v54 = vadd.f32 %v190_v50, %v87_v48 }
 0x13a   :  { %v79_v49 = vmul.f32 %v215_v46, %v47_v13 }
 0x13b   :  { %v88_v51 = vmul.f32 %v189_v44, %v78_v47 }
 0x13c   :  { %v217_v52 = vpop.eup %216  ;;  %v89_v56 = vmul.f32 %v189_v44, %v79_v49 }
 0x13d   :  { %v80_v53 = vmul.f32 %v217_v52, %v48_v21  ;;  %v98_v55 = vadd.f32 %v190_v50, %v88_v51 }
 0x13e   :  { %v99_v59 = vadd.f32 %v190_v50, %v89_v56 }
 0x13f   :  { %v101_v57 = vpack.c.bf16 %v98_v55, %v97_v54  ;;  %v90_v58 = vmul.f32 %v189_v44, %v80_v53 }
 0x141   :  { %204 = vmatprep.mubr.msk.bf16.mxu0 %vm27_vm0, %v101_v57  ;;  %v100_v60 = vadd.f32 %v190_v50, %v90_v58 }
 0x143   :  { %v102_v61 = vpack.c.bf16 %v100_v60, %v99_v59 }
 0x145   :  { %205 = vmatmul.mubr.msk.bf16.vlgmr.msra.gmra.mrb[0].mxu0 %vm27_vm0, %v102_v61 }
 0x218   :  { %v206_v63 = vpop.f32.mrb[0].mxu0 }
 0x219   :  { %v175_v0 = vadd.f32 %v206_v63, %v191_v62  ;;  %v166_v1 = vpop.f32.mrb[1].mxu0 }
 0x21a   :  { %v167_v2 = vadd.f32 %v191_v62, %v166_v1  ;;  %v207_v3 = vpop.f32.mrb[2].mxu0 }
 0x21b   :  { %183 = vst [vmem:[%s302_s5 + $0x10] sm:$0xff] %v175_v0  ;;  %v178_v4 = vadd.f32 %v207_v3, %v191_v62  ;;  %v169_v5 = vpop.f32.mrb[3].mxu0 }
 0x21c   :  { %181 = vst [vmem:[%s302_s5] sm:$0xff] %v167_v2  ;;  %v170_v6 = vadd.f32 %v191_v62, %v169_v5 }
 0x21d   :  { %184 = vst [vmem:[%s302_s5 + $0x18] sm:$0xff] %v178_v4 }
 0x21e   :  { %182 = vst [vmem:[%s302_s5 + $0x8] sm:$0xff] %v170_v6 }

// kernel: table_decoder_fwd.11
= control target key start
LH: loop header
LB: loop body
LE: loop exit
PB: predicated region body
PF: predicated region fallthrough
CT: control target
= control target key end

     0   :  { %s3427_s0 = inlined_call_operand.vmem [shape: f32[2,8,32], index: 0, kind: input, shape index: {}]   ;;  %s3428_s1 = inlined_call_operand.vmem [shape: f32[2,16,32], index: 1, kind: input, shape index: {}]   ;;  %s3429_s2 = inlined_call_operand.vmem [shape: bf16[32,32], index: 2, kind: input, shape index: {}]   ;;  %s3430_s3 = inlined_call_operand.vmem [shape: f32[1,32], index: 3, kind: input, shape index: {}]   ;;  %s3431_s4 = inlined_call_operand.vmem [shape: bf16[32,64], index: 4, kind: input, shape index: {}]   ;;  %s3432_s5 = inlined_call_operand.vmem [shape: f32[1,64], index: 5, kind: input, shape index: {}]   ;;  %s3433_s6 = inlined_call_operand.vmem [shape: bf16[32,32], index: 6, kind: input, shape index: {}]   ;;  %s3434_s7 = inlined_call_operand.vmem [shape: f32[1,32], index: 7, kind: input, shape index: {}]   ;;  %s3435_s8 = inlined_call_operand.vmem [shape: bf16[32,32], index: 8, kind: input, shape index: {}]   ;;  %s3436_s9 = inlined_call_operand.vmem [shape: f32[1,32], index: 9, kind: input, shape index: {}]   ;;  %s3437_s10 = inlined_call_operand.vmem [shape: bf16[32,64], index: 10, kind: input, shape index: {}]   ;;  %s3438_s11 = inlined_call_operand.vmem [shape: f32[1,64], index: 11, kind: input, shape index: {}]   ;;  %s3439_s12 = inlined_call_operand.vmem [shape: bf16[32,32], index: 12, kind: input, shape index: {}]   ;;  %s3440_s13 = inlined_call_operand.vmem [shape: f32[1,32], index: 13, kind: input, shape index: {}]   ;;  %s3441_s14 = inlined_call_operand.vmem [shape: f32[1,32], index: 14, kind: input, shape index: {}]   ;;  %s3442_s15 = inlined_call_operand.vmem [shape: f32[1,32], index: 15, kind: input, shape index: {}]   ;;  %s3443_s16 = inlined_call_operand.vmem [shape: bf16[32,32], index: 16, kind: input, shape index: {}]   ;;  %s3444_s17 = inlined_call_operand.vmem [shape: f32[1,32], index: 17, kind: input, shape index: {}]   ;;  %s3445_s18 = inlined_call_operand.vmem [shape: f32[1,32], index: 18, kind: input, shape index: {}]   ;;  %s3446_s19 = inlined_call_operand.vmem [shape: f32[1,32], index: 19, kind: input, shape index: {}]   ;;  %s3447_s20 = inlined_call_operand.vmem [shape: bf16[32,32], index: 20, kind: input, shape index: {}]   ;;  %s3448_s21 = inlined_call_operand.vmem [shape: f32[1,32], index: 21, kind: input, shape index: {}]   ;;  %s3449_s22 = inlined_call_operand.vmem [shape: f32[2,8,32], index: 22, kind: output, shape index: {}]  }
   0x1   :  { %3462 = sst [smem:[#allocation2_spill]] %s3427_s0 }
   0x2   :  { %3463 = sst [smem:[#allocation3_spill]] %s3428_s1 }
   0x3   :  { %3464 = sst [smem:[#allocation4_spill]] %s3429_s2 }
   0x4   :  { %3465 = sst [smem:[#allocation5_spill]] %s3430_s3  ;;  %s3051_s3 = smov 0  }
   0x5   :  { %3466 = sst [smem:[#allocation6_spill]] %s3431_s4 }
   0x6   :  { %3467 = sst [smem:[#allocation7_spill]] %s3432_s5 }
   0x7   :  { %3468 = sst [smem:[#allocation8_spill]] %s3433_s6 }
   0x8 LB: > { %s2530_s28 = sadd.s32 4294967295, %s2925_s3   ;;  %p2534_p0 = scmp.ge.s32.totalorder %s2925_s3, 1  ;;  %s2925_s3 = sphi %s3051_s3, %s32_s3  }
   0x9   : > { %p621_p1 = scmp.lt.s32.totalorder %s2925_s3, 3 }
   0xb   : > { %p622_p2 = pnand %p2534_p0, %p621_p1 }
   0xc   : > { %s3469_s4 = sld [smem:[#allocation6_spill]] (!%p622_p2)  ;;  %v2927_v1 = vmov (!%p622_p2), 0.0   ;;  %s3470_s24 = sld [smem:[#allocation4_spill]] (!%p622_p2)  ;;  %vm2928_vm0 = vmmov (!%p622_p2), 0   ;;  %vm732_vm1 = vcmask (!%p622_p2), 261120   ;;  %vm852_vm2 = vcmask (!%p622_p2), 64512  }
   0xd   : > { %625 = sbr.rel (%p622_p2) target bundleno = 6683 (0x1a1b), region = 108  ;;  %2670 = vmatprep.subr.bf16.mxu1 (!%p622_p2), %v2927_v1  ;;  %2662 = vmatprep.subr.bf16.mxu0 (!%p622_p2), %v2927_v1  ;;  %p686_p3 = scmp.lt.s32.totalorder (!%p622_p2), %s2530_s28, 1  ;;  %vm919_vm3 = vcmask (!%p622_p2), 1043456   ;;  %v703_v24 = vlaneseq (!%p622_p2)  ;;  %vm1688_vm5 = vcmask (!%p622_p2), 130048  }
   0xe   : > { %2674 = vmatprep.mubr.msk.bf16.mxu1 (!%p622_p2), %vm2928_vm0, %v2927_v1  ;;  %2666 = vmatprep.mubr.msk.bf16.mxu0 (!%p622_p2), %vm2928_vm0, %v2927_v1  ;;  %s3471_s29 = sld [smem:[#allocation2_spill]] (!%p622_p2)  ;;  %s3472_s1 = sld [smem:[#allocation7_spill]] (!%p622_p2) }
   0xf   : > { %s3473_s25 = sld [smem:[#allocation5_spill]] (!%p622_p2)  ;;  %s3461_s2 = smov (!%p622_p2), 96   ;;  %v3122_v25 = vshrl.u32 (!%p622_p2), %v703_v24, 7  ;;  %v3124_v26 = vand.u32 (!%p622_p2), 127, %v703_v24 }
  0x10   : > { %s2930_s27 = smov (!%p622_p2), 120   ;;  %s3474_s0 = sld [smem:[#allocation8_spill]] (!%p622_p2) }
  0x11   : > { %vm707_vm4 = vcmp.ge.s32.totalorder (!%p622_p2), %v3122_v25, %v3124_v26  ;;  %s3460_s23 = smov (!%p622_p2), 88   ;;  %s3454_s5 = smov (!%p622_p2), 72  }
  0x12   : > { %v2871_v0 = vld [vmem:[%s3469_s4] sm:$0xff] (!%p622_p2)   ;;  %v2872_v2 = vld [vmem:[%s3469_s4 + $0x8] sm:$0xff] (!%p622_p2)  }
  0x13   : > { %2671 = vmatpush3.bf16.msra.mxu1 (!%p622_p2), %v2871_v0  ;;  %v2873_v3 = vld [vmem:[%s3470_s24] sm:$0xff] (!%p622_p2)   ;;  %v2874_v4 = vld [vmem:[%s3470_s24 + $0x8] sm:$0xff] (!%p622_p2)  }
  0x14   : > { %2672 = vmatprep.subr.bf16.mxu1 %v2927_v1  ;;  %2663 = vmatpush3.bf16.msra.mxu0 %v2873_v3  ;;  %s3484_s28 = smov (!%p686_p3, %s2530_s28), 1  ;;  %v2543_v7 = vld [vmem:[%s3472_s1] ss:$0 sm:$0xff]  ;;  %s3458_s1 = smov 112  }
  0x15   : > { %2664 = vmatprep.subr.bf16.mxu0 %v2927_v1  ;;  %s3453_s26 = sshll.u32 %s3484_s28, 3  ;;  %v2539_v14 = vld [vmem:[%s3473_s25] ss:$0 sm:$0xff]  ;;  %s3457_s25 = smov 80  }
  0x16   : > { %s689_s30 = scalar_lea.vmem %s3471_s29, %s3453_s26  ;;  %v839_v46 = vld [vmem:[%s3474_s0] sm:$0xf]  ;;  %s3455_s29 = smov 104   ;;  %v842_v26 = vld [vmem:[%s3474_s0 + $0xc] sm:$0xf] }
  0x17   : > { %2673 = vmatpush3.bf16.msra.mxu1 %v2872_v2  ;;  %v3088_v5 = vld [vmem:[%s689_s30] sm:$0xff]  ;;  %v968_v47 = vsel %vm919_vm3, %v839_v46, 0  ;;  %s2595_s6 = sshll.u32 %s3484_s28, 4 }
  0x18   : > { %2684 = vmatprep.subr.bf16.mxu1 %v2927_v1  ;;  %2665 = vmatpush3.bf16.msra.mxu0 %v2874_v4  ;;  %v708_v6 = vpack.c.bf16 %v3088_v5, %v3088_v5 }
  0x19   : > { %2678 = vmatprep.subr.bf16.mxu0 %v2927_v1 }
  0x1a   : > { %2675 = vmatmul.mubr.msk.bf16.vlgmr.msra.gmra.mrb[0].mxu1 %vm732_vm1, %v708_v6 }
  0x1b   : > { %2667 = vmatmul.mubr.msk.bf16.vlgmr.msra.gmra.mrb[0].mxu0 %vm732_vm1, %v708_v6  ;;  %2686 = vmatprep.mubr.msk.bf16.mxu1 %vm2928_vm0, %v2927_v1 }
  0x1c   : > { %2680 = vmatprep.mubr.msk.bf16.mxu0 %vm2928_vm0, %v2927_v1 }
  0xed   : > { %v833_v8 = vpop.f32.mrb[0].mxu1 }
  0xee   : > { %v770_v9 = vpop.f32.mrb[0].mxu0  ;;  %v834_v10 = vadd.f32 %v2543_v7, %v833_v8  ;;  %v2676_v11 = vpop.f32.mrb[1].mxu1 }
  0xef   : > { %v2668_v12 = vpop.f32.mrb[1].mxu0  ;;  %v836_v13 = vpop.f32.mrb[2].mxu1  ;;  %v771_v19 = vadd.f32 %v2539_v14, %v770_v9 }
  0xf0   : > { %v773_v15 = vpop.f32.mrb[2].mxu0  ;;  %v3105_v16 = vpack.c.bf16 %v834_v10, %v834_v10  ;;  %v2677_v17 = vpop.f32.mrb[3].mxu1 }
  0xf1   : > { %v2669_v18 = vpop.f32.mrb[3].mxu0  ;;  %v3112_v21 = vpack.c.bf16 %v771_v19, %v771_v19  ;;  %v840_v17 = vld [vmem:[%s3474_s0 + $0x4] sm:$0xf] }
  0xf2   : > { %914 = vrot.lane.b32.xlu1 %v3105_v16, %s3461_s2  ;;  %v857_v20 = vsel %vm852_vm2, %v3105_v16, 0  ;;  %v1129_v18 = vsel %vm919_vm3, %v840_v17, 0  ;;  %s3478_s2 = smov 112  }
  0xf3   : > { %2679 = vmatpush3.bf16.xpose.msra.mxu0 %v857_v20 }
  0xf4   : > { %2690 = vmatprep.subr.bf16.mxu0 %v2927_v1 }
  0xf6   : > { %1014 = vrot.lane.b32.xlu1 %v3105_v16, %s2930_s27 }
  0xfa   : > { %2681 = vmatmul.mubr.msk.bf16.vlgmr.msra.gmra.mrb[4].mxu0 %vm852_vm2, %v3112_v21 }
  0xfb   : > { %2692 = vmatprep.mubr.msk.bf16.mxu0 %vm2928_vm0, %v2927_v1  ;;  %2691 = vmatpush3.bf16.msra.mxu0 %v968_v47 }
  0xfc   : > { %2702 = vmatprep.subr.bf16.mxu0 %v2927_v1 }
 0x164   : > { %v915_v22 = vpop.permute.xlu1 %914 }
 0x165   : > { %v921_v23 = vsel %vm919_vm3, %v915_v22, 0 }
 0x166   : > { %2685 = vmatpush3.bf16.msra.mxu1 %v921_v23 }
 0x167   : > { %2696 = vmatprep.subr.bf16.mxu1 %v2927_v1 }
 0x168   : > { %v1015_v42 = vpop.permute.xlu1 %1014 }
 0x169   : > { %v1020_v44 = vsel %vm852_vm2, %v1015_v42, 0 }
 0x1cd   : > { %v893_v27 = vpop.f32.mrb[4].mxu0 }
 0x1ce   : > { %v899_v28 = vmul.f32 0.35355338, %v893_v27  ;;  %v2682_v29 = vpop.f32.mrb[5].mxu0 }
 0x1cf   : > { %v896_v30 = vpop.f32.mrb[6].mxu0 }
 0x1d0   : > { %v2683_v31 = vpop.f32.mrb[7].mxu0  ;;  %v900_v32 = vsel %vm707_vm4, %v899_v28, -1e+30 }
 0x1d1   : > { %v901_v33 = vsel %vm852_vm2, %v900_v32, -inf }
 0x1d2   : > { %902 = vmax.xlane.f32.xlu0 %v901_v33 }
 0x25f   : > { %v903_v34 = vpop.xlane.xlu0 %902 }
 0x260   : > { %v904_v35 = vsub.f32 %v900_v32, %v903_v34 }
 0x262   : > { %v905_v36 = vmul.f32 1.442695, %v904_v35 }
 0x264   : > { %2883 = vpow2.f32 %v905_v36 }
 0x26e   : > { %v2884_v37 = vpop.eup %2883 }
 0x26f   : > { %v907_v38 = vsel %vm852_vm2, %v2884_v37, 0.0 }
 0x270   : > { %908 = vadd.xlane.f32.xlu0 %v907_v38 }
 0x286   : > { %1012 = vrot.lane.b32.xlu0 %v3112_v21, %s2930_s27 }
 0x2fd   : > { %v909_v39 = vpop.xlane.xlu0 %908 }
 0x2fe   : > { %2885 = vrcp.f32 %v909_v39 }
 0x301   : > { %v1013_v45 = vpop.permute.xlu0 %1012 }
 0x308   : > { %v2886_v40 = vpop.eup %2885 }
 0x309   : > { %v911_v41 = vmul.f32 %v2886_v40, %v2884_v37 }
 0x30b   : > { %v912_v43 = vpack.c.bf16 %v911_v41, %v911_v41 }
 0x30d   : > { %2687 = vmatmul.mubr.msk.bf16.vlgmr.msra.gmra.mrb[4].mxu1 %vm852_vm2, %v912_v43 }
 0x30e   : > { %2697 = vmatpush3.bf16.xpose.msra.mxu1 %v1020_v44  ;;  %2698 = vmatprep.mubr.msk.bf16.mxu1 %vm2928_vm0, %v2927_v1 }
 0x30f   : > { %2708 = vmatprep.subr.bf16.mxu1 %v2927_v1 }
 0x315   : > { %2699 = vmatmul.mubr.msk.bf16.vlgmr.msra.gmra.mrb[8].mxu1 %vm852_vm2, %v1013_v45 }
 0x316   : > { %2710 = vmatprep.mubr.msk.bf16.mxu1 %vm2928_vm0, %v2927_v1  ;;  %2709 = vmatpush3.bf16.msra.mxu1 %v1129_v18 }
 0x317   : > { %2720 = vmatprep.subr.bf16.mxu1 %v2927_v1 }
 0x3e0   : > { %v957_v48 = vpop.f32.mrb[4].mxu1 }
 0x3e1   : > { %v963_v49 = vpack.c.bf16 %v957_v48, %v957_v48  ;;  %v2688_v50 = vpop.f32.mrb[5].mxu1 }
 0x3e2   : > { %v960_v51 = vpop.f32.mrb[6].mxu1 }
 0x3e3   : > { %v2689_v52 = vpop.f32.mrb[7].mxu1  ;;  %2693 = vmatmul.mubr.msk.bf16.vlgmr.msra.gmra.mrb[8].mxu0 %vm852_vm2, %v963_v49 }
 0x3e4   : > { %2704 = vmatprep.mubr.msk.bf16.mxu0 %vm2928_vm0, %v2927_v1 }
 0x3e8   : > { %v1056_v53 = vpop.f32.mrb[8].mxu1 }
 0x3e9   : > { %v1062_v54 = vmul.f32 0.35355338, %v1056_v53  ;;  %v2700_v55 = vpop.f32.mrb[9].mxu1 }
 0x3ea   : > { %v1059_v56 = vpop.f32.mrb[10].mxu1 }
 0x3eb   : > { %v2701_v57 = vpop.f32.mrb[11].mxu1  ;;  %v1063_v58 = vsel %vm707_vm4, %v1062_v54, -1e+30  ;;  %v841_v54 = vld [vmem:[%s3474_s0 + $0x8] sm:$0xf] }
 0x3ec   : > { %v1064_v59 = vsel %vm852_vm2, %v1063_v58, -inf  ;;  %v1289_v55 = vsel %vm919_vm3, %v841_v54, 0 }
 0x3ed   : > { %1065 = vmax.xlane.f32.xlu1 %v1064_v59 }
 0x3fe   : > { %1076 = vrot.lane.b32.xlu1 %v3105_v16, %s3460_s23 }
 0x402   : > { %1172 = vrot.lane.b32.xlu1 %v3112_v21, %s3458_s1 }
 0x47a   : > { %v1066_v60 = vpop.xlane.xlu1 %1065 }
 0x47b   : > { %v1067_v61 = vsub.f32 %v1063_v58, %v1066_v60 }
 0x47d   : > { %v1068_v62 = vmul.f32 1.442695, %v1067_v61 }
 0x47e   : > { %v1077_v63 = vpop.permute.xlu1 %1076 }
 0x47f   : > { %2887 = vpow2.f32 %v1068_v62  ;;  %v1082_v0 = vsel %vm919_vm3, %v1077_v63, 0 }
 0x480   : > { %2703 = vmatpush3.bf16.msra.mxu0 %v1082_v0 }
 0x481   : > { %2714 = vmatprep.subr.bf16.mxu0 %v2927_v1 }
 0x482   : > { %v1173_v15 = vpop.permute.xlu1 %1172 }
 0x489   : > { %v2888_v2 = vpop.eup %2887 }
 0x48a   : > { %v1070_v3 = vsel %vm852_vm2, %v2888_v2, 0.0 }
 0x48b   : > { %1071 = vadd.xlane.f32.xlu0 %v1070_v3 }
 0x4a1   : > { %1174 = vrot.lane.b32.xlu0 %v3105_v16, %s3458_s1 }
 0x4b6   : > { %v1004_v4 = vpop.f32.mrb[8].mxu0 }
 0x4b7   : > { %v2694_v6 = vpop.f32.mrb[9].mxu0 }
 0x4b8   : > { %v1007_v7 = vpop.f32.mrb[10].mxu0 }
 0x4b9   : > { %v2695_v8 = vpop.f32.mrb[11].mxu0 }
 0x518   : > { %v1072_v9 = vpop.xlane.xlu0 %1071 }
 0x519   : > { %2889 = vrcp.f32 %v1072_v9 }
 0x51c   : > { %v1175_v12 = vpop.permute.xlu0 %1174 }
 0x51d   : > { %v1180_v14 = vsel %vm852_vm2, %v1175_v12, 0 }
 0x523   : > { %v2890_v10 = vpop.eup %2889 }
 0x524   : > { %v1074_v11 = vmul.f32 %v2890_v10, %v2888_v2 }
 0x526   : > { %v1075_v13 = vpack.c.bf16 %v1074_v11, %v1074_v11 }
 0x528   : > { %2705 = vmatmul.mubr.msk.bf16.vlgmr.msra.gmra.mrb[12].mxu0 %vm852_vm2, %v1075_v13 }
 0x529   : > { %2715 = vmatpush3.bf16.xpose.msra.mxu0 %v1180_v14  ;;  %2716 = vmatprep.mubr.msk.bf16.mxu0 %vm2928_vm0, %v2927_v1 }
 0x52a   : > { %2726 = vmatprep.subr.bf16.mxu0 %v2927_v1 }
 0x530   : > { %2717 = vmatmul.mubr.msk.bf16.vlgmr.msra.gmra.mrb[16].mxu0 %vm852_vm2, %v1173_v15 }
 0x531   : > { %2728 = vmatprep.mubr.msk.bf16.mxu0 %vm2928_vm0, %v2927_v1  ;;  %2727 = vmatpush3.bf16.msra.mxu0 %v1289_v55 }
 0x532   : > { %2738 = vmatprep.subr.bf16.mxu0 %v2927_v1 }
 0x5fb   : > { %v1118_v19 = vpop.f32.mrb[12].mxu0 }
 0x5fc   : > { %v1124_v20 = vpack.c.bf16 %v1118_v19, %v1118_v19  ;;  %v2706_v22 = vpop.f32.mrb[13].mxu0 }
 0x5fd   : > { %v1121_v23 = vpop.f32.mrb[14].mxu0 }
 0x5fe   : > { %v2707_v24 = vpop.f32.mrb[15].mxu0  ;;  %2711 = vmatmul.mubr.msk.bf16.vlgmr.msra.gmra.mrb[12].mxu1 %vm852_vm2, %v1124_v20 }
 0x5ff   : > { %2722 = vmatprep.mubr.msk.bf16.mxu1 %vm2928_vm0, %v2927_v1  ;;  %v2875_v24 = vld [vmem:[%s3437_s10] sm:$0xff]  }
 0x603   : > { %v1216_v27 = vpop.f32.mrb[16].mxu0 }
 0x604   : > { %v1222_v28 = vmul.f32 0.35355338, %v1216_v27  ;;  %v2718_v29 = vpop.f32.mrb[17].mxu0 }
 0x605   : > { %v1219_v30 = vpop.f32.mrb[18].mxu0 }
 0x606   : > { %v2719_v31 = vpop.f32.mrb[19].mxu0  ;;  %v1223_v32 = vsel %vm707_vm4, %v1222_v28, -1e+30 }
 0x607   : > { %v1224_v33 = vsel %vm852_vm2, %v1223_v32, -inf  ;;  %v2876_v31 = vld [vmem:[%s3437_s10 + $0x8] sm:$0xff]  }
 0x608   : > { %1225 = vmax.xlane.f32.xlu1 %v1224_v33 }
 0x619   : > { %1236 = vrot.lane.b32.xlu1 %v3105_v16, %s3457_s25  ;;  %s3475_s25 = sld [smem:[#allocation3_spill]] }
 0x61d   : > { %1332 = vrot.lane.b32.xlu1 %v3112_v21, %s3455_s29  ;;  %v2547_v21 = vld [vmem:[%s3434_s7] ss:$0 sm:$0xff] }
 0x61e   : > { %v1010_v41 = vadd.f32 %v2547_v21, %v1004_v4 }
 0x61f   : > { %s694_s1 = scalar_lea.vmem %s3475_s25, %s2595_s6  ;;  %s3477_s25 = smov 88  }
 0x620   : > { %v702_v33 = vld [vmem:[%s694_s1 + $0x8] sm:$0xff] }
 0x695   : > { %v1226_v34 = vpop.xlane.xlu1 %1225 }
 0x696   : > { %v1227_v35 = vsub.f32 %v1223_v32, %v1226_v34  ;;  %v701_v32 = vld [vmem:[%s694_s1] sm:$0xff]  ;;  %s3482_s1 = sshll.u32 %s3484_s28, 3 }
 0x697   : > { %v1560_v34 = vpack.c.bf16 %v702_v33, %v701_v32  ;;  %s698_s6 = scalar_lea.vmem %s3449_s22, %s3482_s1 }
 0x698   : > { %v1228_v36 = vmul.f32 1.442695, %v1227_v35  ;;  %v2877_v35 = vld [vmem:[%s3435_s8] sm:$0xff]  }
 0x699   : > { %v1237_v37 = vpop.permute.xlu1 %1236 }
 0x69a   : > { %2891 = vpow2.f32 %v1228_v36  ;;  %v1242_v38 = vsel %vm919_vm3, %v1237_v37, 0  ;;  %v2878_v36 = vld [vmem:[%s3435_s8 + $0x8] sm:$0xff]  }
 0x69b   : > { %2721 = vmatpush3.bf16.msra.mxu1 %v1242_v38 }
 0x69c   : > { %2732 = vmatprep.subr.bf16.mxu1 %v2927_v1 }
 0x69d   : > { %v1333_v53 = vpop.permute.xlu1 %1332 }
 0x6a4   : > { %v2892_v39 = vpop.eup %2891 }
 0x6a5   : > { %v1230_v40 = vsel %vm852_vm2, %v2892_v39, 0.0 }
 0x6a6   : > { %1231 = vadd.xlane.f32.xlu0 %v1230_v40 }
 0x6bc   : > { %1334 = vrot.lane.b32.xlu0 %v3105_v16, %s3455_s29  ;;  %s3479_s29 = smov 80  }
 0x6d1   : > { %v1165_v42 = vpop.f32.mrb[12].mxu1 }
 0x6d2   : > { %v1171_v43 = vadd.f32 %v1165_v42, %v1010_v41  ;;  %v2712_v44 = vpop.f32.mrb[13].mxu1 }
 0x6d3   : > { %v1168_v45 = vpop.f32.mrb[14].mxu1 }
 0x6d4   : > { %v2713_v46 = vpop.f32.mrb[15].mxu1 }
 0x733   : > { %v1232_v47 = vpop.xlane.xlu0 %1231 }
 0x734   : > { %2893 = vrcp.f32 %v1232_v47 }
 0x737   : > { %v1335_v50 = vpop.permute.xlu0 %1334 }
 0x738   : > { %v1340_v52 = vsel %vm852_vm2, %v1335_v50, 0 }
 0x73e   : > { %v2894_v48 = vpop.eup %2893 }
 0x73f   : > { %v1234_v49 = vmul.f32 %v2894_v48, %v2892_v39 }
 0x741   : > { %v1235_v51 = vpack.c.bf16 %v1234_v49, %v1234_v49 }
 0x743   : > { %2723 = vmatmul.mubr.msk.bf16.vlgmr.msra.gmra.mrb[16].mxu1 %vm852_vm2, %v1235_v51  ;;  %v2560_v51 = vld [vmem:[%s3436_s9] ss:$0 sm:$0xff] }
 0x744   : > { %2733 = vmatpush3.bf16.xpose.msra.mxu1 %v1340_v52  ;;  %2734 = vmatprep.mubr.msk.bf16.mxu1 %vm2928_vm0, %v2927_v1 }
 0x745   : > { %2744 = vmatprep.subr.bf16.mxu1 %v2927_v1 }
 0x74b   : > { %2735 = vmatmul.mubr.msk.bf16.vlgmr.msra.gmra.mrb[20].mxu1 %vm852_vm2, %v1333_v53 }
 0x74c   : > { %2746 = vmatprep.mubr.msk.bf16.mxu1 %vm2928_vm0, %v2927_v1 }
 0x816   : > { %v1278_v56 = vpop.f32.mrb[16].mxu1 }
 0x817   : > { %v1284_v57 = vpack.c.bf16 %v1278_v56, %v1278_v56  ;;  %v2724_v58 = vpop.f32.mrb[17].mxu1 }
 0x818   : > { %v1281_v59 = vpop.f32.mrb[18].mxu1 }
 0x819   : > { %v2725_v60 = vpop.f32.mrb[19].mxu1  ;;  %2729 = vmatmul.mubr.msk.bf16.vlgmr.msra.gmra.mrb[20].mxu0 %vm852_vm2, %v1284_v57 }
 0x81a   : > { %2740 = vmatprep.mubr.msk.bf16.mxu0 %vm2928_vm0, %v2927_v1 }
 0x81e   : > { %v1376_v61 = vpop.f32.mrb[20].mxu1 }
 0x81f   : > { %v1382_v62 = vmul.f32 0.35355338, %v1376_v61  ;;  %v2736_v63 = vpop.f32.mrb[21].mxu1 }
 0x820   : > { %v1379_v0 = vpop.f32.mrb[22].mxu1 }
 0x821   : > { %v2737_v2 = vpop.f32.mrb[23].mxu1  ;;  %v1383_v3 = vsel %vm707_vm4, %v1382_v62, -1e+30 }
 0x822   : > { %v1384_v4 = vsel %vm852_vm2, %v1383_v3, -inf }
 0x823   : > { %1385 = vmax.xlane.f32.xlu1 %v1384_v4 }
 0x834   : > { %1396 = vrot.lane.b32.xlu1 %v3105_v16, %s3454_s5  ;;  %v1449_v16 = vsel %vm919_vm3, %v842_v26, 0  ;;  %s3480_s5 = smov 104  }
 0x835   : > { %2745 = vmatpush3.bf16.msra.mxu1 %v1449_v16 }
 0x836   : > { %2758 = vmatprep.subr.bf16.mxu1 %v2927_v1 }
 0x8b0   : > { %v1386_v6 = vpop.xlane.xlu1 %1385 }
 0x8b1   : > { %v1387_v7 = vsub.f32 %v1383_v3, %v1386_v6 }
 0x8b3   : > { %v1388_v8 = vmul.f32 1.442695, %v1387_v7 }
 0x8b4   : > { %v1397_v9 = vpop.permute.xlu1 %1396 }
 0x8b5   : > { %2895 = vpow2.f32 %v1388_v8  ;;  %v1402_v10 = vsel %vm919_vm3, %v1397_v9, 0 }
 0x8b6   : > { %2739 = vmatpush3.bf16.msra.mxu0 %v1402_v10 }
 0x8b7   : > { %2750 = vmatprep.subr.bf16.mxu0 %v2927_v1 }
 0x8bf   : > { %v2896_v11 = vpop.eup %2895 }
 0x8c0   : > { %v1390_v25 = vsel %vm852_vm2, %v2896_v11, 0.0 }
 0x8c1   : > { %1391 = vadd.xlane.f32.xlu0 %v1390_v25 }
 0x8ec   : > { %v1325_v12 = vpop.f32.mrb[20].mxu0 }
 0x8ed   : > { %v1331_v13 = vadd.f32 %v1325_v12, %v1171_v43  ;;  %v2730_v14 = vpop.f32.mrb[21].mxu0  ;;  %v2564_v43 = vld [vmem:[%s3438_s11] ss:$0 sm:$0xff] }
 0x8ee   : > { %v1328_v15 = vpop.f32.mrb[22].mxu0  ;;  %v1628_v12 = vld [vmem:[%s3439_s12] sm:$0xf] }
 0x8ef   : > { %v2731_v17 = vpop.f32.mrb[23].mxu0 }
 0x94e   : > { %v1392_v18 = vpop.xlane.xlu0 %1391 }
 0x94f   : > { %2897 = vrcp.f32 %v1392_v18 }
 0x959   : > { %v2898_v19 = vpop.eup %2897 }
 0x95a   : > { %v1394_v20 = vmul.f32 %v2898_v19, %v2896_v11 }
 0x95c   : > { %v1395_v22 = vpack.c.bf16 %v1394_v20, %v1394_v20 }
 0x95e   : > { %2741 = vmatmul.mubr.msk.bf16.vlgmr.msra.gmra.mrb[24].mxu0 %vm852_vm2, %v1395_v22 }
 0x95f   : > { %2754 = vmatprep.mubr.msk.bf16.mxu0 %vm2928_vm0, %v2927_v1  ;;  %2751 = vmatpush3.bf16.msra.mxu0 %v2877_v35 }
 0x960   : > { %2752 = vmatprep.subr.bf16.mxu0 %v2927_v1 }
 0x963   : > { %2753 = vmatpush3.bf16.msra.mxu0 %v2878_v36 }
 0x964   : > { %2766 = vmatprep.subr.bf16.mxu0 %v2927_v1 }
 0xa31   : > { %v1438_v23 = vpop.f32.mrb[24].mxu0 }
 0xa32   : > { %v1444_v27 = vpack.c.bf16 %v1438_v23, %v1438_v23  ;;  %v2742_v28 = vpop.f32.mrb[25].mxu0 }
 0xa33   : > { %v1441_v29 = vpop.f32.mrb[26].mxu0 }
 0xa34   : > { %v2743_v30 = vpop.f32.mrb[27].mxu0  ;;  %2747 = vmatmul.mubr.msk.bf16.vlgmr.msra.gmra.mrb[24].mxu1 %vm852_vm2, %v1444_v27 }
 0xa35   : > { %2759 = vmatpush3.bf16.msra.mxu1 %v2875_v24  ;;  %2762 = vmatprep.mubr.msk.bf16.mxu1 %vm2928_vm0, %v2927_v1 }
 0xa36   : > { %2760 = vmatprep.subr.bf16.mxu1 %v2927_v1 }
 0xa39   : > { %2761 = vmatpush3.bf16.msra.mxu1 %v2876_v31 }
 0xa3a   : > { %2772 = vmatprep.subr.bf16.mxu1 %v2927_v1 }
 0xa3c   : > { %2763 = vmatmul.mubr.msk.bf16.vlgmr.msra.gmra.mrb[28].mxu1 %vm732_vm1, %v1560_v34 }
 0xa3d   : > { %2774 = vmatprep.mubr.msk.bf16.mxu1 %vm2928_vm0, %v2927_v1 }
 0xb07   : > { %v1485_v37 = vpop.f32.mrb[24].mxu1 }
 0xb08   : > { %v1491_v38 = vadd.f32 %v1485_v37, %v1331_v13  ;;  %v2748_v39 = vpop.f32.mrb[25].mxu1  ;;  %v1753_v13 = vsel %vm919_vm3, %v1628_v12, 0 }
 0xb09   : > { %v1488_v40 = vpop.f32.mrb[26].mxu1 }
 0xb0a   : > { %v3256_v21 = vadd.f32 %v1491_v38, %v3088_v5  ;;  %v2749_v41 = vpop.f32.mrb[27].mxu1 }
 0xb0c   : > { %v1493_v42 = vpack.c.bf16 %v3256_v21, %v3256_v21 }
 0xb0e   : > { %2755 = vmatmul.mubr.msk.bf16.vlgmr.msra.gmra.mrb[28].mxu0 %vm732_vm1, %v1493_v42 }
 0xb0f   : > { %v1621_v44 = vpop.f32.mrb[28].mxu1  ;;  %2768 = vmatprep.mubr.msk.bf16.mxu0 %vm2928_vm0, %v2927_v1 }
 0xb10   : > { %v1622_v45 = vadd.f32 %v2564_v43, %v1621_v44  ;;  %v2764_v46 = vpop.f32.mrb[29].mxu1 }
 0xb11   : > { %v1624_v47 = vpop.f32.mrb[30].mxu1  ;;  %v1629_v46 = vld [vmem:[%s3439_s12 + $0x4] sm:$0xf] }
 0xb12   : > { %v1625_v48 = vadd.f32 %v2564_v43, %v1624_v47  ;;  %v2765_v5 = vpop.f32.mrb[31].mxu1  ;;  %v1911_v47 = vsel %vm919_vm3, %v1629_v46, 0 }
 0xb14   : > { %v3266_v49 = vpack.c.bf16 %v1625_v48, %v1622_v45 }
 0xb16   : > { %1799 = vrot.lane.b32.xlu1 %v3266_v49, %s2930_s27  ;;  %v1645_v50 = vsel %vm852_vm2, %v3266_v49, 0 }
 0xb17   : > { %2767 = vmatpush3.bf16.xpose.msra.mxu0 %v1645_v50 }
 0xb18   : > { %2778 = vmatprep.subr.bf16.mxu0 %v2927_v1 }
 0xb88   : > { %v1800_v11 = vpop.permute.xlu1 %1799 }
 0xb89   : > { %v1805_v26 = vsel %vm852_vm2, %v1800_v11, 0 }
 0xbe1   : > { %v1554_v52 = vpop.f32.mrb[28].mxu0 }
 0xbe2   : > { %v1555_v53 = vadd.f32 %v2560_v51, %v1554_v52  ;;  %v2756_v54 = vpop.f32.mrb[29].mxu0 }
 0xbe3   : > { %v1557_v55 = vpop.f32.mrb[30].mxu0 }
 0xbe4   : > { %v3276_v56 = vpack.c.bf16 %v1555_v53, %v1555_v53  ;;  %v2757_v57 = vpop.f32.mrb[31].mxu0 }
 0xbe6   : > { %1797 = vrot.lane.b32.xlu1 %v3276_v56, %s2930_s27  ;;  %2769 = vmatmul.mubr.msk.bf16.vlgmr.msra.gmra.mrb[32].mxu0 %vm852_vm2, %v3276_v56  ;;  %s3476_s27 = smov 96  }
 0xbe7   : > { %2780 = vmatprep.mubr.msk.bf16.mxu0 %vm2928_vm0, %v2927_v1  ;;  %2779 = vmatpush3.bf16.msra.mxu0 %v1753_v13 }
 0xbe8   : > { %2790 = vmatprep.subr.bf16.mxu0 %v2927_v1 }
 0xc58   : > { %v1798_v16 = vpop.permute.xlu1 %1797 }
 0xcb9   : > { %v1681_v58 = vpop.f32.mrb[32].mxu0 }
 0xcba   : > { %v1687_v59 = vmul.f32 0.35355338, %v1681_v58  ;;  %v2770_v60 = vpop.f32.mrb[33].mxu0 }
 0xcbb   : > { %v1684_v61 = vpop.f32.mrb[34].mxu0 }
 0xcbc   : > { %v2771_v62 = vpop.f32.mrb[35].mxu0  ;;  %v1689_v63 = vsel %vm1688_vm5, %v1687_v59, -inf }
 0xcbd   : > { %1690 = vmax.xlane.f32.xlu0 %v1689_v63 }
 0xd4a   : > { %v1691_v0 = vpop.xlane.xlu0 %1690 }
 0xd4b   : > { %v1692_v2 = vsub.f32 %v1687_v59, %v1691_v0 }
 0xd4d   : > { %v1693_v3 = vmul.f32 1.442695, %v1692_v2 }
 0xd4f   : > { %2899 = vpow2.f32 %v1693_v3  ;;  %v2568_v3 = vld [vmem:[%s3440_s13] ss:$0 sm:$0xff] }
 0xd59   : > { %v2900_v4 = vpop.eup %2899 }
 0xd5a   : > { %v1695_v6 = vsel %vm1688_vm5, %v2900_v4, 0.0 }
 0xd5b   : > { %1696 = vadd.xlane.f32.xlu0 %v1695_v6 }
 0xd71   : > { %1702 = vrot.lane.b32.xlu0 %v3266_v49, %s3476_s27 }
 0xde8   : > { %v1697_v7 = vpop.xlane.xlu0 %1696 }
 0xde9   : > { %2901 = vrcp.f32 %v1697_v7 }
 0xdec   : > { %v1703_v8 = vpop.permute.xlu0 %1702 }
 0xded   : > { %2773 = vmatpush3.bf16.msra.mxu1 %v1703_v8 }
 0xdee   : > { %2784 = vmatprep.subr.bf16.mxu1 %v2927_v1 }
 0xdf3   : > { %v2902_v9 = vpop.eup %2901 }
 0xdf4   : > { %v1699_v10 = vmul.f32 %v2902_v9, %v2900_v4 }
 0xdf6   : > { %v1700_v25 = vpack.c.bf16 %v1699_v10, %v1699_v10 }
 0xdf8   : > { %2775 = vmatmul.mubr.msk.bf16.vlgmr.msra.gmra.mrb[32].mxu1 %vm1688_vm5, %v1700_v25 }
 0xdf9   : > { %2785 = vmatpush3.bf16.xpose.msra.mxu1 %v1805_v26  ;;  %2786 = vmatprep.mubr.msk.bf16.mxu1 %vm2928_vm0, %v2927_v1 }
 0xdfa   : > { %2796 = vmatprep.subr.bf16.mxu1 %v2927_v1 }
 0xe00   : > { %2787 = vmatmul.mubr.msk.bf16.vlgmr.msra.gmra.mrb[36].mxu1 %vm852_vm2, %v1798_v16 }
 0xe01   : > { %2798 = vmatprep.mubr.msk.bf16.mxu1 %vm2928_vm0, %v2927_v1  ;;  %2797 = vmatpush3.bf16.msra.mxu1 %v1911_v47 }
 0xe02   : > { %2808 = vmatprep.subr.bf16.mxu1 %v2927_v1 }
 0xecb   : > { %v1742_v14 = vpop.f32.mrb[32].mxu1 }
 0xecc   : > { %v1748_v15 = vpack.c.bf16 %v1742_v14, %v1742_v14  ;;  %v2776_v17 = vpop.f32.mrb[33].mxu1  ;;  %v1630_v14 = vld [vmem:[%s3439_s12 + $0x8] sm:$0xf] }
 0xecd   : > { %v1745_v18 = vpop.f32.mrb[34].mxu1 }
 0xece   : > { %v2777_v19 = vpop.f32.mrb[35].mxu1  ;;  %2781 = vmatmul.mubr.msk.bf16.vlgmr.msra.gmra.mrb[36].mxu0 %vm852_vm2, %v1748_v15  ;;  %v2068_v15 = vsel %vm919_vm3, %v1630_v14, 0 }
 0xecf   : > { %2792 = vmatprep.mubr.msk.bf16.mxu0 %vm2928_vm0, %v2927_v1 }
 0xed3   : > { %v1841_v20 = vpop.f32.mrb[36].mxu1 }
 0xed4   : > { %v1847_v22 = vmul.f32 0.35355338, %v1841_v20  ;;  %v2788_v23 = vpop.f32.mrb[37].mxu1 }
 0xed5   : > { %v1844_v24 = vpop.f32.mrb[38].mxu1 }
 0xed6   : > { %v2789_v27 = vpop.f32.mrb[39].mxu1  ;;  %v1848_v28 = vsel %vm1688_vm5, %v1847_v22, -inf }
 0xed7   : > { %1849 = vmax.xlane.f32.xlu1 %v1848_v28 }
 0xee8   : > { %1860 = vrot.lane.b32.xlu1 %v3266_v49, %s3477_s25  ;;  %s3481_s25 = smov 72  }
 0xeec   : > { %1954 = vrot.lane.b32.xlu1 %v3276_v56, %s3478_s2 }
 0xf64   : > { %v1850_v29 = vpop.xlane.xlu1 %1849 }
 0xf65   : > { %v1851_v30 = vsub.f32 %v1847_v22, %v1850_v29 }
 0xf67   : > { %v1852_v31 = vmul.f32 1.442695, %v1851_v30 }
 0xf68   : > { %v1861_v32 = vpop.permute.xlu1 %1860 }
 0xf69   : > { %2903 = vpow2.f32 %v1852_v31  ;;  %2791 = vmatpush3.bf16.msra.mxu0 %v1861_v32 }
 0xf6a   : > { %2802 = vmatprep.subr.bf16.mxu0 %v2927_v1 }
 0xf6c   : > { %v1955_v45 = vpop.permute.xlu1 %1954 }
 0xf73   : > { %v2904_v33 = vpop.eup %2903 }
 0xf74   : > { %v1854_v34 = vsel %vm1688_vm5, %v2904_v33, 0.0 }
 0xf75   : > { %1855 = vadd.xlane.f32.xlu0 %v1854_v34 }
 0xf8b   : > { %1956 = vrot.lane.b32.xlu0 %v3266_v49, %s3478_s2 }
 0xfa1   : > { %v1789_v35 = vpop.f32.mrb[36].mxu0 }
 0xfa2   : > { %v2782_v36 = vpop.f32.mrb[37].mxu0 }
 0xfa3   : > { %v1792_v37 = vpop.f32.mrb[38].mxu0 }
 0xfa4   : > { %v2783_v38 = vpop.f32.mrb[39].mxu0  ;;  %v1631_v37 = vld [vmem:[%s3439_s12 + $0xc] sm:$0xf] }
 0xfa5   : > { %v2225_v38 = vsel %vm919_vm3, %v1631_v37, 0 }
0x1002   : > { %v1856_v39 = vpop.xlane.xlu0 %1855 }
0x1003   : > { %2905 = vrcp.f32 %v1856_v39 }
0x1006   : > { %v1957_v42 = vpop.permute.xlu0 %1956 }
0x1007   : > { %v1962_v44 = vsel %vm852_vm2, %v1957_v42, 0 }
0x100d   : > { %v2906_v40 = vpop.eup %2905 }
0x100e   : > { %v1858_v41 = vmul.f32 %v2906_v40, %v2904_v33 }
0x1010   : > { %v1859_v43 = vpack.c.bf16 %v1858_v41, %v1858_v41 }
0x1012   : > { %2793 = vmatmul.mubr.msk.bf16.vlgmr.msra.gmra.mrb[40].mxu0 %vm1688_vm5, %v1859_v43 }
0x1013   : > { %2803 = vmatpush3.bf16.xpose.msra.mxu0 %v1962_v44  ;;  %2804 = vmatprep.mubr.msk.bf16.mxu0 %vm2928_vm0, %v2927_v1 }
0x1014   : > { %2814 = vmatprep.subr.bf16.mxu0 %v2927_v1 }
0x101a   : > { %2805 = vmatmul.mubr.msk.bf16.vlgmr.msra.gmra.mrb[44].mxu0 %vm852_vm2, %v1955_v45 }
0x101b   : > { %2816 = vmatprep.mubr.msk.bf16.mxu0 %vm2928_vm0, %v2927_v1  ;;  %2815 = vmatpush3.bf16.msra.mxu0 %v2068_v15 }
0x101c   : > { %2826 = vmatprep.subr.bf16.mxu0 %v2927_v1 }
0x10e5   : > { %v1900_v48 = vpop.f32.mrb[40].mxu0 }
0x10e6   : > { %v1906_v5 = vpack.c.bf16 %v1900_v48, %v1900_v48  ;;  %v2794_v50 = vpop.f32.mrb[41].mxu0 }
0x10e7   : > { %v1903_v51 = vpop.f32.mrb[42].mxu0 }
0x10e8   : > { %v2795_v52 = vpop.f32.mrb[43].mxu0  ;;  %2799 = vmatmul.mubr.msk.bf16.vlgmr.msra.gmra.mrb[40].mxu1 %vm852_vm2, %v1906_v5 }
0x10e9   : > { %2810 = vmatprep.mubr.msk.bf16.mxu1 %vm2928_vm0, %v2927_v1 }
0x10ed   : > { %v1998_v53 = vpop.f32.mrb[44].mxu0 }
0x10ee   : > { %v2004_v54 = vmul.f32 0.35355338, %v1998_v53  ;;  %v2806_v55 = vpop.f32.mrb[45].mxu0 }
0x10ef   : > { %v2001_v57 = vpop.f32.mrb[46].mxu0 }
0x10f0   : > { %v2807_v58 = vpop.f32.mrb[47].mxu0  ;;  %v2005_v59 = vsel %vm1688_vm5, %v2004_v54, -inf }
0x10f1   : > { %2006 = vmax.xlane.f32.xlu1 %v2005_v59 }
0x1102   : > { %2017 = vrot.lane.b32.xlu1 %v3266_v49, %s3479_s29 }
0x1106   : > { %2111 = vrot.lane.b32.xlu1 %v3276_v56, %s3480_s5  ;;  %v1795_v56 = vadd.f32 %v2568_v3, %v1789_v35 }
0x117e   : > { %v2007_v60 = vpop.xlane.xlu1 %2006 }
0x117f   : > { %v2008_v61 = vsub.f32 %v2004_v54, %v2007_v60 }
0x1181   : > { %v2009_v62 = vmul.f32 1.442695, %v2008_v61 }
0x1182   : > { %v2018_v63 = vpop.permute.xlu1 %2017 }
0x1183   : > { %2907 = vpow2.f32 %v2009_v62  ;;  %2809 = vmatpush3.bf16.msra.mxu1 %v2018_v63 }
0x1184   : > { %2820 = vmatprep.subr.bf16.mxu1 %v2927_v1 }
0x1186   : > { %v2112_v13 = vpop.permute.xlu1 %2111 }
0x118d   : > { %v2908_v0 = vpop.eup %2907 }
0x118e   : > { %v2011_v2 = vsel %vm1688_vm5, %v2908_v0, 0.0 }
0x118f   : > { %2012 = vadd.xlane.f32.xlu0 %v2011_v2  ;;  %v2879_v2 = vld [vmem:[%s3443_s16] sm:$0xff]  }
0x11a5   : > { %2113 = vrot.lane.b32.xlu0 %v3266_v49, %s3480_s5 }
0x11bb   : > { %v1947_v4 = vpop.f32.mrb[40].mxu1 }
0x11bc   : > { %v1953_v6 = vadd.f32 %v1947_v4, %v1795_v56  ;;  %v2800_v7 = vpop.f32.mrb[41].mxu1 }
0x11bd   : > { %v1950_v8 = vpop.f32.mrb[42].mxu1  ;;  %v2581_v7 = vld [vmem:[%s3441_s14] ss:$0 sm:$0xff] }
0x11be   : > { %v2801_v9 = vpop.f32.mrb[43].mxu1 }
0x11bf   : > { %v2582_v9 = vld [vmem:[%s3442_s15] ss:$0 sm:$0xff] }
0x121c   : > { %v2013_v10 = vpop.xlane.xlu0 %2012 }
0x121d   : > { %2909 = vrcp.f32 %v2013_v10 }
0x1220   : > { %v2114_v26 = vpop.permute.xlu0 %2113 }
0x1221   : > { %v2119_v12 = vsel %vm852_vm2, %v2114_v26, 0  ;;  %v2583_v26 = vld [vmem:[%s3444_s17] ss:$0 sm:$0xff] }
0x1227   : > { %v2910_v11 = vpop.eup %2909 }
0x1228   : > { %v2015_v25 = vmul.f32 %v2910_v11, %v2908_v0 }
0x122a   : > { %v2016_v16 = vpack.c.bf16 %v2015_v25, %v2015_v25 }
0x122c   : > { %2811 = vmatmul.mubr.msk.bf16.vlgmr.msra.gmra.mrb[44].mxu1 %vm1688_vm5, %v2016_v16 }
0x122d   : > { %2821 = vmatpush3.bf16.xpose.msra.mxu1 %v2119_v12  ;;  %2822 = vmatprep.mubr.msk.bf16.mxu1 %vm2928_vm0, %v2927_v1 }
0x122e   : > { %2832 = vmatprep.subr.bf16.mxu1 %v2927_v1 }
0x1234   : > { %2823 = vmatmul.mubr.msk.bf16.vlgmr.msra.gmra.mrb[48].mxu1 %vm852_vm2, %v2112_v13 }
0x1235   : > { %2834 = vmatprep.mubr.msk.bf16.mxu1 %vm2928_vm0, %v2927_v1  ;;  %2833 = vmatpush3.bf16.msra.mxu1 %v2225_v38 }
0x1236   : > { %2846 = vmatprep.subr.bf16.mxu1 %v2927_v1 }
0x12ff   : > { %v2057_v17 = vpop.f32.mrb[44].mxu1 }
0x1300   : > { %v2063_v18 = vpack.c.bf16 %v2057_v17, %v2057_v17  ;;  %v2812_v19 = vpop.f32.mrb[45].mxu1 }
0x1301   : > { %v2060_v20 = vpop.f32.mrb[46].mxu1 }
0x1302   : > { %v2813_v22 = vpop.f32.mrb[47].mxu1  ;;  %2817 = vmatmul.mubr.msk.bf16.vlgmr.msra.gmra.mrb[48].mxu0 %vm852_vm2, %v2063_v18 }
0x1303   : > { %2828 = vmatprep.mubr.msk.bf16.mxu0 %vm2928_vm0, %v2927_v1 }
0x1307   : > { %v2155_v23 = vpop.f32.mrb[48].mxu1 }
0x1308   : > { %v2161_v24 = vmul.f32 0.35355338, %v2155_v23  ;;  %v2824_v27 = vpop.f32.mrb[49].mxu1 }
0x1309   : > { %v2158_v28 = vpop.f32.mrb[50].mxu1  ;;  %v2881_v27 = vld [vmem:[%s3447_s20] sm:$0xff]  }
0x130a   : > { %v2825_v29 = vpop.f32.mrb[51].mxu1  ;;  %v2162_v30 = vsel %vm1688_vm5, %v2161_v24, -inf  ;;  %v2882_v28 = vld [vmem:[%s3447_s20 + $0x8] sm:$0xff]  }
0x130b   : > { %2163 = vmax.xlane.f32.xlu1 %v2162_v30 }
0x131c   : > { %2174 = vrot.lane.b32.xlu1 %v3266_v49, %s3481_s25 }
0x1398   : > { %v2164_v31 = vpop.xlane.xlu1 %2163 }
0x1399   : > { %v2165_v32 = vsub.f32 %v2161_v24, %v2164_v31 }
0x139b   : > { %v2166_v33 = vmul.f32 1.442695, %v2165_v32 }
0x139c   : > { %v2175_v34 = vpop.permute.xlu1 %2174 }
0x139d   : > { %2911 = vpow2.f32 %v2166_v33  ;;  %2827 = vmatpush3.bf16.msra.mxu0 %v2175_v34  ;;  %v2587_v33 = vld [vmem:[%s3445_s18] ss:$0 sm:$0xff] }
0x139e   : > { %2838 = vmatprep.subr.bf16.mxu0 %v2927_v1 }
0x13a7   : > { %v2912_v35 = vpop.eup %2911 }
0x13a8   : > { %v2168_v36 = vsel %vm1688_vm5, %v2912_v35, 0.0 }
0x13a9   : > { %2169 = vadd.xlane.f32.xlu0 %v2168_v36 }
0x13d5   : > { %v2104_v49 = vpop.f32.mrb[48].mxu0 }
0x13d6   : > { %v2110_v39 = vadd.f32 %v2104_v49, %v1953_v6  ;;  %v2818_v40 = vpop.f32.mrb[49].mxu0 }
0x13d7   : > { %v2107_v41 = vpop.f32.mrb[50].mxu0 }
0x13d8   : > { %v2819_v42 = vpop.f32.mrb[51].mxu0 }
0x1436   : > { %v2170_v43 = vpop.xlane.xlu0 %2169 }
0x1437   : > { %2913 = vrcp.f32 %v2170_v43 }
0x1441   : > { %v2914_v44 = vpop.eup %2913 }
0x1442   : > { %v2172_v45 = vmul.f32 %v2914_v44, %v2912_v35  ;;  %v2588_v35 = vld [vmem:[%s3446_s19] ss:$0 sm:$0xff] }
0x1444   : > { %v2173_v46 = vpack.c.bf16 %v2172_v45, %v2172_v45 }
0x1446   : > { %2829 = vmatmul.mubr.msk.bf16.vlgmr.msra.gmra.mrb[52].mxu0 %vm1688_vm5, %v2173_v46 }
0x1447   : > { %2842 = vmatprep.mubr.msk.bf16.mxu0 %vm2928_vm0, %v2927_v1  ;;  %2839 = vmatpush3.bf16.msra.mxu0 %v2879_v2 }
0x1448   : > { %2840 = vmatprep.subr.bf16.mxu0 %v2927_v1 }
0x1519   : > { %v2214_v47 = vpop.f32.mrb[52].mxu0 }
0x151a   : > { %v2220_v48 = vpack.c.bf16 %v2214_v47, %v2214_v47  ;;  %v2830_v5 = vpop.f32.mrb[53].mxu0 }
0x151b   : > { %v2217_v50 = vpop.f32.mrb[54].mxu0 }
0x151c   : > { %v2831_v51 = vpop.f32.mrb[55].mxu0  ;;  %2835 = vmatmul.mubr.msk.bf16.vlgmr.msra.gmra.mrb[52].mxu1 %vm852_vm2, %v2220_v48 }
0x151d   : > { %2850 = vmatprep.mubr.msk.bf16.mxu1 %vm2928_vm0, %v2927_v1  ;;  %2847 = vmatpush3.bf16.msra.mxu1 %v2881_v27 }
0x151e   : > { %2848 = vmatprep.subr.bf16.mxu1 %v2927_v1  ;;  %v2589_v1 = vld [vmem:[%s3448_s21] ss:$0 sm:$0xff] }
0x1521   : > { %2849 = vmatpush3.bf16.msra.mxu1 %v2882_v28 }
0x15ef   : > { %v2261_v52 = vpop.f32.mrb[52].mxu1 }
0x15f0   : > { %v2267_v53 = vadd.f32 %v2261_v52, %v2110_v39  ;;  %v2836_v54 = vpop.f32.mrb[53].mxu1 }
0x15f1   : > { %v2264_v55 = vpop.f32.mrb[54].mxu1 }
0x15f2   : > { %v3375_v57 = vadd.f32 %v2267_v53, %v3256_v21  ;;  %v2837_v58 = vpop.f32.mrb[55].mxu1  ;;  %v2880_v21 = vld [vmem:[%s3443_s16 + $0x8] sm:$0xff]  }
0x15f3   : > { %2841 = vmatpush3.bf16.msra.mxu0 %v2880_v21 }
0x15f4   : > { %v2271_v59 = vsel %vm732_vm1, %v3375_v57, 0.0 }
0x15f5   : > { %2272 = vadd.xlane.f32.xlu0 %v2271_v59 }
0x1682   : > { %v2273_v60 = vpop.xlane.xlu0 %2272 }
0x1683   : > { %v2275_v61 = vmul.f32 0.03125, %v2273_v60 }
0x1685   : > { %v2276_v62 = vsub.f32 %v3375_v57, %v2275_v61 }
0x1687   : > { %v2277_v63 = vmul.f32 %v2276_v62, %v2276_v62 }
0x1689   : > { %v2278_v0 = vsel %vm732_vm1, %v2277_v63, 0.0 }
0x168a   : > { %2279 = vadd.xlane.f32.xlu0 %v2278_v0 }
0x1717   : > { %v2280_v3 = vpop.xlane.xlu0 %2279 }
0x1718   : > { %v2281_v56 = vmul.f32 0.03125, %v2280_v3 }
0x171a   : > { %v2282_v4 = vadd.f32 1e-05, %v2281_v56 }
0x171c   : > { %2915 = vrsqrt.f32 %v2282_v4 }
0x1726   : > { %v2916_v6 = vpop.eup %2915 }
0x1727   : > { %v2284_v8 = vmul.f32 %v2916_v6, %v2276_v62 }
0x1729   : > { %v2291_v10 = vmul.f32 %v2581_v7, %v2284_v8 }
0x172b   : > { %v2298_v11 = vadd.f32 %v2582_v9, %v2291_v10 }
0x172d   : > { %v2299_v25 = vpack.c.bf16 %v2298_v11, %v2298_v11 }
0x172f   : > { %2843 = vmatmul.mubr.msk.bf16.vlgmr.msra.gmra.mrb[56].mxu0 %vm732_vm1, %v2299_v25 }
0x1802   : > { %v2360_v16 = vpop.f32.mrb[56].mxu0 }
0x1803   : > { %v2361_v12 = vadd.f32 %v2583_v26, %v2360_v16  ;;  %v2844_v13 = vpop.f32.mrb[57].mxu0 }
0x1804   : > { %v2363_v14 = vpop.f32.mrb[58].mxu0 }
0x1805   : > { %v2366_v15 = vmax.f32 %v2361_v12, 0.0  ;;  %v2845_v17 = vpop.f32.mrb[59].mxu0 }
0x1807   : > { %v2369_v18 = vsel %vm732_vm1, %v2366_v15, 0.0 }
0x1808   : > { %2370 = vadd.xlane.f32.xlu0 %v2369_v18 }
0x1895   : > { %v2371_v19 = vpop.xlane.xlu0 %2370 }
0x1896   : > { %v2372_v20 = vmul.f32 0.03125, %v2371_v19 }
0x1898   : > { %v2373_v22 = vsub.f32 %v2366_v15, %v2372_v20 }
0x189a   : > { %v2374_v23 = vmul.f32 %v2373_v22, %v2373_v22 }
0x189c   : > { %v2375_v24 = vsel %vm732_vm1, %v2374_v23, 0.0 }
0x189d   : > { %2376 = vadd.xlane.f32.xlu0 %v2375_v24 }
0x192a   : > { %v2377_v29 = vpop.xlane.xlu0 %2376 }
0x192b   : > { %v2378_v30 = vmul.f32 0.03125, %v2377_v29 }
0x192d   : > { %v2379_v31 = vadd.f32 1e-05, %v2378_v30 }
0x192f   : > { %2917 = vrsqrt.f32 %v2379_v31 }
0x1939   : > { %v2918_v32 = vpop.eup %2917 }
0x193a   : > { %v2381_v34 = vmul.f32 %v2918_v32, %v2373_v22 }
0x193c   : > { %v2388_v36 = vmul.f32 %v2587_v33, %v2381_v34 }
0x193e   : > { %v2395_v37 = vadd.f32 %v2588_v35, %v2388_v36 }
0x1940   : > { %v2396_v38 = vpack.c.bf16 %v2395_v37, %v2395_v37 }
0x1942   : > { %2851 = vmatmul.mubr.msk.bf16.vlgmr.msra.gmra.mrb[56].mxu1 %vm732_vm1, %v2396_v38 }
0x1a15   : > { %v2457_v49 = vpop.f32.mrb[56].mxu1 }
0x1a16   : > { %v2458_v39 = vadd.f32 %v2589_v1, %v2457_v49  ;;  %v2852_v40 = vpop.f32.mrb[57].mxu1 }
0x1a17   : > { %v2460_v41 = vpop.f32.mrb[58].mxu1 }
0x1a18   : > { %v2463_v42 = vadd.f32 %v2458_v39, %v3375_v57  ;;  %v2853_v43 = vpop.f32.mrb[59].mxu1 }
0x1a1a   : > { %2464 = vst.msk [vmem:[%s698_s6] sm:$0xff] %vm732_vm1, %v2463_v42 }
0x1a1b PF: > { %s32_s3 = sadd.s32 1, %s2925_s3  }
0x1a1c   : > { %p29_p4 = scmp.ge.s32.totalorder %s32_s3, 4  }
0x1a1e   :  { %31 = sbr.rel (!%p29_p4) target bundleno = 8 (0x8), region = 141 }

// kernel: table_decoder_fwd.13
= control target key start
LH: loop header
LB: loop body
LE: loop exit
PB: predicated region body
PF: predicated region fallthrough
CT: control target
= control target key end

     0   :  { %vm25_vm0 = vcmask 261120   ;;  %v190_v15 = vmov 0.0   ;;  %vm191_vm1 = vmmov 0   ;;  %s254_s0 = inlined_call_operand.vmem [shape: f32[16,32], index: 0, kind: input, shape index: {}]   ;;  %s255_s3 = inlined_call_operand.vmem [shape: bf16[32,128], index: 3, kind: input, shape index: {}]   ;;  %s256_s1 = inlined_call_operand.vmem [shape: f32[1,32], index: 1, kind: input, shape index: {}]   ;;  %s257_s2 = inlined_call_operand.vmem [shape: f32[1,32], index: 2, kind: input, shape index: {}]   ;;  %s258_s4 = inlined_call_operand.vmem [shape: f32[1,128], index: 4, kind: input, shape index: {}]   ;;  %s259_s5 = inlined_call_operand.vmem [shape: f32[16,128], index: 5, kind: output, shape index: {}]  }
   0x1   :  { %v21_v0 = vld [vmem:[%s254_s0] sm:$0xff]  ;;  %v22_v1 = vld [vmem:[%s254_s0 + $0x8] sm:$0xff]  ;;  %166 = vmatprep.subr.bf16.mxu0 %v190_v15  ;;  %170 = vmatprep.mubr.msk.bf16.mxu0 %vm191_vm1, %v190_v15 }
   0x2   :  { %v26_v2 = vsel %vm25_vm0, %v21_v0, 0.0  ;;  %v29_v3 = vsel %vm25_vm0, %v22_v1, 0.0  ;;  %v176_v14 = vld [vmem:[%s255_s3] sm:$0xff]   ;;  %v177_v16 = vld [vmem:[%s255_s3 + $0x8] sm:$0xff]  }
   0x3   :  { %27 = vadd.xlane.f32.xlu0 %v26_v2  ;;  %167 = vmatpush3.bf16.msra.mxu0 %v176_v14  ;;  %v155_v25 = vld [vmem:[%s256_s1] ss:$0 sm:$0xff] }
   0x4   :  { %168 = vmatprep.subr.bf16.mxu0 %v190_v15  ;;  %v156_v29 = vld [vmem:[%s257_s2] ss:$0 sm:$0xff] }
   0x5   :  { %v157_v34 = vld [vmem:[%s258_s4] ss:$0 sm:$0xff] }
   0x7   :  { %30 = vadd.xlane.f32.xlu0 %v29_v3  ;;  %169 = vmatpush3.bf16.msra.mxu0 %v177_v16 }
  0x90   :  { %v28_v4 = vpop.xlane.xlu0 %27 }
  0x91   :  { %v33_v5 = vmul.f32 0.03125, %v28_v4 }
  0x93   :  { %v35_v6 = vsub.f32 %v21_v0, %v33_v5 }
  0x94   :  { %v31_v7 = vpop.xlane.xlu0 %30 }
  0x95   :  { %v34_v8 = vmul.f32 0.03125, %v31_v7  ;;  %v37_v9 = vmul.f32 %v35_v6, %v35_v6 }
  0x97   :  { %v36_v10 = vsub.f32 %v22_v1, %v34_v8  ;;  %v39_v11 = vsel %vm25_vm0, %v37_v9, 0.0 }
  0x98   :  { %40 = vadd.xlane.f32.xlu1 %v39_v11 }
  0x99   :  { %v38_v12 = vmul.f32 %v36_v10, %v36_v10 }
  0x9b   :  { %v42_v13 = vsel %vm25_vm0, %v38_v12, 0.0 }
  0x9c   :  { %43 = vadd.xlane.f32.xlu1 %v42_v13 }
 0x125   :  { %v41_v17 = vpop.xlane.xlu1 %40 }
 0x126   :  { %v45_v18 = vmul.f32 0.03125, %v41_v17 }
 0x128   :  { %v47_v19 = vadd.f32 1e-05, %v45_v18 }
 0x129   :  { %v44_v20 = vpop.xlane.xlu1 %43 }
 0x12a   :  { %178 = vrsqrt.f32 %v47_v19  ;;  %v46_v21 = vmul.f32 0.03125, %v44_v20 }
 0x12c   :  { %v48_v22 = vadd.f32 1e-05, %v46_v21 }
 0x12e   :  { %180 = vrsqrt.f32 %v48_v22 }
 0x134   :  { %v179_v23 = vpop.eup %178 }
 0x135   :  { %v51_v24 = vmul.f32 %v179_v23, %v35_v6 }
 0x137   :  { %v59_v28 = vmul.f32 %v155_v25, %v51_v24 }
 0x138   :  { %v181_v26 = vpop.eup %180 }
 0x139   :  { %v52_v27 = vmul.f32 %v181_v26, %v36_v10  ;;  %v67_v31 = vadd.f32 %v156_v29, %v59_v28 }
 0x13b   :  { %v60_v30 = vmul.f32 %v155_v25, %v52_v27 }
 0x13d   :  { %v68_v32 = vadd.f32 %v156_v29, %v60_v30 }
 0x13f   :  { %v69_v33 = vpack.c.bf16 %v68_v32, %v67_v31 }
 0x141   :  { %171 = vmatmul.mubr.msk.bf16.vlgmr.msra.gmra.mrb[0].mxu0 %vm25_vm0, %v69_v33 }
 0x214   :  { %v130_v35 = vpop.f32.mrb[0].mxu0 }
 0x215   :  { %v131_v36 = vadd.f32 %v157_v34, %v130_v35  ;;  %v172_v37 = vpop.f32.mrb[1].mxu0 }
 0x216   :  { %v133_v38 = vpop.f32.mrb[2].mxu0 }
 0x217   :  { %v161_v39 = vmul.f32 -1.442695, %v131_v36  ;;  %v134_v40 = vadd.f32 %v157_v34, %v133_v38  ;;  %v173_v41 = vpop.f32.mrb[3].mxu0 }
 0x219   :  { %182 = vpow2.f32 %v161_v39  ;;  %v162_v42 = vmul.f32 -1.442695, %v134_v40 }
 0x21b   :  { %184 = vpow2.f32 %v162_v42 }
 0x223   :  { %v183_v43 = vpop.eup %182 }
 0x224   :  { %v143_v44 = vadd.f32 1.0, %v183_v43 }
 0x225   :  { %v185_v45 = vpop.eup %184 }
 0x226   :  { %186 = vrcp.f32 %v143_v44  ;;  %v144_v46 = vadd.f32 1.0, %v185_v45 }
 0x228   :  { %188 = vrcp.f32 %v144_v46 }
 0x230   :  { %v187_v47 = vpop.eup %186 }
 0x231   :  { %149 = vst [vmem:[%s259_s5] sm:$0xff] %v187_v47 }
 0x232   :  { %v189_v48 = vpop.eup %188 }
 0x233   :  { %150 = vst [vmem:[%s259_s5 + $0x8] sm:$0xff] %v189_v48 }

</bundles_post_ra>
